<compile_context>
chip_gen: v5e
topology: v5e:2x2
jax: 0.10.0
libtpu: 0.0.40
codegen_flags: <defaults>
</compile_context>

<pallas_src>
import functools

import jax
import jax.numpy as jnp
from jax import lax
from jax.experimental import pallas as pl
from jax.experimental.pallas import tpu as pltpu

_LN_EPS = 1e-6                # LayerNorm2d default
_TILE_BUDGET = 2 << 20        # ~2 MiB of tiled data per grid step (x2 for double buffering)
# Inter-kernel activations (u, h1, gated).  Set to jnp.bfloat16 to halve HBM
# traffic on bandwidth-bound shapes (test tolerance must then be loosened).
_ACT_DTYPE = jnp.float32


# --------------------------------------------------------------------------
# tile-size selection (VMEM byte budget)
# --------------------------------------------------------------------------
def _choose_cols(s, row_bytes, budget=_TILE_BUDGET):
    """Largest multiple-of-128 divisor of `s` whose tiled bytes fit the budget."""
    if s % 128 != 0:
        return s                          # full extent is always a legal block
    max_cols = max(128, (budget // max(row_bytes, 1)) // 128 * 128)
    best, cand = 128, 128
    while cand <= s:
        if s % cand == 0 and cand <= max_cols:
            best = cand
        cand += 128
    return best


def _choose_ch_tile(c, s, budget=_TILE_BUDGET):
    """Largest multiple-of-8 divisor of `c` whose (tile, S) working set fits."""
    cands = [d for d in range(8, c + 1, 8) if c % d == 0]
    assert cands, "channels-first kernels require C % 8 == 0"  # TODO(synk): pad C otherwise
    best = cands[0]
    for d in cands:
        if d * s * 4 * 4 <= budget:       # ~4 live f32 (d, S) arrays in the dw kernel
            best = d
    return best


def _parallel(n):
    return pltpu.CompilerParams(dimension_semantics=("parallel",) * n)


# --------------------------------------------------------------------------
# in-kernel helpers (channels-first: rows = channels, lanes = flattened H*W)
# --------------------------------------------------------------------------
def _layernorm_cf(x, g, b):
    # x: (C, ts); normalize over the channel (sublane) axis, per pixel.
    mu = jnp.mean(x, axis=0, keepdims=True)
    xc = x - mu
    var = jnp.mean(xc * xc, axis=0, keepdims=True)
    return xc * lax.rsqrt(var + _LN_EPS) * g + b


def _shift_cols(x, off):
    """out[..., s] = x[..., s + off], zero-filled past the row ends (static off)."""
    if off == 0:
        return x
    ch, _ = x.shape
    z = jnp.zeros((ch, abs(off)), x.dtype)
    if off > 0:
        return jnp.concatenate([x[:, off:], z], axis=1)
    return jnp.concatenate([z, x[:, :off]], axis=1)


def _dwconv3x3(x, k, bias, h, w):
    """3x3 depthwise conv (padding=1) on flattened (ch, H*W) images.

    The 1-pixel halo is handled in-kernel: zero-filled lane shifts cover the
    top/bottom image edges, an iota column mask covers left/right — no
    XLA-side pad.  k: (ch, 9) taps, index = (dy+1)*3 + (dx+1); bias: (ch, 1).
    """
    s = h * w
    col = lax.broadcasted_iota(jnp.int32, (1, s), 1) % w
    # x-shifted views, hoisted out of the dy loop (lane-axis shifts only).
    xs = (
        jnp.where(col >= 1, _shift_cols(x, -1), 0.0),       # dx = -1
        x,                                                  # dx =  0
        jnp.where(col <= w - 2, _shift_cols(x, 1), 0.0),    # dx = +1
    )
    out = bias + k[:, 3:4] * xs[0] + k[:, 4:5] * xs[1] + k[:, 5:6] * xs[2]   # dy = 0
    for dy in (-1, 1):
        t0 = 3 * (dy + 1)
        row = (k[:, t0:t0 + 1] * xs[0]
               + k[:, t0 + 1:t0 + 2] * xs[1]
               + k[:, t0 + 2:t0 + 3] * xs[2])
        out = out + _shift_cols(row, dy * w)                # zero fill = top/bottom halo
    return out


# --------------------------------------------------------------------------
# kernel bodies
# --------------------------------------------------------------------------
def _stage_a_kernel(x_ref, wf_ref, bf_ref, g1_ref, be1_ref, w1_ref, b1_ref,
                    u_ref, h1_ref):
    # subnet 1x1 conv + LayerNorm2d + conv1 (c -> 2c), fused.
    x = x_ref[0].astype(jnp.float32)                                       # (C, ts)
    u = jnp.dot(wf_ref[...], x, preferred_element_type=jnp.float32) + bf_ref[...]
    u_ref[0] = u.astype(u_ref.dtype)                                       # NAFBlock input / residual
    xn = _layernorm_cf(u, g1_ref[...], be1_ref[...])
    h1 = jnp.dot(w1_ref[...], xn, preferred_element_type=jnp.float32) + b1_ref[...]
    h1_ref[0] = h1.astype(h1_ref.dtype)


def _stage_b1_kernel(xa_ref, xb_ref, ka_ref, kb_ref, ba_ref, bb_ref,
                     g_ref, p_ref, *, h, w):
    # 3x3 depthwise conv + SimpleGate + SCA global average pool.
    da = _dwconv3x3(xa_ref[0].astype(jnp.float32), ka_ref[...], ba_ref[...], h, w)
    db = _dwconv3x3(xb_ref[0].astype(jnp.float32), kb_ref[...], bb_ref[...], h, w)
    g = da * db                                                            # SimpleGate
    g_ref[0] = g.astype(g_ref.dtype)
    p_ref[0] = jnp.mean(g, axis=1, keepdims=True)                          # (tc, 1) per batch


def _naf_tail(g_ref, p_ref, u_ref, w_refs):
    # SCA scale + conv3*beta + residual + LayerNorm2 + conv4 + SimpleGate
    # + conv5*gamma + residual, all on one (C, ts) tile.
    (scaw, scab, w3, b3, beta, g2, be2, w4, b4, w5, b5, gamma) = w_refs
    c = u_ref.shape[1]
    gated = g_ref[0].astype(jnp.float32)
    u = u_ref[0].astype(jnp.float32)
    sca = jnp.dot(scaw[...], p_ref[0], preferred_element_type=jnp.float32) + scab[...]
    y = u + beta[...] * (
        jnp.dot(w3[...], gated * sca, preferred_element_type=jnp.float32) + b3[...])
    f = jnp.dot(w4[...], _layernorm_cf(y, g2[...], be2[...]),
                preferred_element_type=jnp.float32) + b4[...]
    sg = f[:c] * f[c:]
    return y + gamma[...] * (
        jnp.dot(w5[...], sg, preferred_element_type=jnp.float32) + b5[...])


def _tail_kernel(g_ref, p_ref, u_ref, *rest):
    o_ref = rest[-1]
    o_ref[0] = _naf_tail(g_ref, p_ref, u_ref, rest[:-1]).astype(o_ref.dtype)


def _tail_res_kernel(g_ref, p_ref, u_ref, r_ref, *rest):
    # fused coupling residual:  y1 = x1 + NF(F(x2))
    o_ref = rest[-1]
    out = _naf_tail(g_ref, p_ref, u_ref, rest[:-1]) + r_ref[0].astype(jnp.float32)
    o_ref[0] = out.astype(o_ref.dtype)


def _tail_coupling_kernel(g_ref, p_ref, u_ref, x2_ref, hh_ref, *rest, clamp):
    # NG tail fused with the coupling: s = clamp*(2*sigmoid(hh)-1),
    # y2 = x2*exp(s) + NG(G(y1))  (sigmoid/exp land on the otherwise-idle EUP).
    s_ref, y2_ref = rest[-2], rest[-1]
    gg = _naf_tail(g_ref, p_ref, u_ref, rest[:-2])
    hh = hh_ref[0].astype(jnp.float32)
    s = clamp * (2.0 / (1.0 + jnp.exp(-hh)) - 1.0)
    s_ref[0] = s.astype(s_ref.dtype)
    y2_ref[0] = (x2_ref[0].astype(jnp.float32) * jnp.exp(s) + gg).astype(y2_ref.dtype)


# --------------------------------------------------------------------------
# stage launchers
# --------------------------------------------------------------------------
def _stage_a(x, subnet_p, naf_p):
    b, c, s = x.shape
    c2 = 2 * c
    ts = _choose_cols(s, 4 * c * 4)          # x, u (c rows each) + h1 (2c rows), f32
    dmap = lambda i, j: (i, 0, j)
    wmap = lambda i, j: (0, 0)
    return pl.pallas_call(
        _stage_a_kernel,
        grid=(b, s // ts),
        in_specs=[
            pl.BlockSpec((1, c, ts), dmap),
            pl.BlockSpec(subnet_p["w"].shape, wmap),
            pl.BlockSpec(subnet_p["b"].shape, wmap),
            pl.BlockSpec(naf_p["ln1_w"].shape, wmap),
            pl.BlockSpec(naf_p["ln1_b"].shape, wmap),
            pl.BlockSpec(naf_p["w1"].shape, wmap),
            pl.BlockSpec(naf_p["b1"].shape, wmap),
        ],
        out_specs=(pl.BlockSpec((1, c, ts), dmap), pl.BlockSpec((1, c2, ts), dmap)),
        out_shape=(jax.ShapeDtypeStruct((b, c, s), _ACT_DTYPE),
                   jax.ShapeDtypeStruct((b, c2, s), _ACT_DTYPE)),
        compiler_params=_parallel(2),
    )(x, subnet_p["w"], subnet_p["b"], naf_p["ln1_w"], naf_p["ln1_b"],
      naf_p["w1"], naf_p["b1"])


def _stage_b1(h1, naf_p, h, w):
    b, c2, s = h1.shape
    c = c2 // 2
    tc = _choose_ch_tile(c, s)
    nt = c // tc
    amap = lambda i, j: (i, j, 0)            # SimpleGate half 1: channels [j*tc, ...)
    bmap = lambda i, j: (i, j + nt, 0)       # SimpleGate half 2: channels [c + j*tc, ...)
    wamap = lambda i, j: (j, 0)
    wbmap = lambda i, j: (j + nt, 0)
    omap = lambda i, j: (i, j, 0)
    return pl.pallas_call(
        functools.partial(_stage_b1_kernel, h=h, w=w),
        grid=(b, nt),
        in_specs=[
            pl.BlockSpec((1, tc, s), amap),
            pl.BlockSpec((1, tc, s), bmap),
            pl.BlockSpec((tc, 9), wamap),
            pl.BlockSpec((tc, 9), wbmap),
            pl.BlockSpec((tc, 1), wamap),
            pl.BlockSpec((tc, 1), wbmap),
        ],
        out_specs=(pl.BlockSpec((1, tc, s), omap), pl.BlockSpec((1, tc, 1), omap)),
        out_shape=(jax.ShapeDtypeStruct((b, c, s), _ACT_DTYPE),
                   jax.ShapeDtypeStruct((b, c, 1), jnp.float32)),
        compiler_params=_parallel(2),
    )(h1, h1, naf_p["w2"], naf_p["w2"], naf_p["b2"], naf_p["b2"])


_TAIL_WEIGHT_NAMES = ("sca_w", "sca_b", "w3", "b3", "beta",
                      "ln2_w", "ln2_b", "w4", "b4", "w5", "b5", "gamma")


def _stage_b2(gated, pooled, u, naf_p, *, extra=None, coupling=None, clamp=1.0):
    b, c, s = u.shape
    rows = 3 * c + (c if extra is not None else 0) + (3 * c if coupling is not None else 0)
    ts = _choose_cols(s, rows * 4)
    dmap = lambda i, j: (i, 0, j)
    pmap = lambda i, j: (i, 0, 0)
    wmap = lambda i, j: (0, 0)
    dspec = pl.BlockSpec((1, c, ts), dmap)

    weights = [naf_p[k] for k in _TAIL_WEIGHT_NAMES]
    wspecs = [pl.BlockSpec(a.shape, wmap) for a in weights]

    args = [gated, pooled, u]
    dspecs = [dspec, pl.BlockSpec((1, c, 1), pmap), dspec]
    if coupling is not None:
        x2, hh = coupling
        args += [x2, hh]
        dspecs += [dspec, dspec]
        kernel = functools.partial(_tail_coupling_kernel, clamp=float(clamp))
        out_shape = (jax.ShapeDtypeStruct((b, c, s), jnp.float32),) * 2
        out_specs = (dspec, dspec)
    elif extra is not None:
        args += [extra]
        dspecs += [dspec]
        kernel = _tail_res_kernel
        out_shape = jax.ShapeDtypeStruct((b, c, s), jnp.float32)
        out_specs = dspec
    else:
        kernel = _tail_kernel
        out_shape = jax.ShapeDtypeStruct((b, c, s), jnp.float32)
        out_specs = dspec

    return pl.pallas_call(
        kernel,
        grid=(b, s // ts),
        in_specs=dspecs + wspecs,
        out_specs=out_specs,
        out_shape=out_shape,
        compiler_params=_parallel(2),
    )(*args, *weights)


# --------------------------------------------------------------------------
# module wrapper
# --------------------------------------------------------------------------
def invblock_forward(x1, x2, params, clamp=1.0):
    """InvBlock.forward with rev=False; returns (y1, y2, s) in NCHW.
    TODO(synk): the original iterates `for x2i in x2` (x2 as a list of tensors)
    and has a rev=True branch; here x2 is a single tensor and only the forward
    coupling is implemented."""
    b, c, h, w = x1.shape
    s = h * w
    x1f = x1.reshape(b, c, s)        # channels-first flattening only, no transpose
    x2f = x2.reshape(b, c, s)

    def naf(x_in, sub_p, naf_p, **kw):
        u, h1 = _stage_a(x_in, sub_p, naf_p)
        gated, pooled = _stage_b1(h1, naf_p, h, w)
        return _stage_b2(gated, pooled, u, naf_p, clamp=clamp, **kw)

    y1 = naf(x2f, params["F"], params["NF"], extra=x1f)        # y1 = x1 + NF(F(x2))
    hh = naf(y1, params["H"], params["NH"])                    # NH(H(y1))
    ss, y2 = naf(y1, params["G"], params["NG"], coupling=(x2f, hh))
    shp = (b, c, h, w)
    return y1.reshape(shp), y2.reshape(shp), ss.reshape(shp)


# --------------------------------------------------------------------------
# pure-JAX reference (NCHW, for correctness check)
# --------------------------------------------------------------------------
def _ln_ref(x, g, bb):
    mu = jnp.mean(x, axis=1, keepdims=True)
    var = jnp.mean((x - mu) ** 2, axis=1, keepdims=True)
    return (x - mu) / jnp.sqrt(var + _LN_EPS) * g.reshape(1, -1, 1, 1) + bb.reshape(1, -1, 1, 1)


def _pw_ref(x, w, bb):
    hp = lax.Precision.HIGHEST
    return jnp.einsum("oi,bihw->bohw", w, x, precision=hp) + bb.reshape(1, -1, 1, 1)


def nafblock_reference(x, p):
    hp = lax.Precision.HIGHEST
    c = x.shape[1]
    c2 = 2 * c
    t = _ln_ref(x, p["ln1_w"], p["ln1_b"])
    t = _pw_ref(t, p["w1"], p["b1"])
    kern = jnp.transpose(p["w2"].reshape(c2, 3, 3), (1, 2, 0))[:, :, None, :]
    t = lax.conv_general_dilated(t, kern, (1, 1), ((1, 1), (1, 1)),
                                 dimension_numbers=("NCHW", "HWIO", "NCHW"),
                                 feature_group_count=c2, precision=hp)
    t = t + p["b2"].reshape(1, -1, 1, 1)
    t = t[:, :c] * t[:, c:]
    pooled = jnp.mean(t, axis=(2, 3), keepdims=True)
    sca = (jnp.einsum("oi,bihw->bohw", p["sca_w"], pooled, precision=hp)
           + p["sca_b"].reshape(1, -1, 1, 1))
    t = t * sca
    t = _pw_ref(t, p["w3"], p["b3"])
    y = x + t * p["beta"].reshape(1, -1, 1, 1)
    t = _ln_ref(y, p["ln2_w"], p["ln2_b"])
    t = _pw_ref(t, p["w4"], p["b4"])
    t = t[:, :c] * t[:, c:]
    t = _pw_ref(t, p["w5"], p["b5"])
    return y + t * p["gamma"].reshape(1, -1, 1, 1)


def invblock_reference(x1, x2, params, clamp=1.0):
    def pw(t, sp):
        return _pw_ref(t, sp["w"], sp["b"])
    y1 = x1 + nafblock_reference(pw(x2, params["F"]), params["NF"])
    s = clamp * (jax.nn.sigmoid(nafblock_reference(pw(y1, params["H"]), params["NH"])) * 2.0 - 1.0)
    y2 = x2 * jnp.exp(s) + nafblock_reference(pw(y1, params["G"]), params["NG"])
    return y1, y2, s


# --------------------------------------------------------------------------
if __name__ == "__main__":
    B, C, H, W = 2, 8, 16, 16          # channel_num_ho == channel_num_hi == 8
    CLAMP = 1.0

    keys = iter(jax.random.split(jax.random.PRNGKey(0), 96))

    def rnd(shape, scale=0.2):
        return scale * jax.random.normal(next(keys), shape, jnp.float32)

    def naf_params(c):
        # beta/gamma are zero-initialized in PyTorch; randomized here so the
        # test exercises every branch of the block.
        return {
            "ln1_w": jnp.ones((c, 1), jnp.float32) + rnd((c, 1), 0.05),
            "ln1_b": rnd((c, 1), 0.05),
            "w1": rnd((2 * c, c)), "b1": rnd((2 * c, 1), 0.05),
            "w2": rnd((2 * c, 9)), "b2": rnd((2 * c, 1), 0.05),
            "sca_w": rnd((c, c)), "sca_b": rnd((c, 1), 0.05),
            "w3": rnd((c, c)), "b3": rnd((c, 1), 0.05),
            "beta": rnd((c, 1), 0.5),
            "ln2_w": jnp.ones((c, 1), jnp.float32) + rnd((c, 1), 0.05),
            "ln2_b": rnd((c, 1), 0.05),
            "w4": rnd((2 * c, c)), "b4": rnd((2 * c, 1), 0.05),
            "w5": rnd((c, c)), "b5": rnd((c, 1), 0.05),
            "gamma": rnd((c, 1), 0.5),
        }

    def subnet_params(c_in, c_out):
        # TODO(synk): subnet_constructor / subnet_constructor_v2 (F/G/H bodies)
        # are injected dependencies not defined in the spec; a biased 1x1 conv
        # with the required channel mapping is the stand-in.
        return {"w": rnd((c_out, c_in)), "b": rnd((c_out, 1), 0.05)}

    params = {
        "F": subnet_params(C, C), "NF": naf_params(C),
        "H": subnet_params(C, C), "NH": naf_params(C),
        "G": subnet_params(C, C), "NG": naf_params(C),
    }
    x1 = jax.random.normal(next(keys), (B, C, H, W), jnp.float32)
    x2 = jax.random.normal(next(keys), (B, C, H, W), jnp.float32)

    fwd = jax.jit(functools.partial(invblock_forward, clamp=CLAMP))
    y1, y2, s = jax.block_until_ready(fwd(x1, x2, params))

    r1, r2, rs = invblock_reference(x1, x2, params, clamp=CLAMP)
    for name, got, ref in (("y1", y1, r1), ("y2", y2, r2), ("s", s, rs)):
        assert got.shape == ref.shape, (name, got.shape, ref.shape)
        err = float(jnp.max(jnp.abs(got - ref)))
        assert err < 2e-3, f"{name} mismatch vs reference: max abs err {err}"
    print("KERNEL_OK")
</pallas_src>

<mosaic_0001>
module attributes {stable_mosaic.version = 11 : i64} {
  func.func @_stage_b1_kernel(%arg0: i32, %arg1: i32, %arg2: memref<1x8x256xf32, #tpu.memory_space<vmem>>, %arg3: memref<1x8x256xf32, #tpu.memory_space<vmem>>, %arg4: memref<8x9xf32, #tpu.memory_space<vmem>>, %arg5: memref<8x9xf32, #tpu.memory_space<vmem>>, %arg6: memref<8x1xf32, #tpu.memory_space<vmem>>, %arg7: memref<8x1xf32, #tpu.memory_space<vmem>>, %arg8: memref<1x8x256xf32, #tpu.memory_space<vmem>>, %arg9: memref<1x8x1xf32, #tpu.memory_space<vmem>>) attributes {dimension_semantics = [#tpu.dimension_semantics<parallel>, #tpu.dimension_semantics<parallel>], iteration_bounds = array<i64: 2, 1>, scalar_prefetch = 0 : i64, scratch_operands = 0 : i64, tpu.core_type = #tpu.core_type<tc>, window_params = [{transform_indices = @transform_0, window_bounds = array<i64: 1, 8, 256>}, {transform_indices = @transform_1, window_bounds = array<i64: 1, 8, 256>}, {transform_indices = @transform_2, window_bounds = array<i64: 8, 9>}, {transform_indices = @transform_3, window_bounds = array<i64: 8, 9>}, {transform_indices = @transform_4, window_bounds = array<i64: 8, 1>}, {transform_indices = @transform_5, window_bounds = array<i64: 8, 1>}, {transform_indices = @transform_6, window_bounds = array<i64: 1, 8, 256>}, {transform_indices = @transform_7, window_bounds = array<i64: 1, 8, 1>}]} {
    %c0 = arith.constant 0 : index
    %c0_0 = arith.constant 0 : index
    %c0_1 = arith.constant 0 : index
    %0 = vector.load %arg2[%c0, %c0_0, %c0_1] : memref<1x8x256xf32, #tpu.memory_space<vmem>>, vector<1x8x256xf32>
    %1 = vector.shape_cast %0 : vector<1x8x256xf32> to vector<8x256xf32>
    %c0_2 = arith.constant 0 : index
    %c0_3 = arith.constant 0 : index
    %2 = vector.load %arg4[%c0_2, %c0_3] : memref<8x9xf32, #tpu.memory_space<vmem>>, vector<8x9xf32>
    %c0_4 = arith.constant 0 : index
    %c0_5 = arith.constant 0 : index
    %3 = vector.load %arg6[%c0_4, %c0_5] : memref<8x1xf32, #tpu.memory_space<vmem>>, vector<8x1xf32>
    %4 = tpu.iota {dimensions = array<i32: 1>} : vector<1x256xi32>
    %c16_i32 = arith.constant 16 : i32
    %c0_i32 = arith.constant 0 : i32
    %5 = arith.cmpi eq, %c16_i32, %c0_i32 : i32
    %c1_i32 = arith.constant 1 : i32
    %6 = arith.select %5, %c1_i32, %c16_i32 : i32
    %7 = vector.broadcast %6 : i32 to vector<1x256xi32>
    %8 = arith.remsi %4, %7 : vector<1x256xi32>
    %c0_i32_6 = arith.constant 0 : i32
    %9 = vector.broadcast %c0_i32_6 : i32 to vector<1x256xi32>
    %10 = arith.cmpi ne, %8, %9 : vector<1x256xi32>
    %c0_i32_7 = arith.constant 0 : i32
    %11 = vector.broadcast %c0_i32_7 : i32 to vector<1x256xi32>
    %12 = arith.cmpi slt, %8, %11 : vector<1x256xi32>
    %c0_i32_8 = arith.constant 0 : i32
    %13 = arith.cmpi slt, %6, %c0_i32_8 : i32
    %14 = vector.broadcast %13 : i1 to vector<1x256xi1>
    %15 = vector.broadcast %14 : vector<1x256xi1> to vector<1x256xi1>
    %16 = arith.xori %12, %15 : vector<1x256xi1>
    %17 = arith.andi %16, %10 : vector<1x256xi1>
    %18 = vector.broadcast %6 : i32 to vector<1x256xi32>
    %19 = arith.addi %8, %18 : vector<1x256xi32>
    %20 = arith.select %17, %19, %8 : vector<1x256xi1>, vector<1x256xi32>
    %c1_i32_9 = arith.constant 1 : i32
    %21 = vector.broadcast %c1_i32_9 : i32 to vector<1x256xi32>
    %22 = arith.cmpi sge, %20, %21 : vector<1x256xi32>
    %cst = arith.constant 0.000000e+00 : f32
    %23 = vector.broadcast %cst : f32 to vector<8x1xf32>
    %24 = vector.extract_strided_slice %1 {offsets = [0, 0], sizes = [8, 255], strides = [1, 1]} : vector<8x256xf32> to vector<8x255xf32>
    %25 = tpu.concatenate %23, %24 in 1 : vector<8x1xf32>, vector<8x255xf32> -> vector<8x256xf32>
    %cst_10 = arith.constant 0.000000e+00 : f32
    %26 = vector.shape_cast %22 : vector<1x256xi1> to vector<1x256xi1>
    %27 = vector.broadcast %26 : vector<1x256xi1> to vector<8x256xi1>
    %28 = vector.broadcast %cst_10 : f32 to vector<8x256xf32>
    %29 = arith.select %27, %25, %28 : vector<8x256xi1>, vector<8x256xf32>
    %c14_i32 = arith.constant 14 : i32
    %30 = vector.broadcast %c14_i32 : i32 to vector<1x256xi32>
    %31 = arith.cmpi sle, %20, %30 : vector<1x256xi32>
    %cst_11 = arith.constant 0.000000e+00 : f32
    %32 = vector.broadcast %cst_11 : f32 to vector<8x1xf32>
    %33 = vector.extract_strided_slice %1 {offsets = [0, 1], sizes = [8, 255], strides = [1, 1]} : vector<8x256xf32> to vector<8x255xf32>
    %34 = tpu.concatenate %33, %32 in 1 : vector<8x255xf32>, vector<8x1xf32> -> vector<8x256xf32>
    %cst_12 = arith.constant 0.000000e+00 : f32
    %35 = vector.shape_cast %31 : vector<1x256xi1> to vector<1x256xi1>
    %36 = vector.broadcast %35 : vector<1x256xi1> to vector<8x256xi1>
    %37 = vector.broadcast %cst_12 : f32 to vector<8x256xf32>
    %38 = arith.select %36, %34, %37 : vector<8x256xi1>, vector<8x256xf32>
    %39 = vector.extract_strided_slice %2 {offsets = [0, 3], sizes = [8, 1], strides = [1, 1]} : vector<8x9xf32> to vector<8x1xf32>
    %40 = vector.broadcast %39 : vector<8x1xf32> to vector<8x256xf32>
    %41 = arith.mulf %40, %29 : vector<8x256xf32>
    %42 = vector.broadcast %3 : vector<8x1xf32> to vector<8x256xf32>
    %43 = arith.addf %42, %41 : vector<8x256xf32>
    %44 = vector.extract_strided_slice %2 {offsets = [0, 4], sizes = [8, 1], strides = [1, 1]} : vector<8x9xf32> to vector<8x1xf32>
    %45 = vector.broadcast %44 : vector<8x1xf32> to vector<8x256xf32>
    %46 = arith.mulf %45, %1 : vector<8x256xf32>
    %47 = arith.addf %43, %46 : vector<8x256xf32>
    %48 = vector.extract_strided_slice %2 {offsets = [0, 5], sizes = [8, 1], strides = [1, 1]} : vector<8x9xf32> to vector<8x1xf32>
    %49 = vector.broadcast %48 : vector<8x1xf32> to vector<8x256xf32>
    %50 = arith.mulf %49, %38 : vector<8x256xf32>
    %51 = arith.addf %47, %50 : vector<8x256xf32>
    %52 = vector.extract_strided_slice %2 {offsets = [0, 0], sizes = [8, 1], strides = [1, 1]} : vector<8x9xf32> to vector<8x1xf32>
    %53 = vector.broadcast %52 : vector<8x1xf32> to vector<8x256xf32>
    %54 = arith.mulf %53, %29 : vector<8x256xf32>
    %55 = vector.extract_strided_slice %2 {offsets = [0, 1], sizes = [8, 1], strides = [1, 1]} : vector<8x9xf32> to vector<8x1xf32>
    %56 = vector.broadcast %55 : vector<8x1xf32> to vector<8x256xf32>
    %57 = arith.mulf %56, %1 : vector<8x256xf32>
    %58 = arith.addf %54, %57 : vector<8x256xf32>
    %59 = vector.extract_strided_slice %2 {offsets = [0, 2], sizes = [8, 1], strides = [1, 1]} : vector<8x9xf32> to vector<8x1xf32>
    %60 = vector.broadcast %59 : vector<8x1xf32> to vector<8x256xf32>
    %61 = arith.mulf %60, %38 : vector<8x256xf32>
    %62 = arith.addf %58, %61 : vector<8x256xf32>
    %cst_13 = arith.constant 0.000000e+00 : f32
    %63 = vector.broadcast %cst_13 : f32 to vector<8x16xf32>
    %64 = vector.extract_strided_slice %62 {offsets = [0, 0], sizes = [8, 240], strides = [1, 1]} : vector<8x256xf32> to vector<8x240xf32>
    %65 = tpu.concatenate %63, %64 in 1 : vector<8x16xf32>, vector<8x240xf32> -> vector<8x256xf32>
    %66 = arith.addf %51, %65 : vector<8x256xf32>
    %67 = vector.extract_strided_slice %2 {offsets = [0, 6], sizes = [8, 1], strides = [1, 1]} : vector<8x9xf32> to vector<8x1xf32>
    %68 = vector.broadcast %67 : vector<8x1xf32> to vector<8x256xf32>
    %69 = arith.mulf %68, %29 : vector<8x256xf32>
    %70 = vector.extract_strided_slice %2 {offsets = [0, 7], sizes = [8, 1], strides = [1, 1]} : vector<8x9xf32> to vector<8x1xf32>
    %71 = vector.broadcast %70 : vector<8x1xf32> to vector<8x256xf32>
    %72 = arith.mulf %71, %1 : vector<8x256xf32>
    %73 = arith.addf %69, %72 : vector<8x256xf32>
    %74 = vector.extract_strided_slice %2 {offsets = [0, 8], sizes = [8, 1], strides = [1, 1]} : vector<8x9xf32> to vector<8x1xf32>
    %75 = vector.broadcast %74 : vector<8x1xf32> to vector<8x256xf32>
    %76 = arith.mulf %75, %38 : vector<8x256xf32>
    %77 = arith.addf %73, %76 : vector<8x256xf32>
    %cst_14 = arith.constant 0.000000e+00 : f32
    %78 = vector.broadcast %cst_14 : f32 to vector<8x16xf32>
    %79 = vector.extract_strided_slice %77 {offsets = [0, 16], sizes = [8, 240], strides = [1, 1]} : vector<8x256xf32> to vector<8x240xf32>
    %80 = tpu.concatenate %79, %78 in 1 : vector<8x240xf32>, vector<8x16xf32> -> vector<8x256xf32>
    %81 = arith.addf %66, %80 : vector<8x256xf32>
    %c0_15 = arith.constant 0 : index
    %c0_16 = arith.constant 0 : index
    %c0_17 = arith.constant 0 : index
    %82 = vector.load %arg3[%c0_15, %c0_16, %c0_17] : memref<1x8x256xf32, #tpu.memory_space<vmem>>, vector<1x8x256xf32>
    %83 = vector.shape_cast %82 : vector<1x8x256xf32> to vector<8x256xf32>
    %c0_18 = arith.constant 0 : index
    %c0_19 = arith.constant 0 : index
    %84 = vector.load %arg5[%c0_18, %c0_19] : memref<8x9xf32, #tpu.memory_space<vmem>>, vector<8x9xf32>
    %c0_20 = arith.constant 0 : index
    %c0_21 = arith.constant 0 : index
    %85 = vector.load %arg7[%c0_20, %c0_21] : memref<8x1xf32, #tpu.memory_space<vmem>>, vector<8x1xf32>
    %86 = tpu.iota {dimensions = array<i32: 1>} : vector<1x256xi32>
    %c16_i32_22 = arith.constant 16 : i32
    %c0_i32_23 = arith.constant 0 : i32
    %87 = arith.cmpi eq, %c16_i32_22, %c0_i32_23 : i32
    %c1_i32_24 = arith.constant 1 : i32
    %88 = arith.select %87, %c1_i32_24, %c16_i32_22 : i32
    %89 = vector.broadcast %88 : i32 to vector<1x256xi32>
    %90 = arith.remsi %86, %89 : vector<1x256xi32>
    %c0_i32_25 = arith.constant 0 : i32
    %91 = vector.broadcast %c0_i32_25 : i32 to vector<1x256xi32>
    %92 = arith.cmpi ne, %90, %91 : vector<1x256xi32>
    %c0_i32_26 = arith.constant 0 : i32
    %93 = vector.broadcast %c0_i32_26 : i32 to vector<1x256xi32>
    %94 = arith.cmpi slt, %90, %93 : vector<1x256xi32>
    %c0_i32_27 = arith.constant 0 : i32
    %95 = arith.cmpi slt, %88, %c0_i32_27 : i32
    %96 = vector.broadcast %95 : i1 to vector<1x256xi1>
    %97 = vector.broadcast %96 : vector<1x256xi1> to vector<1x256xi1>
    %98 = arith.xori %94, %97 : vector<1x256xi1>
    %99 = arith.andi %98, %92 : vector<1x256xi1>
    %100 = vector.broadcast %88 : i32 to vector<1x256xi32>
    %101 = arith.addi %90, %100 : vector<1x256xi32>
    %102 = arith.select %99, %101, %90 : vector<1x256xi1>, vector<1x256xi32>
    %c1_i32_28 = arith.constant 1 : i32
    %103 = vector.broadcast %c1_i32_28 : i32 to vector<1x256xi32>
    %104 = arith.cmpi sge, %102, %103 : vector<1x256xi32>
    %cst_29 = arith.constant 0.000000e+00 : f32
    %105 = vector.broadcast %cst_29 : f32 to vector<8x1xf32>
    %106 = vector.extract_strided_slice %83 {offsets = [0, 0], sizes = [8, 255], strides = [1, 1]} : vector<8x256xf32> to vector<8x255xf32>
    %107 = tpu.concatenate %105, %106 in 1 : vector<8x1xf32>, vector<8x255xf32> -> vector<8x256xf32>
    %cst_30 = arith.constant 0.000000e+00 : f32
    %108 = vector.shape_cast %104 : vector<1x256xi1> to vector<1x256xi1>
    %109 = vector.broadcast %108 : vector<1x256xi1> to vector<8x256xi1>
    %110 = vector.broadcast %cst_30 : f32 to vector<8x256xf32>
    %111 = arith.select %109, %107, %110 : vector<8x256xi1>, vector<8x256xf32>
    %c14_i32_31 = arith.constant 14 : i32
    %112 = vector.broadcast %c14_i32_31 : i32 to vector<1x256xi32>
    %113 = arith.cmpi sle, %102, %112 : vector<1x256xi32>
    %cst_32 = arith.constant 0.000000e+00 : f32
    %114 = vector.broadcast %cst_32 : f32 to vector<8x1xf32>
    %115 = vector.extract_strided_slice %83 {offsets = [0, 1], sizes = [8, 255], strides = [1, 1]} : vector<8x256xf32> to vector<8x255xf32>
    %116 = tpu.concatenate %115, %114 in 1 : vector<8x255xf32>, vector<8x1xf32> -> vector<8x256xf32>
    %cst_33 = arith.constant 0.000000e+00 : f32
    %117 = vector.shape_cast %113 : vector<1x256xi1> to vector<1x256xi1>
    %118 = vector.broadcast %117 : vector<1x256xi1> to vector<8x256xi1>
    %119 = vector.broadcast %cst_33 : f32 to vector<8x256xf32>
    %120 = arith.select %118, %116, %119 : vector<8x256xi1>, vector<8x256xf32>
    %121 = vector.extract_strided_slice %84 {offsets = [0, 3], sizes = [8, 1], strides = [1, 1]} : vector<8x9xf32> to vector<8x1xf32>
    %122 = vector.broadcast %121 : vector<8x1xf32> to vector<8x256xf32>
    %123 = arith.mulf %122, %111 : vector<8x256xf32>
    %124 = vector.broadcast %85 : vector<8x1xf32> to vector<8x256xf32>
    %125 = arith.addf %124, %123 : vector<8x256xf32>
    %126 = vector.extract_strided_slice %84 {offsets = [0, 4], sizes = [8, 1], strides = [1, 1]} : vector<8x9xf32> to vector<8x1xf32>
    %127 = vector.broadcast %126 : vector<8x1xf32> to vector<8x256xf32>
    %128 = arith.mulf %127, %83 : vector<8x256xf32>
    %129 = arith.addf %125, %128 : vector<8x256xf32>
    %130 = vector.extract_strided_slice %84 {offsets = [0, 5], sizes = [8, 1], strides = [1, 1]} : vector<8x9xf32> to vector<8x1xf32>
    %131 = vector.broadcast %130 : vector<8x1xf32> to vector<8x256xf32>
    %132 = arith.mulf %131, %120 : vector<8x256xf32>
    %133 = arith.addf %129, %132 : vector<8x256xf32>
    %134 = vector.extract_strided_slice %84 {offsets = [0, 0], sizes = [8, 1], strides = [1, 1]} : vector<8x9xf32> to vector<8x1xf32>
    %135 = vector.broadcast %134 : vector<8x1xf32> to vector<8x256xf32>
    %136 = arith.mulf %135, %111 : vector<8x256xf32>
    %137 = vector.extract_strided_slice %84 {offsets = [0, 1], sizes = [8, 1], strides = [1, 1]} : vector<8x9xf32> to vector<8x1xf32>
    %138 = vector.broadcast %137 : vector<8x1xf32> to vector<8x256xf32>
    %139 = arith.mulf %138, %83 : vector<8x256xf32>
    %140 = arith.addf %136, %139 : vector<8x256xf32>
    %141 = vector.extract_strided_slice %84 {offsets = [0, 2], sizes = [8, 1], strides = [1, 1]} : vector<8x9xf32> to vector<8x1xf32>
    %142 = vector.broadcast %141 : vector<8x1xf32> to vector<8x256xf32>
    %143 = arith.mulf %142, %120 : vector<8x256xf32>
    %144 = arith.addf %140, %143 : vector<8x256xf32>
    %cst_34 = arith.constant 0.000000e+00 : f32
    %145 = vector.broadcast %cst_34 : f32 to vector<8x16xf32>
    %146 = vector.extract_strided_slice %144 {offsets = [0, 0], sizes = [8, 240], strides = [1, 1]} : vector<8x256xf32> to vector<8x240xf32>
    %147 = tpu.concatenate %145, %146 in 1 : vector<8x16xf32>, vector<8x240xf32> -> vector<8x256xf32>
    %148 = arith.addf %133, %147 : vector<8x256xf32>
    %149 = vector.extract_strided_slice %84 {offsets = [0, 6], sizes = [8, 1], strides = [1, 1]} : vector<8x9xf32> to vector<8x1xf32>
    %150 = vector.broadcast %149 : vector<8x1xf32> to vector<8x256xf32>
    %151 = arith.mulf %150, %111 : vector<8x256xf32>
    %152 = vector.extract_strided_slice %84 {offsets = [0, 7], sizes = [8, 1], strides = [1, 1]} : vector<8x9xf32> to vector<8x1xf32>
    %153 = vector.broadcast %152 : vector<8x1xf32> to vector<8x256xf32>
    %154 = arith.mulf %153, %83 : vector<8x256xf32>
    %155 = arith.addf %151, %154 : vector<8x256xf32>
    %156 = vector.extract_strided_slice %84 {offsets = [0, 8], sizes = [8, 1], strides = [1, 1]} : vector<8x9xf32> to vector<8x1xf32>
    %157 = vector.broadcast %156 : vector<8x1xf32> to vector<8x256xf32>
    %158 = arith.mulf %157, %120 : vector<8x256xf32>
    %159 = arith.addf %155, %158 : vector<8x256xf32>
    %cst_35 = arith.constant 0.000000e+00 : f32
    %160 = vector.broadcast %cst_35 : f32 to vector<8x16xf32>
    %161 = vector.extract_strided_slice %159 {offsets = [0, 16], sizes = [8, 240], strides = [1, 1]} : vector<8x256xf32> to vector<8x240xf32>
    %162 = tpu.concatenate %161, %160 in 1 : vector<8x240xf32>, vector<8x16xf32> -> vector<8x256xf32>
    %163 = arith.addf %148, %162 : vector<8x256xf32>
    %164 = arith.mulf %81, %163 : vector<8x256xf32>
    %c0_36 = arith.constant 0 : index
    %c0_37 = arith.constant 0 : index
    %c0_38 = arith.constant 0 : index
    %165 = vector.load %arg8[%c0_36, %c0_37, %c0_38] : memref<1x8x256xf32, #tpu.memory_space<vmem>>, vector<1x8x256xf32>
    %166 = vector.shape_cast %165 : vector<1x8x256xf32> to vector<8x256xf32>
    %167 = vector.shape_cast %164 : vector<8x256xf32> to vector<1x8x256xf32>
    tpu.vector_store %arg8[%c0_36, %c0_37, %c0_38], %167 {strides = array<i32>} : memref<1x8x256xf32, #tpu.memory_space<vmem>>, vector<1x8x256xf32>,
    %cst_39 = arith.constant dense<0.000000e+00> : vector<8xf32>
    %168 = vector.multi_reduction <add>, %164, %cst_39 [1] : vector<8x256xf32> to vector<8xf32>
    %169 = vector.shape_cast %168 : vector<8xf32> to vector<8x1xf32>
    %cst_40 = arith.constant 2.560000e+02 : f32
    %170 = vector.broadcast %cst_40 : f32 to vector<8x1xf32>
    %171 = arith.divf %169, %170 : vector<8x1xf32>
    %c0_41 = arith.constant 0 : index
    %c0_42 = arith.constant 0 : index
    %c0_43 = arith.constant 0 : index
    %172 = vector.load %arg9[%c0_41, %c0_42, %c0_43] : memref<1x8x1xf32, #tpu.memory_space<vmem>>, vector<1x8x1xf32>
    %173 = vector.shape_cast %172 : vector<1x8x1xf32> to vector<8x1xf32>
    %174 = vector.shape_cast %171 : vector<8x1xf32> to vector<1x8x1xf32>
    tpu.vector_store %arg9[%c0_41, %c0_42, %c0_43], %174 {strides = array<i32>} : memref<1x8x1xf32, #tpu.memory_space<vmem>>, vector<1x8x1xf32>,
    return
  }
  func.func @transform_0(%arg0: i32, %arg1: i32) -> (i32, i32, i32) {
    %c0_i32 = arith.constant 0 : i32
    %c0_i32_0 = arith.constant 0 : i32
    return %arg0, %arg1, %c0_i32 : i32, i32, i32
  }
  func.func @transform_1(%arg0: i32, %arg1: i32) -> (i32, i32, i32) {
    %c1_i32 = arith.constant 1 : i32
    %0 = arith.addi %arg1, %c1_i32 : i32
    %c0_i32 = arith.constant 0 : i32
    %c0_i32_0 = arith.constant 0 : i32
    return %arg0, %0, %c0_i32 : i32, i32, i32
  }
  func.func @transform_2(%arg0: i32, %arg1: i32) -> (i32, i32) {
    %c0_i32 = arith.constant 0 : i32
    %c0_i32_0 = arith.constant 0 : i32
    return %arg1, %c0_i32 : i32, i32
  }
  func.func @transform_3(%arg0: i32, %arg1: i32) -> (i32, i32) {
    %c1_i32 = arith.constant 1 : i32
    %0 = arith.addi %arg1, %c1_i32 : i32
    %c0_i32 = arith.constant 0 : i32
    %c0_i32_0 = arith.constant 0 : i32
    return %0, %c0_i32 : i32, i32
  }
  func.func @transform_4(%arg0: i32, %arg1: i32) -> (i32, i32) {
    %c0_i32 = arith.constant 0 : i32
    %c0_i32_0 = arith.constant 0 : i32
    return %arg1, %c0_i32 : i32, i32
  }
  func.func @transform_5(%arg0: i32, %arg1: i32) -> (i32, i32) {
    %c1_i32 = arith.constant 1 : i32
    %0 = arith.addi %arg1, %c1_i32 : i32
    %c0_i32 = arith.constant 0 : i32
    %c0_i32_0 = arith.constant 0 : i32
    return %0, %c0_i32 : i32, i32
  }
  func.func @transform_6(%arg0: i32, %arg1: i32) -> (i32, i32, i32) {
    %c0_i32 = arith.constant 0 : i32
    %c0_i32_0 = arith.constant 0 : i32
    return %arg0, %arg1, %c0_i32 : i32, i32, i32
  }
  func.func @transform_7(%arg0: i32, %arg1: i32) -> (i32, i32, i32) {
    %c0_i32 = arith.constant 0 : i32
    %c0_i32_0 = arith.constant 0 : i32
    return %arg0, %arg1, %c0_i32 : i32, i32, i32
  }
}

module attributes {stable_mosaic.version = 11 : i64} {
  func.func @_stage_a_kernel(%arg0: i32, %arg1: i32, %arg2: memref<1x8x256xf32, #tpu.memory_space<vmem>>, %arg3: memref<8x8xf32, #tpu.memory_space<vmem>>, %arg4: memref<8x1xf32, #tpu.memory_space<vmem>>, %arg5: memref<8x1xf32, #tpu.memory_space<vmem>>, %arg6: memref<8x1xf32, #tpu.memory_space<vmem>>, %arg7: memref<16x8xf32, #tpu.memory_space<vmem>>, %arg8: memref<16x1xf32, #tpu.memory_space<vmem>>, %arg9: memref<1x8x256xf32, #tpu.memory_space<vmem>>, %arg10: memref<1x16x256xf32, #tpu.memory_space<vmem>>) attributes {dimension_semantics = [#tpu.dimension_semantics<parallel>, #tpu.dimension_semantics<parallel>], iteration_bounds = array<i64: 2, 1>, scalar_prefetch = 0 : i64, scratch_operands = 0 : i64, tpu.core_type = #tpu.core_type<tc>, window_params = [{transform_indices = @transform_0, window_bounds = array<i64: 1, 8, 256>}, {pipeline_mode = #tpu.pipeline_mode<synchronous>, transform_indices = @transform_1, window_bounds = array<i64: 8, 8>}, {pipeline_mode = #tpu.pipeline_mode<synchronous>, transform_indices = @transform_2, window_bounds = array<i64: 8, 1>}, {pipeline_mode = #tpu.pipeline_mode<synchronous>, transform_indices = @transform_3, window_bounds = array<i64: 8, 1>}, {pipeline_mode = #tpu.pipeline_mode<synchronous>, transform_indices = @transform_4, window_bounds = array<i64: 8, 1>}, {pipeline_mode = #tpu.pipeline_mode<synchronous>, transform_indices = @transform_5, window_bounds = array<i64: 16, 8>}, {pipeline_mode = #tpu.pipeline_mode<synchronous>, transform_indices = @transform_6, window_bounds = array<i64: 16, 1>}, {transform_indices = @transform_7, window_bounds = array<i64: 1, 8, 256>}, {transform_indices = @transform_8, window_bounds = array<i64: 1, 16, 256>}]} {
    %c0 = arith.constant 0 : index
    %c0_0 = arith.constant 0 : index
    %c0_1 = arith.constant 0 : index
    %0 = vector.load %arg2[%c0, %c0_0, %c0_1] : memref<1x8x256xf32, #tpu.memory_space<vmem>>, vector<1x8x256xf32>
    %1 = vector.shape_cast %0 : vector<1x8x256xf32> to vector<8x256xf32>
    %c0_2 = arith.constant 0 : index
    %c0_3 = arith.constant 0 : index
    %2 = vector.load %arg3[%c0_2, %c0_3] : memref<8x8xf32, #tpu.memory_space<vmem>>, vector<8x8xf32>
    %cst = arith.constant dense<0.000000e+00> : vector<8x256xf32>
    %3 = tpu.matmul %2, %1, %cst {dimension_numbers = #tpu.dot_dimension_numbers<[1], [0], [0], [1], [0, 0, 1, 1], [], []>} : vector<8x8xf32>, vector<8x256xf32>, vector<8x256xf32> -> vector<8x256xf32>
    %c0_4 = arith.constant 0 : index
    %c0_5 = arith.constant 0 : index
    %4 = vector.load %arg4[%c0_4, %c0_5] : memref<8x1xf32, #tpu.memory_space<vmem>>, vector<8x1xf32>
    %5 = vector.broadcast %4 : vector<8x1xf32> to vector<8x256xf32>
    %6 = arith.addf %3, %5 : vector<8x256xf32>
    %c0_6 = arith.constant 0 : index
    %c0_7 = arith.constant 0 : index
    %c0_8 = arith.constant 0 : index
    %7 = vector.load %arg9[%c0_6, %c0_7, %c0_8] : memref<1x8x256xf32, #tpu.memory_space<vmem>>, vector<1x8x256xf32>
    %8 = vector.shape_cast %7 : vector<1x8x256xf32> to vector<8x256xf32>
    %9 = vector.shape_cast %6 : vector<8x256xf32> to vector<1x8x256xf32>
    tpu.vector_store %arg9[%c0_6, %c0_7, %c0_8], %9 {strides = array<i32>} : memref<1x8x256xf32, #tpu.memory_space<vmem>>, vector<1x8x256xf32>,
    %c0_9 = arith.constant 0 : index
    %c0_10 = arith.constant 0 : index
    %10 = vector.load %arg5[%c0_9, %c0_10] : memref<8x1xf32, #tpu.memory_space<vmem>>, vector<8x1xf32>
    %c0_11 = arith.constant 0 : index
    %c0_12 = arith.constant 0 : index
    %11 = vector.load %arg6[%c0_11, %c0_12] : memref<8x1xf32, #tpu.memory_space<vmem>>, vector<8x1xf32>
    %cst_13 = arith.constant dense<0.000000e+00> : vector<256xf32>
    %12 = vector.multi_reduction <add>, %6, %cst_13 [0] : vector<8x256xf32> to vector<256xf32>
    %13 = vector.shape_cast %12 : vector<256xf32> to vector<1x256xf32>
    %cst_14 = arith.constant 8.000000e+00 : f32
    %14 = vector.broadcast %cst_14 : f32 to vector<1x256xf32>
    %15 = arith.divf %13, %14 : vector<1x256xf32>
    %16 = vector.broadcast %15 : vector<1x256xf32> to vector<8x256xf32>
    %17 = arith.subf %6, %16 : vector<8x256xf32>
    %18 = arith.mulf %17, %17 : vector<8x256xf32>
    %cst_15 = arith.constant dense<0.000000e+00> : vector<256xf32>
    %19 = vector.multi_reduction <add>, %18, %cst_15 [0] : vector<8x256xf32> to vector<256xf32>
    %20 = vector.shape_cast %19 : vector<256xf32> to vector<1x256xf32>
    %cst_16 = arith.constant 8.000000e+00 : f32
    %21 = vector.broadcast %cst_16 : f32 to vector<1x256xf32>
    %22 = arith.divf %20, %21 : vector<1x256xf32>
    %cst_17 = arith.constant 9.99999997E-7 : f32
    %23 = vector.broadcast %cst_17 : f32 to vector<1x256xf32>
    %24 = arith.addf %22, %23 : vector<1x256xf32>
    %25 = math.rsqrt %24 : vector<1x256xf32>
    %26 = vector.broadcast %25 : vector<1x256xf32> to vector<8x256xf32>
    %27 = arith.mulf %17, %26 : vector<8x256xf32>
    %28 = vector.broadcast %10 : vector<8x1xf32> to vector<8x256xf32>
    %29 = arith.mulf %27, %28 : vector<8x256xf32>
    %30 = vector.broadcast %11 : vector<8x1xf32> to vector<8x256xf32>
    %31 = arith.addf %29, %30 : vector<8x256xf32>
    %c0_18 = arith.constant 0 : index
    %c0_19 = arith.constant 0 : index
    %32 = vector.load %arg7[%c0_18, %c0_19] : memref<16x8xf32, #tpu.memory_space<vmem>>, vector<16x8xf32>
    %cst_20 = arith.constant dense<0.000000e+00> : vector<16x256xf32>
    %33 = tpu.matmul %32, %31, %cst_20 {dimension_numbers = #tpu.dot_dimension_numbers<[1], [0], [0], [1], [0, 0, 1, 1], [], []>} : vector<16x8xf32>, vector<8x256xf32>, vector<16x256xf32> -> vector<16x256xf32>
    %c0_21 = arith.constant 0 : index
    %c0_22 = arith.constant 0 : index
    %34 = vector.load %arg8[%c0_21, %c0_22] : memref<16x1xf32, #tpu.memory_space<vmem>>, vector<16x1xf32>
    %35 = vector.broadcast %34 : vector<16x1xf32> to vector<16x256xf32>
    %36 = arith.addf %33, %35 : vector<16x256xf32>
    %c0_23 = arith.constant 0 : index
    %c0_24 = arith.constant 0 : index
    %c0_25 = arith.constant 0 : index
    %37 = vector.load %arg10[%c0_23, %c0_24, %c0_25] : memref<1x16x256xf32, #tpu.memory_space<vmem>>, vector<1x16x256xf32>
    %38 = vector.shape_cast %37 : vector<1x16x256xf32> to vector<16x256xf32>
    %39 = vector.shape_cast %36 : vector<16x256xf32> to vector<1x16x256xf32>
    tpu.vector_store %arg10[%c0_23, %c0_24, %c0_25], %39 {strides = array<i32>} : memref<1x16x256xf32, #tpu.memory_space<vmem>>, vector<1x16x256xf32>,
    return
  }
  func.func @transform_0(%arg0: i32, %arg1: i32) -> (i32, i32, i32) {
    %c0_i32 = arith.constant 0 : i32
    %c0_i32_0 = arith.constant 0 : i32
    return %arg0, %c0_i32, %arg1 : i32, i32, i32
  }
  func.func @transform_1(%arg0: i32, %arg1: i32) -> (i32, i32) {
    %c0_i32 = arith.constant 0 : i32
    %c0_i32_0 = arith.constant 0 : i32
    %c0_i32_1 = arith.constant 0 : i32
    return %c0_i32, %c0_i32_0 : i32, i32
  }
  func.func @transform_2(%arg0: i32, %arg1: i32) -> (i32, i32) {
    %c0_i32 = arith.constant 0 : i32
    %c0_i32_0 = arith.constant 0 : i32
    %c0_i32_1 = arith.constant 0 : i32
    return %c0_i32, %c0_i32_0 : i32, i32
  }
  func.func @transform_3(%arg0: i32, %arg1: i32) -> (i32, i32) {
    %c0_i32 = arith.constant 0 : i32
    %c0_i32_0 = arith.constant 0 : i32
    %c0_i32_1 = arith.constant 0 : i32
    return %c0_i32, %c0_i32_0 : i32, i32
  }
  func.func @transform_4(%arg0: i32, %arg1: i32) -> (i32, i32) {
    %c0_i32 = arith.constant 0 : i32
    %c0_i32_0 = arith.constant 0 : i32
    %c0_i32_1 = arith.constant 0 : i32
    return %c0_i32, %c0_i32_0 : i32, i32
  }
  func.func @transform_5(%arg0: i32, %arg1: i32) -> (i32, i32) {
    %c0_i32 = arith.constant 0 : i32
    %c0_i32_0 = arith.constant 0 : i32
    %c0_i32_1 = arith.constant 0 : i32
    return %c0_i32, %c0_i32_0 : i32, i32
  }
  func.func @transform_6(%arg0: i32, %arg1: i32) -> (i32, i32) {
    %c0_i32 = arith.constant 0 : i32
    %c0_i32_0 = arith.constant 0 : i32
    %c0_i32_1 = arith.constant 0 : i32
    return %c0_i32, %c0_i32_0 : i32, i32
  }
  func.func @transform_7(%arg0: i32, %arg1: i32) -> (i32, i32, i32) {
    %c0_i32 = arith.constant 0 : i32
    %c0_i32_0 = arith.constant 0 : i32
    return %arg0, %c0_i32, %arg1 : i32, i32, i32
  }
  func.func @transform_8(%arg0: i32, %arg1: i32) -> (i32, i32, i32) {
    %c0_i32 = arith.constant 0 : i32
    %c0_i32_0 = arith.constant 0 : i32
    return %arg0, %c0_i32, %arg1 : i32, i32, i32
  }
}

module attributes {stable_mosaic.version = 11 : i64} {
  func.func @_tail_res_kernel(%arg0: i32, %arg1: i32, %arg2: memref<1x8x256xf32, #tpu.memory_space<vmem>>, %arg3: memref<1x8x1xf32, #tpu.memory_space<vmem>>, %arg4: memref<1x8x256xf32, #tpu.memory_space<vmem>>, %arg5: memref<1x8x256xf32, #tpu.memory_space<vmem>>, %arg6: memref<8x8xf32, #tpu.memory_space<vmem>>, %arg7: memref<8x1xf32, #tpu.memory_space<vmem>>, %arg8: memref<8x8xf32, #tpu.memory_space<vmem>>, %arg9: memref<8x1xf32, #tpu.memory_space<vmem>>, %arg10: memref<8x1xf32, #tpu.memory_space<vmem>>, %arg11: memref<8x1xf32, #tpu.memory_space<vmem>>, %arg12: memref<8x1xf32, #tpu.memory_space<vmem>>, %arg13: memref<16x8xf32, #tpu.memory_space<vmem>>, %arg14: memref<16x1xf32, #tpu.memory_space<vmem>>, %arg15: memref<8x8xf32, #tpu.memory_space<vmem>>, %arg16: memref<8x1xf32, #tpu.memory_space<vmem>>, %arg17: memref<8x1xf32, #tpu.memory_space<vmem>>, %arg18: memref<1x8x256xf32, #tpu.memory_space<vmem>>) attributes {dimension_semantics = [#tpu.dimension_semantics<parallel>, #tpu.dimension_semantics<parallel>], iteration_bounds = array<i64: 2, 1>, scalar_prefetch = 0 : i64, scratch_operands = 0 : i64, tpu.core_type = #tpu.core_type<tc>, window_params = [{transform_indices = @transform_0, window_bounds = array<i64: 1, 8, 256>}, {transform_indices = @transform_1, window_bounds = array<i64: 1, 8, 1>}, {transform_indices = @transform_2, window_bounds = array<i64: 1, 8, 256>}, {transform_indices = @transform_3, window_bounds = array<i64: 1, 8, 256>}, {pipeline_mode = #tpu.pipeline_mode<synchronous>, transform_indices = @transform_4, window_bounds = array<i64: 8, 8>}, {pipeline_mode = #tpu.pipeline_mode<synchronous>, transform_indices = @transform_5, window_bounds = array<i64: 8, 1>}, {pipeline_mode = #tpu.pipeline_mode<synchronous>, transform_indices = @transform_6, window_bounds = array<i64: 8, 8>}, {pipeline_mode = #tpu.pipeline_mode<synchronous>, transform_indices = @transform_7, window_bounds = array<i64: 8, 1>}, {pipeline_mode = #tpu.pipeline_mode<synchronous>, transform_indices = @transform_8, window_bounds = array<i64: 8, 1>}, {pipeline_mode = #tpu.pipeline_mode<synchronous>, transform_indices = @transform_9, window_bounds = array<i64: 8, 1>}, {pipeline_mode = #tpu.pipeline_mode<synchronous>, transform_indices = @transform_10, window_bounds = array<i64: 8, 1>}, {pipeline_mode = #tpu.pipeline_mode<synchronous>, transform_indices = @transform_11, window_bounds = array<i64: 16, 8>}, {pipeline_mode = #tpu.pipeline_mode<synchronous>, transform_indices = @transform_12, window_bounds = array<i64: 16, 1>}, {pipeline_mode = #tpu.pipeline_mode<synchronous>, transform_indices = @transform_13, window_bounds = array<i64: 8, 8>}, {pipeline_mode = #tpu.pipeline_mode<synchronous>, transform_indices = @transform_14, window_bounds = array<i64: 8, 1>}, {pipeline_mode = #tpu.pipeline_mode<synchronous>, transform_indices = @transform_15, window_bounds = array<i64: 8, 1>}, {transform_indices = @transform_16, window_bounds = array<i64: 1, 8, 256>}]} {
    %c0 = arith.constant 0 : index
    %c0_0 = arith.constant 0 : index
    %c0_1 = arith.constant 0 : index
    %0 = vector.load %arg2[%c0, %c0_0, %c0_1] : memref<1x8x256xf32, #tpu.memory_space<vmem>>, vector<1x8x256xf32>
    %1 = vector.shape_cast %0 : vector<1x8x256xf32> to vector<8x256xf32>
    %c0_2 = arith.constant 0 : index
    %c0_3 = arith.constant 0 : index
    %c0_4 = arith.constant 0 : index
    %2 = vector.load %arg4[%c0_2, %c0_3, %c0_4] : memref<1x8x256xf32, #tpu.memory_space<vmem>>, vector<1x8x256xf32>
    %3 = vector.shape_cast %2 : vector<1x8x256xf32> to vector<8x256xf32>
    %c0_5 = arith.constant 0 : index
    %c0_6 = arith.constant 0 : index
    %4 = vector.load %arg6[%c0_5, %c0_6] : memref<8x8xf32, #tpu.memory_space<vmem>>, vector<8x8xf32>
    %c0_7 = arith.constant 0 : index
    %c0_8 = arith.constant 0 : index
    %c0_9 = arith.constant 0 : index
    %5 = vector.load %arg3[%c0_7, %c0_8, %c0_9] : memref<1x8x1xf32, #tpu.memory_space<vmem>>, vector<1x8x1xf32>
    %6 = vector.shape_cast %5 : vector<1x8x1xf32> to vector<8x1xf32>
    %cst = arith.constant dense<0.000000e+00> : vector<8x1xf32>
    %7 = tpu.matmul %4, %6, %cst {dimension_numbers = #tpu.dot_dimension_numbers<[1], [0], [0], [1], [0, 0, 1, 1], [], []>} : vector<8x8xf32>, vector<8x1xf32>, vector<8x1xf32> -> vector<8x1xf32>
    %c0_10 = arith.constant 0 : index
    %c0_11 = arith.constant 0 : index
    %8 = vector.load %arg7[%c0_10, %c0_11] : memref<8x1xf32, #tpu.memory_space<vmem>>, vector<8x1xf32>
    %9 = arith.addf %7, %8 : vector<8x1xf32>
    %c0_12 = arith.constant 0 : index
    %c0_13 = arith.constant 0 : index
    %10 = vector.load %arg10[%c0_12, %c0_13] : memref<8x1xf32, #tpu.memory_space<vmem>>, vector<8x1xf32>
    %c0_14 = arith.constant 0 : index
    %c0_15 = arith.constant 0 : index
    %11 = vector.load %arg8[%c0_14, %c0_15] : memref<8x8xf32, #tpu.memory_space<vmem>>, vector<8x8xf32>
    %12 = vector.broadcast %9 : vector<8x1xf32> to vector<8x256xf32>
    %13 = arith.mulf %1, %12 : vector<8x256xf32>
    %cst_16 = arith.constant dense<0.000000e+00> : vector<8x256xf32>
    %14 = tpu.matmul %11, %13, %cst_16 {dimension_numbers = #tpu.dot_dimension_numbers<[1], [0], [0], [1], [0, 0, 1, 1], [], []>} : vector<8x8xf32>, vector<8x256xf32>, vector<8x256xf32> -> vector<8x256xf32>
    %c0_17 = arith.constant 0 : index
    %c0_18 = arith.constant 0 : index
    %15 = vector.load %arg9[%c0_17, %c0_18] : memref<8x1xf32, #tpu.memory_space<vmem>>, vector<8x1xf32>
    %16 = vector.broadcast %15 : vector<8x1xf32> to vector<8x256xf32>
    %17 = arith.addf %14, %16 : vector<8x256xf32>
    %18 = vector.broadcast %10 : vector<8x1xf32> to vector<8x256xf32>
    %19 = arith.mulf %18, %17 : vector<8x256xf32>
    %20 = arith.addf %3, %19 : vector<8x256xf32>
    %c0_19 = arith.constant 0 : index
    %c0_20 = arith.constant 0 : index
    %21 = vector.load %arg13[%c0_19, %c0_20] : memref<16x8xf32, #tpu.memory_space<vmem>>, vector<16x8xf32>
    %c0_21 = arith.constant 0 : index
    %c0_22 = arith.constant 0 : index
    %22 = vector.load %arg11[%c0_21, %c0_22] : memref<8x1xf32, #tpu.memory_space<vmem>>, vector<8x1xf32>
    %c0_23 = arith.constant 0 : index
    %c0_24 = arith.constant 0 : index
    %23 = vector.load %arg12[%c0_23, %c0_24] : memref<8x1xf32, #tpu.memory_space<vmem>>, vector<8x1xf32>
    %cst_25 = arith.constant dense<0.000000e+00> : vector<256xf32>
    %24 = vector.multi_reduction <add>, %20, %cst_25 [0] : vector<8x256xf32> to vector<256xf32>
    %25 = vector.shape_cast %24 : vector<256xf32> to vector<1x256xf32>
    %cst_26 = arith.constant 8.000000e+00 : f32
    %26 = vector.broadcast %cst_26 : f32 to vector<1x256xf32>
    %27 = arith.divf %25, %26 : vector<1x256xf32>
    %28 = vector.broadcast %27 : vector<1x256xf32> to vector<8x256xf32>
    %29 = arith.subf %20, %28 : vector<8x256xf32>
    %30 = arith.mulf %29, %29 : vector<8x256xf32>
    %cst_27 = arith.constant dense<0.000000e+00> : vector<256xf32>
    %31 = vector.multi_reduction <add>, %30, %cst_27 [0] : vector<8x256xf32> to vector<256xf32>
    %32 = vector.shape_cast %31 : vector<256xf32> to vector<1x256xf32>
    %cst_28 = arith.constant 8.000000e+00 : f32
    %33 = vector.broadcast %cst_28 : f32 to vector<1x256xf32>
    %34 = arith.divf %32, %33 : vector<1x256xf32>
    %cst_29 = arith.constant 9.99999997E-7 : f32
    %35 = vector.broadcast %cst_29 : f32 to vector<1x256xf32>
    %36 = arith.addf %34, %35 : vector<1x256xf32>
    %37 = math.rsqrt %36 : vector<1x256xf32>
    %38 = vector.broadcast %37 : vector<1x256xf32> to vector<8x256xf32>
    %39 = arith.mulf %29, %38 : vector<8x256xf32>
    %40 = vector.broadcast %22 : vector<8x1xf32> to vector<8x256xf32>
    %41 = arith.mulf %39, %40 : vector<8x256xf32>
    %42 = vector.broadcast %23 : vector<8x1xf32> to vector<8x256xf32>
    %43 = arith.addf %41, %42 : vector<8x256xf32>
    %cst_30 = arith.constant dense<0.000000e+00> : vector<16x256xf32>
    %44 = tpu.matmul %21, %43, %cst_30 {dimension_numbers = #tpu.dot_dimension_numbers<[1], [0], [0], [1], [0, 0, 1, 1], [], []>} : vector<16x8xf32>, vector<8x256xf32>, vector<16x256xf32> -> vector<16x256xf32>
    %c0_31 = arith.constant 0 : index
    %c0_32 = arith.constant 0 : index
    %45 = vector.load %arg14[%c0_31, %c0_32] : memref<16x1xf32, #tpu.memory_space<vmem>>, vector<16x1xf32>
    %46 = vector.broadcast %45 : vector<16x1xf32> to vector<16x256xf32>
    %47 = arith.addf %44, %46 : vector<16x256xf32>
    %48 = vector.extract_strided_slice %47 {offsets = [0, 0], sizes = [8, 256], strides = [1, 1]} : vector<16x256xf32> to vector<8x256xf32>
    %49 = vector.extract_strided_slice %47 {offsets = [8, 0], sizes = [8, 256], strides = [1, 1]} : vector<16x256xf32> to vector<8x256xf32>
    %50 = arith.mulf %48, %49 : vector<8x256xf32>
    %c0_33 = arith.constant 0 : index
    %c0_34 = arith.constant 0 : index
    %51 = vector.load %arg17[%c0_33, %c0_34] : memref<8x1xf32, #tpu.memory_space<vmem>>, vector<8x1xf32>
    %c0_35 = arith.constant 0 : index
    %c0_36 = arith.constant 0 : index
    %52 = vector.load %arg15[%c0_35, %c0_36] : memref<8x8xf32, #tpu.memory_space<vmem>>, vector<8x8xf32>
    %cst_37 = arith.constant dense<0.000000e+00> : vector<8x256xf32>
    %53 = tpu.matmul %52, %50, %cst_37 {dimension_numbers = #tpu.dot_dimension_numbers<[1], [0], [0], [1], [0, 0, 1, 1], [], []>} : vector<8x8xf32>, vector<8x256xf32>, vector<8x256xf32> -> vector<8x256xf32>
    %c0_38 = arith.constant 0 : index
    %c0_39 = arith.constant 0 : index
    %54 = vector.load %arg16[%c0_38, %c0_39] : memref<8x1xf32, #tpu.memory_space<vmem>>, vector<8x1xf32>
    %55 = vector.broadcast %54 : vector<8x1xf32> to vector<8x256xf32>
    %56 = arith.addf %53, %55 : vector<8x256xf32>
    %57 = vector.broadcast %51 : vector<8x1xf32> to vector<8x256xf32>
    %58 = arith.mulf %57, %56 : vector<8x256xf32>
    %59 = arith.addf %20, %58 : vector<8x256xf32>
    %c0_40 = arith.constant 0 : index
    %c0_41 = arith.constant 0 : index
    %c0_42 = arith.constant 0 : index
    %60 = vector.load %arg5[%c0_40, %c0_41, %c0_42] : memref<1x8x256xf32, #tpu.memory_space<vmem>>, vector<1x8x256xf32>
    %61 = vector.shape_cast %60 : vector<1x8x256xf32> to vector<8x256xf32>
    %62 = arith.addf %59, %61 : vector<8x256xf32>
    %c0_43 = arith.constant 0 : index
    %c0_44 = arith.constant 0 : index
    %c0_45 = arith.constant 0 : index
    %63 = vector.load %arg18[%c0_43, %c0_44, %c0_45] : memref<1x8x256xf32, #tpu.memory_space<vmem>>, vector<1x8x256xf32>
    %64 = vector.shape_cast %63 : vector<1x8x256xf32> to vector<8x256xf32>
    %65 = vector.shape_cast %62 : vector<8x256xf32> to vector<1x8x256xf32>
    tpu.vector_store %arg18[%c0_43, %c0_44, %c0_45], %65 {strides = array<i32>} : memref<1x8x256xf32, #tpu.memory_space<vmem>>, vector<1x8x256xf32>,
    return
  }
  func.func @transform_0(%arg0: i32, %arg1: i32) -> (i32, i32, i32) {
    %c0_i32 = arith.constant 0 : i32
    %c0_i32_0 = arith.constant 0 : i32
    return %arg0, %c0_i32, %arg1 : i32, i32, i32
  }
  func.func @transform_1(%arg0: i32, %arg1: i32) -> (i32, i32, i32) {
    %c0_i32 = arith.constant 0 : i32
    %c0_i32_0 = arith.constant 0 : i32
    %c0_i32_1 = arith.constant 0 : i32
    return %arg0, %c0_i32, %c0_i32_0 : i32, i32, i32
  }
  func.func @transform_2(%arg0: i32, %arg1: i32) -> (i32, i32, i32) {
    %c0_i32 = arith.constant 0 : i32
    %c0_i32_0 = arith.constant 0 : i32
    return %arg0, %c0_i32, %arg1 : i32, i32, i32
  }
  func.func @transform_3(%arg0: i32, %arg1: i32) -> (i32, i32, i32) {
    %c0_i32 = arith.constant 0 : i32
    %c0_i32_0 = arith.constant 0 : i32
    return %arg0, %c0_i32, %arg1 : i32, i32, i32
  }
  func.func @transform_4(%arg0: i32, %arg1: i32) -> (i32, i32) {
    %c0_i32 = arith.constant 0 : i32
    %c0_i32_0 = arith.constant 0 : i32
    %c0_i32_1 = arith.constant 0 : i32
    return %c0_i32, %c0_i32_0 : i32, i32
  }
  func.func @transform_5(%arg0: i32, %arg1: i32) -> (i32, i32) {
    %c0_i32 = arith.constant 0 : i32
    %c0_i32_0 = arith.constant 0 : i32
    %c0_i32_1 = arith.constant 0 : i32
    return %c0_i32, %c0_i32_0 : i32, i32
  }
  func.func @transform_6(%arg0: i32, %arg1: i32) -> (i32, i32) {
    %c0_i32 = arith.constant 0 : i32
    %c0_i32_0 = arith.constant 0 : i32
    %c0_i32_1 = arith.constant 0 : i32
    return %c0_i32, %c0_i32_0 : i32, i32
  }
  func.func @transform_7(%arg0: i32, %arg1: i32) -> (i32, i32) {
    %c0_i32 = arith.constant 0 : i32
    %c0_i32_0 = arith.constant 0 : i32
    %c0_i32_1 = arith.constant 0 : i32
    return %c0_i32, %c0_i32_0 : i32, i32
  }
  func.func @transform_8(%arg0: i32, %arg1: i32) -> (i32, i32) {
    %c0_i32 = arith.constant 0 : i32
    %c0_i32_0 = arith.constant 0 : i32
    %c0_i32_1 = arith.constant 0 : i32
    return %c0_i32, %c0_i32_0 : i32, i32
  }
  func.func @transform_9(%arg0: i32, %arg1: i32) -> (i32, i32) {
    %c0_i32 = arith.constant 0 : i32
    %c0_i32_0 = arith.constant 0 : i32
    %c0_i32_1 = arith.constant 0 : i32
    return %c0_i32, %c0_i32_0 : i32, i32
  }
  func.func @transform_10(%arg0: i32, %arg1: i32) -> (i32, i32) {
    %c0_i32 = arith.constant 0 : i32
    %c0_i32_0 = arith.constant 0 : i32
    %c0_i32_1 = arith.constant 0 : i32
    return %c0_i32, %c0_i32_0 : i32, i32
  }
  func.func @transform_11(%arg0: i32, %arg1: i32) -> (i32, i32) {
    %c0_i32 = arith.constant 0 : i32
    %c0_i32_0 = arith.constant 0 : i32
    %c0_i32_1 = arith.constant 0 : i32
    return %c0_i32, %c0_i32_0 : i32, i32
  }
  func.func @transform_12(%arg0: i32, %arg1: i32) -> (i32, i32) {
    %c0_i32 = arith.constant 0 : i32
    %c0_i32_0 = arith.constant 0 : i32
    %c0_i32_1 = arith.constant 0 : i32
    return %c0_i32, %c0_i32_0 : i32, i32
  }
  func.func @transform_13(%arg0: i32, %arg1: i32) -> (i32, i32) {
    %c0_i32 = arith.constant 0 : i32
    %c0_i32_0 = arith.constant 0 : i32
    %c0_i32_1 = arith.constant 0 : i32
    return %c0_i32, %c0_i32_0 : i32, i32
  }
  func.func @transform_14(%arg0: i32, %arg1: i32) -> (i32, i32) {
    %c0_i32 = arith.constant 0 : i32
    %c0_i32_0 = arith.constant 0 : i32
    %c0_i32_1 = arith.constant 0 : i32
    return %c0_i32, %c0_i32_0 : i32, i32
  }
  func.func @transform_15(%arg0: i32, %arg1: i32) -> (i32, i32) {
    %c0_i32 = arith.constant 0 : i32
    %c0_i32_0 = arith.constant 0 : i32
    %c0_i32_1 = arith.constant 0 : i32
    return %c0_i32, %c0_i32_0 : i32, i32
  }
  func.func @transform_16(%arg0: i32, %arg1: i32) -> (i32, i32, i32) {
    %c0_i32 = arith.constant 0 : i32
    %c0_i32_0 = arith.constant 0 : i32
    return %arg0, %c0_i32, %arg1 : i32, i32, i32
  }
}

module attributes {stable_mosaic.version = 11 : i64} {
  func.func @_tail_kernel(%arg0: i32, %arg1: i32, %arg2: memref<1x8x256xf32, #tpu.memory_space<vmem>>, %arg3: memref<1x8x1xf32, #tpu.memory_space<vmem>>, %arg4: memref<1x8x256xf32, #tpu.memory_space<vmem>>, %arg5: memref<8x8xf32, #tpu.memory_space<vmem>>, %arg6: memref<8x1xf32, #tpu.memory_space<vmem>>, %arg7: memref<8x8xf32, #tpu.memory_space<vmem>>, %arg8: memref<8x1xf32, #tpu.memory_space<vmem>>, %arg9: memref<8x1xf32, #tpu.memory_space<vmem>>, %arg10: memref<8x1xf32, #tpu.memory_space<vmem>>, %arg11: memref<8x1xf32, #tpu.memory_space<vmem>>, %arg12: memref<16x8xf32, #tpu.memory_space<vmem>>, %arg13: memref<16x1xf32, #tpu.memory_space<vmem>>, %arg14: memref<8x8xf32, #tpu.memory_space<vmem>>, %arg15: memref<8x1xf32, #tpu.memory_space<vmem>>, %arg16: memref<8x1xf32, #tpu.memory_space<vmem>>, %arg17: memref<1x8x256xf32, #tpu.memory_space<vmem>>) attributes {dimension_semantics = [#tpu.dimension_semantics<parallel>, #tpu.dimension_semantics<parallel>], iteration_bounds = array<i64: 2, 1>, scalar_prefetch = 0 : i64, scratch_operands = 0 : i64, tpu.core_type = #tpu.core_type<tc>, window_params = [{transform_indices = @transform_0, window_bounds = array<i64: 1, 8, 256>}, {transform_indices = @transform_1, window_bounds = array<i64: 1, 8, 1>}, {transform_indices = @transform_2, window_bounds = array<i64: 1, 8, 256>}, {pipeline_mode = #tpu.pipeline_mode<synchronous>, transform_indices = @transform_3, window_bounds = array<i64: 8, 8>}, {pipeline_mode = #tpu.pipeline_mode<synchronous>, transform_indices = @transform_4, window_bounds = array<i64: 8, 1>}, {pipeline_mode = #tpu.pipeline_mode<synchronous>, transform_indices = @transform_5, window_bounds = array<i64: 8, 8>}, {pipeline_mode = #tpu.pipeline_mode<synchronous>, transform_indices = @transform_6, window_bounds = array<i64: 8, 1>}, {pipeline_mode = #tpu.pipeline_mode<synchronous>, transform_indices = @transform_7, window_bounds = array<i64: 8, 1>}, {pipeline_mode = #tpu.pipeline_mode<synchronous>, transform_indices = @transform_8, window_bounds = array<i64: 8, 1>}, {pipeline_mode = #tpu.pipeline_mode<synchronous>, transform_indices = @transform_9, window_bounds = array<i64: 8, 1>}, {pipeline_mode = #tpu.pipeline_mode<synchronous>, transform_indices = @transform_10, window_bounds = array<i64: 16, 8>}, {pipeline_mode = #tpu.pipeline_mode<synchronous>, transform_indices = @transform_11, window_bounds = array<i64: 16, 1>}, {pipeline_mode = #tpu.pipeline_mode<synchronous>, transform_indices = @transform_12, window_bounds = array<i64: 8, 8>}, {pipeline_mode = #tpu.pipeline_mode<synchronous>, transform_indices = @transform_13, window_bounds = array<i64: 8, 1>}, {pipeline_mode = #tpu.pipeline_mode<synchronous>, transform_indices = @transform_14, window_bounds = array<i64: 8, 1>}, {transform_indices = @transform_15, window_bounds = array<i64: 1, 8, 256>}]} {
    %c0 = arith.constant 0 : index
    %c0_0 = arith.constant 0 : index
    %c0_1 = arith.constant 0 : index
    %0 = vector.load %arg2[%c0, %c0_0, %c0_1] : memref<1x8x256xf32, #tpu.memory_space<vmem>>, vector<1x8x256xf32>
    %1 = vector.shape_cast %0 : vector<1x8x256xf32> to vector<8x256xf32>
    %c0_2 = arith.constant 0 : index
    %c0_3 = arith.constant 0 : index
    %c0_4 = arith.constant 0 : index
    %2 = vector.load %arg4[%c0_2, %c0_3, %c0_4] : memref<1x8x256xf32, #tpu.memory_space<vmem>>, vector<1x8x256xf32>
    %3 = vector.shape_cast %2 : vector<1x8x256xf32> to vector<8x256xf32>
    %c0_5 = arith.constant 0 : index
    %c0_6 = arith.constant 0 : index
    %4 = vector.load %arg5[%c0_5, %c0_6] : memref<8x8xf32, #tpu.memory_space<vmem>>, vector<8x8xf32>
    %c0_7 = arith.constant 0 : index
    %c0_8 = arith.constant 0 : index
    %c0_9 = arith.constant 0 : index
    %5 = vector.load %arg3[%c0_7, %c0_8, %c0_9] : memref<1x8x1xf32, #tpu.memory_space<vmem>>, vector<1x8x1xf32>
    %6 = vector.shape_cast %5 : vector<1x8x1xf32> to vector<8x1xf32>
    %cst = arith.constant dense<0.000000e+00> : vector<8x1xf32>
    %7 = tpu.matmul %4, %6, %cst {dimension_numbers = #tpu.dot_dimension_numbers<[1], [0], [0], [1], [0, 0, 1, 1], [], []>} : vector<8x8xf32>, vector<8x1xf32>, vector<8x1xf32> -> vector<8x1xf32>
    %c0_10 = arith.constant 0 : index
    %c0_11 = arith.constant 0 : index
    %8 = vector.load %arg6[%c0_10, %c0_11] : memref<8x1xf32, #tpu.memory_space<vmem>>, vector<8x1xf32>
    %9 = arith.addf %7, %8 : vector<8x1xf32>
    %c0_12 = arith.constant 0 : index
    %c0_13 = arith.constant 0 : index
    %10 = vector.load %arg9[%c0_12, %c0_13] : memref<8x1xf32, #tpu.memory_space<vmem>>, vector<8x1xf32>
    %c0_14 = arith.constant 0 : index
    %c0_15 = arith.constant 0 : index
    %11 = vector.load %arg7[%c0_14, %c0_15] : memref<8x8xf32, #tpu.memory_space<vmem>>, vector<8x8xf32>
    %12 = vector.broadcast %9 : vector<8x1xf32> to vector<8x256xf32>
    %13 = arith.mulf %1, %12 : vector<8x256xf32>
    %cst_16 = arith.constant dense<0.000000e+00> : vector<8x256xf32>
    %14 = tpu.matmul %11, %13, %cst_16 {dimension_numbers = #tpu.dot_dimension_numbers<[1], [0], [0], [1], [0, 0, 1, 1], [], []>} : vector<8x8xf32>, vector<8x256xf32>, vector<8x256xf32> -> vector<8x256xf32>
    %c0_17 = arith.constant 0 : index
    %c0_18 = arith.constant 0 : index
    %15 = vector.load %arg8[%c0_17, %c0_18] : memref<8x1xf32, #tpu.memory_space<vmem>>, vector<8x1xf32>
    %16 = vector.broadcast %15 : vector<8x1xf32> to vector<8x256xf32>
    %17 = arith.addf %14, %16 : vector<8x256xf32>
    %18 = vector.broadcast %10 : vector<8x1xf32> to vector<8x256xf32>
    %19 = arith.mulf %18, %17 : vector<8x256xf32>
    %20 = arith.addf %3, %19 : vector<8x256xf32>
    %c0_19 = arith.constant 0 : index
    %c0_20 = arith.constant 0 : index
    %21 = vector.load %arg12[%c0_19, %c0_20] : memref<16x8xf32, #tpu.memory_space<vmem>>, vector<16x8xf32>
    %c0_21 = arith.constant 0 : index
    %c0_22 = arith.constant 0 : index
    %22 = vector.load %arg10[%c0_21, %c0_22] : memref<8x1xf32, #tpu.memory_space<vmem>>, vector<8x1xf32>
    %c0_23 = arith.constant 0 : index
    %c0_24 = arith.constant 0 : index
    %23 = vector.load %arg11[%c0_23, %c0_24] : memref<8x1xf32, #tpu.memory_space<vmem>>, vector<8x1xf32>
    %cst_25 = arith.constant dense<0.000000e+00> : vector<256xf32>
    %24 = vector.multi_reduction <add>, %20, %cst_25 [0] : vector<8x256xf32> to vector<256xf32>
    %25 = vector.shape_cast %24 : vector<256xf32> to vector<1x256xf32>
    %cst_26 = arith.constant 8.000000e+00 : f32
    %26 = vector.broadcast %cst_26 : f32 to vector<1x256xf32>
    %27 = arith.divf %25, %26 : vector<1x256xf32>
    %28 = vector.broadcast %27 : vector<1x256xf32> to vector<8x256xf32>
    %29 = arith.subf %20, %28 : vector<8x256xf32>
    %30 = arith.mulf %29, %29 : vector<8x256xf32>
    %cst_27 = arith.constant dense<0.000000e+00> : vector<256xf32>
    %31 = vector.multi_reduction <add>, %30, %cst_27 [0] : vector<8x256xf32> to vector<256xf32>
    %32 = vector.shape_cast %31 : vector<256xf32> to vector<1x256xf32>
    %cst_28 = arith.constant 8.000000e+00 : f32
    %33 = vector.broadcast %cst_28 : f32 to vector<1x256xf32>
    %34 = arith.divf %32, %33 : vector<1x256xf32>
    %cst_29 = arith.constant 9.99999997E-7 : f32
    %35 = vector.broadcast %cst_29 : f32 to vector<1x256xf32>
    %36 = arith.addf %34, %35 : vector<1x256xf32>
    %37 = math.rsqrt %36 : vector<1x256xf32>
    %38 = vector.broadcast %37 : vector<1x256xf32> to vector<8x256xf32>
    %39 = arith.mulf %29, %38 : vector<8x256xf32>
    %40 = vector.broadcast %22 : vector<8x1xf32> to vector<8x256xf32>
    %41 = arith.mulf %39, %40 : vector<8x256xf32>
    %42 = vector.broadcast %23 : vector<8x1xf32> to vector<8x256xf32>
    %43 = arith.addf %41, %42 : vector<8x256xf32>
    %cst_30 = arith.constant dense<0.000000e+00> : vector<16x256xf32>
    %44 = tpu.matmul %21, %43, %cst_30 {dimension_numbers = #tpu.dot_dimension_numbers<[1], [0], [0], [1], [0, 0, 1, 1], [], []>} : vector<16x8xf32>, vector<8x256xf32>, vector<16x256xf32> -> vector<16x256xf32>
    %c0_31 = arith.constant 0 : index
    %c0_32 = arith.constant 0 : index
    %45 = vector.load %arg13[%c0_31, %c0_32] : memref<16x1xf32, #tpu.memory_space<vmem>>, vector<16x1xf32>
    %46 = vector.broadcast %45 : vector<16x1xf32> to vector<16x256xf32>
    %47 = arith.addf %44, %46 : vector<16x256xf32>
    %48 = vector.extract_strided_slice %47 {offsets = [0, 0], sizes = [8, 256], strides = [1, 1]} : vector<16x256xf32> to vector<8x256xf32>
    %49 = vector.extract_strided_slice %47 {offsets = [8, 0], sizes = [8, 256], strides = [1, 1]} : vector<16x256xf32> to vector<8x256xf32>
    %50 = arith.mulf %48, %49 : vector<8x256xf32>
    %c0_33 = arith.constant 0 : index
    %c0_34 = arith.constant 0 : index
    %51 = vector.load %arg16[%c0_33, %c0_34] : memref<8x1xf32, #tpu.memory_space<vmem>>, vector<8x1xf32>
    %c0_35 = arith.constant 0 : index
    %c0_36 = arith.constant 0 : index
    %52 = vector.load %arg14[%c0_35, %c0_36] : memref<8x8xf32, #tpu.memory_space<vmem>>, vector<8x8xf32>
    %cst_37 = arith.constant dense<0.000000e+00> : vector<8x256xf32>
    %53 = tpu.matmul %52, %50, %cst_37 {dimension_numbers = #tpu.dot_dimension_numbers<[1], [0], [0], [1], [0, 0, 1, 1], [], []>} : vector<8x8xf32>, vector<8x256xf32>, vector<8x256xf32> -> vector<8x256xf32>
    %c0_38 = arith.constant 0 : index
    %c0_39 = arith.constant 0 : index
    %54 = vector.load %arg15[%c0_38, %c0_39] : memref<8x1xf32, #tpu.memory_space<vmem>>, vector<8x1xf32>
    %55 = vector.broadcast %54 : vector<8x1xf32> to vector<8x256xf32>
    %56 = arith.addf %53, %55 : vector<8x256xf32>
    %57 = vector.broadcast %51 : vector<8x1xf32> to vector<8x256xf32>
    %58 = arith.mulf %57, %56 : vector<8x256xf32>
    %59 = arith.addf %20, %58 : vector<8x256xf32>
    %c0_40 = arith.constant 0 : index
    %c0_41 = arith.constant 0 : index
    %c0_42 = arith.constant 0 : index
    %60 = vector.load %arg17[%c0_40, %c0_41, %c0_42] : memref<1x8x256xf32, #tpu.memory_space<vmem>>, vector<1x8x256xf32>
    %61 = vector.shape_cast %60 : vector<1x8x256xf32> to vector<8x256xf32>
    %62 = vector.shape_cast %59 : vector<8x256xf32> to vector<1x8x256xf32>
    tpu.vector_store %arg17[%c0_40, %c0_41, %c0_42], %62 {strides = array<i32>} : memref<1x8x256xf32, #tpu.memory_space<vmem>>, vector<1x8x256xf32>,
    return
  }
  func.func @transform_0(%arg0: i32, %arg1: i32) -> (i32, i32, i32) {
    %c0_i32 = arith.constant 0 : i32
    %c0_i32_0 = arith.constant 0 : i32
    return %arg0, %c0_i32, %arg1 : i32, i32, i32
  }
  func.func @transform_1(%arg0: i32, %arg1: i32) -> (i32, i32, i32) {
    %c0_i32 = arith.constant 0 : i32
    %c0_i32_0 = arith.constant 0 : i32
    %c0_i32_1 = arith.constant 0 : i32
    return %arg0, %c0_i32, %c0_i32_0 : i32, i32, i32
  }
  func.func @transform_2(%arg0: i32, %arg1: i32) -> (i32, i32, i32) {
    %c0_i32 = arith.constant 0 : i32
    %c0_i32_0 = arith.constant 0 : i32
    return %arg0, %c0_i32, %arg1 : i32, i32, i32
  }
  func.func @transform_3(%arg0: i32, %arg1: i32) -> (i32, i32) {
    %c0_i32 = arith.constant 0 : i32
    %c0_i32_0 = arith.constant 0 : i32
    %c0_i32_1 = arith.constant 0 : i32
    return %c0_i32, %c0_i32_0 : i32, i32
  }
  func.func @transform_4(%arg0: i32, %arg1: i32) -> (i32, i32) {
    %c0_i32 = arith.constant 0 : i32
    %c0_i32_0 = arith.constant 0 : i32
    %c0_i32_1 = arith.constant 0 : i32
    return %c0_i32, %c0_i32_0 : i32, i32
  }
  func.func @transform_5(%arg0: i32, %arg1: i32) -> (i32, i32) {
    %c0_i32 = arith.constant 0 : i32
    %c0_i32_0 = arith.constant 0 : i32
    %c0_i32_1 = arith.constant 0 : i32
    return %c0_i32, %c0_i32_0 : i32, i32
  }
  func.func @transform_6(%arg0: i32, %arg1: i32) -> (i32, i32) {
    %c0_i32 = arith.constant 0 : i32
    %c0_i32_0 = arith.constant 0 : i32
    %c0_i32_1 = arith.constant 0 : i32
    return %c0_i32, %c0_i32_0 : i32, i32
  }
  func.func @transform_7(%arg0: i32, %arg1: i32) -> (i32, i32) {
    %c0_i32 = arith.constant 0 : i32
    %c0_i32_0 = arith.constant 0 : i32
    %c0_i32_1 = arith.constant 0 : i32
    return %c0_i32, %c0_i32_0 : i32, i32
  }
  func.func @transform_8(%arg0: i32, %arg1: i32) -> (i32, i32) {
    %c0_i32 = arith.constant 0 : i32
    %c0_i32_0 = arith.constant 0 : i32
    %c0_i32_1 = arith.constant 0 : i32
    return %c0_i32, %c0_i32_0 : i32, i32
  }
  func.func @transform_9(%arg0: i32, %arg1: i32) -> (i32, i32) {
    %c0_i32 = arith.constant 0 : i32
    %c0_i32_0 = arith.constant 0 : i32
    %c0_i32_1 = arith.constant 0 : i32
    return %c0_i32, %c0_i32_0 : i32, i32
  }
  func.func @transform_10(%arg0: i32, %arg1: i32) -> (i32, i32) {
    %c0_i32 = arith.constant 0 : i32
    %c0_i32_0 = arith.constant 0 : i32
    %c0_i32_1 = arith.constant 0 : i32
    return %c0_i32, %c0_i32_0 : i32, i32
  }
  func.func @transform_11(%arg0: i32, %arg1: i32) -> (i32, i32) {
    %c0_i32 = arith.constant 0 : i32
    %c0_i32_0 = arith.constant 0 : i32
    %c0_i32_1 = arith.constant 0 : i32
    return %c0_i32, %c0_i32_0 : i32, i32
  }
  func.func @transform_12(%arg0: i32, %arg1: i32) -> (i32, i32) {
    %c0_i32 = arith.constant 0 : i32
    %c0_i32_0 = arith.constant 0 : i32
    %c0_i32_1 = arith.constant 0 : i32
    return %c0_i32, %c0_i32_0 : i32, i32
  }
  func.func @transform_13(%arg0: i32, %arg1: i32) -> (i32, i32) {
    %c0_i32 = arith.constant 0 : i32
    %c0_i32_0 = arith.constant 0 : i32
    %c0_i32_1 = arith.constant 0 : i32
    return %c0_i32, %c0_i32_0 : i32, i32
  }
  func.func @transform_14(%arg0: i32, %arg1: i32) -> (i32, i32) {
    %c0_i32 = arith.constant 0 : i32
    %c0_i32_0 = arith.constant 0 : i32
    %c0_i32_1 = arith.constant 0 : i32
    return %c0_i32, %c0_i32_0 : i32, i32
  }
  func.func @transform_15(%arg0: i32, %arg1: i32) -> (i32, i32, i32) {
    %c0_i32 = arith.constant 0 : i32
    %c0_i32_0 = arith.constant 0 : i32
    return %arg0, %c0_i32, %arg1 : i32, i32, i32
  }
}

module attributes {stable_mosaic.version = 11 : i64} {
  func.func @_tail_coupling_kernel(%arg0: i32, %arg1: i32, %arg2: memref<1x8x256xf32, #tpu.memory_space<vmem>>, %arg3: memref<1x8x1xf32, #tpu.memory_space<vmem>>, %arg4: memref<1x8x256xf32, #tpu.memory_space<vmem>>, %arg5: memref<1x8x256xf32, #tpu.memory_space<vmem>>, %arg6: memref<1x8x256xf32, #tpu.memory_space<vmem>>, %arg7: memref<8x8xf32, #tpu.memory_space<vmem>>, %arg8: memref<8x1xf32, #tpu.memory_space<vmem>>, %arg9: memref<8x8xf32, #tpu.memory_space<vmem>>, %arg10: memref<8x1xf32, #tpu.memory_space<vmem>>, %arg11: memref<8x1xf32, #tpu.memory_space<vmem>>, %arg12: memref<8x1xf32, #tpu.memory_space<vmem>>, %arg13: memref<8x1xf32, #tpu.memory_space<vmem>>, %arg14: memref<16x8xf32, #tpu.memory_space<vmem>>, %arg15: memref<16x1xf32, #tpu.memory_space<vmem>>, %arg16: memref<8x8xf32, #tpu.memory_space<vmem>>, %arg17: memref<8x1xf32, #tpu.memory_space<vmem>>, %arg18: memref<8x1xf32, #tpu.memory_space<vmem>>, %arg19: memref<1x8x256xf32, #tpu.memory_space<vmem>>, %arg20: memref<1x8x256xf32, #tpu.memory_space<vmem>>) attributes {dimension_semantics = [#tpu.dimension_semantics<parallel>, #tpu.dimension_semantics<parallel>], iteration_bounds = array<i64: 2, 1>, scalar_prefetch = 0 : i64, scratch_operands = 0 : i64, tpu.core_type = #tpu.core_type<tc>, window_params = [{transform_indices = @transform_0, window_bounds = array<i64: 1, 8, 256>}, {transform_indices = @transform_1, window_bounds = array<i64: 1, 8, 1>}, {transform_indices = @transform_2, window_bounds = array<i64: 1, 8, 256>}, {transform_indices = @transform_3, window_bounds = array<i64: 1, 8, 256>}, {transform_indices = @transform_4, window_bounds = array<i64: 1, 8, 256>}, {pipeline_mode = #tpu.pipeline_mode<synchronous>, transform_indices = @transform_5, window_bounds = array<i64: 8, 8>}, {pipeline_mode = #tpu.pipeline_mode<synchronous>, transform_indices = @transform_6, window_bounds = array<i64: 8, 1>}, {pipeline_mode = #tpu.pipeline_mode<synchronous>, transform_indices = @transform_7, window_bounds = array<i64: 8, 8>}, {pipeline_mode = #tpu.pipeline_mode<synchronous>, transform_indices = @transform_8, window_bounds = array<i64: 8, 1>}, {pipeline_mode = #tpu.pipeline_mode<synchronous>, transform_indices = @transform_9, window_bounds = array<i64: 8, 1>}, {pipeline_mode = #tpu.pipeline_mode<synchronous>, transform_indices = @transform_10, window_bounds = array<i64: 8, 1>}, {pipeline_mode = #tpu.pipeline_mode<synchronous>, transform_indices = @transform_11, window_bounds = array<i64: 8, 1>}, {pipeline_mode = #tpu.pipeline_mode<synchronous>, transform_indices = @transform_12, window_bounds = array<i64: 16, 8>}, {pipeline_mode = #tpu.pipeline_mode<synchronous>, transform_indices = @transform_13, window_bounds = array<i64: 16, 1>}, {pipeline_mode = #tpu.pipeline_mode<synchronous>, transform_indices = @transform_14, window_bounds = array<i64: 8, 8>}, {pipeline_mode = #tpu.pipeline_mode<synchronous>, transform_indices = @transform_15, window_bounds = array<i64: 8, 1>}, {pipeline_mode = #tpu.pipeline_mode<synchronous>, transform_indices = @transform_16, window_bounds = array<i64: 8, 1>}, {transform_indices = @transform_17, window_bounds = array<i64: 1, 8, 256>}, {transform_indices = @transform_18, window_bounds = array<i64: 1, 8, 256>}]} {
    %c0 = arith.constant 0 : index
    %c0_0 = arith.constant 0 : index
    %c0_1 = arith.constant 0 : index
    %0 = vector.load %arg2[%c0, %c0_0, %c0_1] : memref<1x8x256xf32, #tpu.memory_space<vmem>>, vector<1x8x256xf32>
    %1 = vector.shape_cast %0 : vector<1x8x256xf32> to vector<8x256xf32>
    %c0_2 = arith.constant 0 : index
    %c0_3 = arith.constant 0 : index
    %c0_4 = arith.constant 0 : index
    %2 = vector.load %arg4[%c0_2, %c0_3, %c0_4] : memref<1x8x256xf32, #tpu.memory_space<vmem>>, vector<1x8x256xf32>
    %3 = vector.shape_cast %2 : vector<1x8x256xf32> to vector<8x256xf32>
    %c0_5 = arith.constant 0 : index
    %c0_6 = arith.constant 0 : index
    %4 = vector.load %arg7[%c0_5, %c0_6] : memref<8x8xf32, #tpu.memory_space<vmem>>, vector<8x8xf32>
    %c0_7 = arith.constant 0 : index
    %c0_8 = arith.constant 0 : index
    %c0_9 = arith.constant 0 : index
    %5 = vector.load %arg3[%c0_7, %c0_8, %c0_9] : memref<1x8x1xf32, #tpu.memory_space<vmem>>, vector<1x8x1xf32>
    %6 = vector.shape_cast %5 : vector<1x8x1xf32> to vector<8x1xf32>
    %cst = arith.constant dense<0.000000e+00> : vector<8x1xf32>
    %7 = tpu.matmul %4, %6, %cst {dimension_numbers = #tpu.dot_dimension_numbers<[1], [0], [0], [1], [0, 0, 1, 1], [], []>} : vector<8x8xf32>, vector<8x1xf32>, vector<8x1xf32> -> vector<8x1xf32>
    %c0_10 = arith.constant 0 : index
    %c0_11 = arith.constant 0 : index
    %8 = vector.load %arg8[%c0_10, %c0_11] : memref<8x1xf32, #tpu.memory_space<vmem>>, vector<8x1xf32>
    %9 = arith.addf %7, %8 : vector<8x1xf32>
    %c0_12 = arith.constant 0 : index
    %c0_13 = arith.constant 0 : index
    %10 = vector.load %arg11[%c0_12, %c0_13] : memref<8x1xf32, #tpu.memory_space<vmem>>, vector<8x1xf32>
    %c0_14 = arith.constant 0 : index
    %c0_15 = arith.constant 0 : index
    %11 = vector.load %arg9[%c0_14, %c0_15] : memref<8x8xf32, #tpu.memory_space<vmem>>, vector<8x8xf32>
    %12 = vector.broadcast %9 : vector<8x1xf32> to vector<8x256xf32>
    %13 = arith.mulf %1, %12 : vector<8x256xf32>
    %cst_16 = arith.constant dense<0.000000e+00> : vector<8x256xf32>
    %14 = tpu.matmul %11, %13, %cst_16 {dimension_numbers = #tpu.dot_dimension_numbers<[1], [0], [0], [1], [0, 0, 1, 1], [], []>} : vector<8x8xf32>, vector<8x256xf32>, vector<8x256xf32> -> vector<8x256xf32>
    %c0_17 = arith.constant 0 : index
    %c0_18 = arith.constant 0 : index
    %15 = vector.load %arg10[%c0_17, %c0_18] : memref<8x1xf32, #tpu.memory_space<vmem>>, vector<8x1xf32>
    %16 = vector.broadcast %15 : vector<8x1xf32> to vector<8x256xf32>
    %17 = arith.addf %14, %16 : vector<8x256xf32>
    %18 = vector.broadcast %10 : vector<8x1xf32> to vector<8x256xf32>
    %19 = arith.mulf %18, %17 : vector<8x256xf32>
    %20 = arith.addf %3, %19 : vector<8x256xf32>
    %c0_19 = arith.constant 0 : index
    %c0_20 = arith.constant 0 : index
    %21 = vector.load %arg14[%c0_19, %c0_20] : memref<16x8xf32, #tpu.memory_space<vmem>>, vector<16x8xf32>
    %c0_21 = arith.constant 0 : index
    %c0_22 = arith.constant 0 : index
    %22 = vector.load %arg12[%c0_21, %c0_22] : memref<8x1xf32, #tpu.memory_space<vmem>>, vector<8x1xf32>
    %c0_23 = arith.constant 0 : index
    %c0_24 = arith.constant 0 : index
    %23 = vector.load %arg13[%c0_23, %c0_24] : memref<8x1xf32, #tpu.memory_space<vmem>>, vector<8x1xf32>
    %cst_25 = arith.constant dense<0.000000e+00> : vector<256xf32>
    %24 = vector.multi_reduction <add>, %20, %cst_25 [0] : vector<8x256xf32> to vector<256xf32>
    %25 = vector.shape_cast %24 : vector<256xf32> to vector<1x256xf32>
    %cst_26 = arith.constant 8.000000e+00 : f32
    %26 = vector.broadcast %cst_26 : f32 to vector<1x256xf32>
    %27 = arith.divf %25, %26 : vector<1x256xf32>
    %28 = vector.broadcast %27 : vector<1x256xf32> to vector<8x256xf32>
    %29 = arith.subf %20, %28 : vector<8x256xf32>
    %30 = arith.mulf %29, %29 : vector<8x256xf32>
    %cst_27 = arith.constant dense<0.000000e+00> : vector<256xf32>
    %31 = vector.multi_reduction <add>, %30, %cst_27 [0] : vector<8x256xf32> to vector<256xf32>
    %32 = vector.shape_cast %31 : vector<256xf32> to vector<1x256xf32>
    %cst_28 = arith.constant 8.000000e+00 : f32
    %33 = vector.broadcast %cst_28 : f32 to vector<1x256xf32>
    %34 = arith.divf %32, %33 : vector<1x256xf32>
    %cst_29 = arith.constant 9.99999997E-7 : f32
    %35 = vector.broadcast %cst_29 : f32 to vector<1x256xf32>
    %36 = arith.addf %34, %35 : vector<1x256xf32>
    %37 = math.rsqrt %36 : vector<1x256xf32>
    %38 = vector.broadcast %37 : vector<1x256xf32> to vector<8x256xf32>
    %39 = arith.mulf %29, %38 : vector<8x256xf32>
    %40 = vector.broadcast %22 : vector<8x1xf32> to vector<8x256xf32>
    %41 = arith.mulf %39, %40 : vector<8x256xf32>
    %42 = vector.broadcast %23 : vector<8x1xf32> to vector<8x256xf32>
    %43 = arith.addf %41, %42 : vector<8x256xf32>
    %cst_30 = arith.constant dense<0.000000e+00> : vector<16x256xf32>
    %44 = tpu.matmul %21, %43, %cst_30 {dimension_numbers = #tpu.dot_dimension_numbers<[1], [0], [0], [1], [0, 0, 1, 1], [], []>} : vector<16x8xf32>, vector<8x256xf32>, vector<16x256xf32> -> vector<16x256xf32>
    %c0_31 = arith.constant 0 : index
    %c0_32 = arith.constant 0 : index
    %45 = vector.load %arg15[%c0_31, %c0_32] : memref<16x1xf32, #tpu.memory_space<vmem>>, vector<16x1xf32>
    %46 = vector.broadcast %45 : vector<16x1xf32> to vector<16x256xf32>
    %47 = arith.addf %44, %46 : vector<16x256xf32>
    %48 = vector.extract_strided_slice %47 {offsets = [0, 0], sizes = [8, 256], strides = [1, 1]} : vector<16x256xf32> to vector<8x256xf32>
    %49 = vector.extract_strided_slice %47 {offsets = [8, 0], sizes = [8, 256], strides = [1, 1]} : vector<16x256xf32> to vector<8x256xf32>
    %50 = arith.mulf %48, %49 : vector<8x256xf32>
    %c0_33 = arith.constant 0 : index
    %c0_34 = arith.constant 0 : index
    %51 = vector.load %arg18[%c0_33, %c0_34] : memref<8x1xf32, #tpu.memory_space<vmem>>, vector<8x1xf32>
    %c0_35 = arith.constant 0 : index
    %c0_36 = arith.constant 0 : index
    %52 = vector.load %arg16[%c0_35, %c0_36] : memref<8x8xf32, #tpu.memory_space<vmem>>, vector<8x8xf32>
    %cst_37 = arith.constant dense<0.000000e+00> : vector<8x256xf32>
    %53 = tpu.matmul %52, %50, %cst_37 {dimension_numbers = #tpu.dot_dimension_numbers<[1], [0], [0], [1], [0, 0, 1, 1], [], []>} : vector<8x8xf32>, vector<8x256xf32>, vector<8x256xf32> -> vector<8x256xf32>
    %c0_38 = arith.constant 0 : index
    %c0_39 = arith.constant 0 : index
    %54 = vector.load %arg17[%c0_38, %c0_39] : memref<8x1xf32, #tpu.memory_space<vmem>>, vector<8x1xf32>
    %55 = vector.broadcast %54 : vector<8x1xf32> to vector<8x256xf32>
    %56 = arith.addf %53, %55 : vector<8x256xf32>
    %57 = vector.broadcast %51 : vector<8x1xf32> to vector<8x256xf32>
    %58 = arith.mulf %57, %56 : vector<8x256xf32>
    %59 = arith.addf %20, %58 : vector<8x256xf32>
    %c0_40 = arith.constant 0 : index
    %c0_41 = arith.constant 0 : index
    %c0_42 = arith.constant 0 : index
    %60 = vector.load %arg6[%c0_40, %c0_41, %c0_42] : memref<1x8x256xf32, #tpu.memory_space<vmem>>, vector<1x8x256xf32>
    %61 = vector.shape_cast %60 : vector<1x8x256xf32> to vector<8x256xf32>
    %cst_43 = arith.constant 0.000000e+00 : f32
    %62 = vector.broadcast %cst_43 : f32 to vector<8x256xf32>
    %63 = arith.subf %62, %61 : vector<8x256xf32>
    %64 = math.exp %63 : vector<8x256xf32>
    %cst_44 = arith.constant 1.000000e+00 : f32
    %65 = vector.broadcast %cst_44 : f32 to vector<8x256xf32>
    %66 = arith.addf %65, %64 : vector<8x256xf32>
    %cst_45 = arith.constant 2.000000e+00 : f32
    %67 = vector.broadcast %cst_45 : f32 to vector<8x256xf32>
    %68 = arith.divf %67, %66 : vector<8x256xf32>
    %cst_46 = arith.constant 1.000000e+00 : f32
    %69 = vector.broadcast %cst_46 : f32 to vector<8x256xf32>
    %70 = arith.subf %68, %69 : vector<8x256xf32>
    %cst_47 = arith.constant 1.000000e+00 : f32
    %71 = vector.broadcast %cst_47 : f32 to vector<8x256xf32>
    %72 = arith.mulf %71, %70 : vector<8x256xf32>
    %c0_48 = arith.constant 0 : index
    %c0_49 = arith.constant 0 : index
    %c0_50 = arith.constant 0 : index
    %73 = vector.load %arg19[%c0_48, %c0_49, %c0_50] : memref<1x8x256xf32, #tpu.memory_space<vmem>>, vector<1x8x256xf32>
    %74 = vector.shape_cast %73 : vector<1x8x256xf32> to vector<8x256xf32>
    %75 = vector.shape_cast %72 : vector<8x256xf32> to vector<1x8x256xf32>
    tpu.vector_store %arg19[%c0_48, %c0_49, %c0_50], %75 {strides = array<i32>} : memref<1x8x256xf32, #tpu.memory_space<vmem>>, vector<1x8x256xf32>,
    %c0_51 = arith.constant 0 : index
    %c0_52 = arith.constant 0 : index
    %c0_53 = arith.constant 0 : index
    %76 = vector.load %arg5[%c0_51, %c0_52, %c0_53] : memref<1x8x256xf32, #tpu.memory_space<vmem>>, vector<1x8x256xf32>
    %77 = vector.shape_cast %76 : vector<1x8x256xf32> to vector<8x256xf32>
    %78 = math.exp %72 : vector<8x256xf32>
    %79 = arith.mulf %77, %78 : vector<8x256xf32>
    %80 = arith.addf %79, %59 : vector<8x256xf32>
    %c0_54 = arith.constant 0 : index
    %c0_55 = arith.constant 0 : index
    %c0_56 = arith.constant 0 : index
    %81 = vector.load %arg20[%c0_54, %c0_55, %c0_56] : memref<1x8x256xf32, #tpu.memory_space<vmem>>, vector<1x8x256xf32>
    %82 = vector.shape_cast %81 : vector<1x8x256xf32> to vector<8x256xf32>
    %83 = vector.shape_cast %80 : vector<8x256xf32> to vector<1x8x256xf32>
    tpu.vector_store %arg20[%c0_54, %c0_55, %c0_56], %83 {strides = array<i32>} : memref<1x8x256xf32, #tpu.memory_space<vmem>>, vector<1x8x256xf32>,
    return
  }
  func.func @transform_0(%arg0: i32, %arg1: i32) -> (i32, i32, i32) {
    %c0_i32 = arith.constant 0 : i32
    %c0_i32_0 = arith.constant 0 : i32
    return %arg0, %c0_i32, %arg1 : i32, i32, i32
  }
  func.func @transform_1(%arg0: i32, %arg1: i32) -> (i32, i32, i32) {
    %c0_i32 = arith.constant 0 : i32
    %c0_i32_0 = arith.constant 0 : i32
    %c0_i32_1 = arith.constant 0 : i32
    return %arg0, %c0_i32, %c0_i32_0 : i32, i32, i32
  }
  func.func @transform_2(%arg0: i32, %arg1: i32) -> (i32, i32, i32) {
    %c0_i32 = arith.constant 0 : i32
    %c0_i32_0 = arith.constant 0 : i32
    return %arg0, %c0_i32, %arg1 : i32, i32, i32
  }
  func.func @transform_3(%arg0: i32, %arg1: i32) -> (i32, i32, i32) {
    %c0_i32 = arith.constant 0 : i32
    %c0_i32_0 = arith.constant 0 : i32
    return %arg0, %c0_i32, %arg1 : i32, i32, i32
  }
  func.func @transform_4(%arg0: i32, %arg1: i32) -> (i32, i32, i32) {
    %c0_i32 = arith.constant 0 : i32
    %c0_i32_0 = arith.constant 0 : i32
    return %arg0, %c0_i32, %arg1 : i32, i32, i32
  }
  func.func @transform_5(%arg0: i32, %arg1: i32) -> (i32, i32) {
    %c0_i32 = arith.constant 0 : i32
    %c0_i32_0 = arith.constant 0 : i32
    %c0_i32_1 = arith.constant 0 : i32
    return %c0_i32, %c0_i32_0 : i32, i32
  }
  func.func @transform_6(%arg0: i32, %arg1: i32) -> (i32, i32) {
    %c0_i32 = arith.constant 0 : i32
    %c0_i32_0 = arith.constant 0 : i32
    %c0_i32_1 = arith.constant 0 : i32
    return %c0_i32, %c0_i32_0 : i32, i32
  }
  func.func @transform_7(%arg0: i32, %arg1: i32) -> (i32, i32) {
    %c0_i32 = arith.constant 0 : i32
    %c0_i32_0 = arith.constant 0 : i32
    %c0_i32_1 = arith.constant 0 : i32
    return %c0_i32, %c0_i32_0 : i32, i32
  }
  func.func @transform_8(%arg0: i32, %arg1: i32) -> (i32, i32) {
    %c0_i32 = arith.constant 0 : i32
    %c0_i32_0 = arith.constant 0 : i32
    %c0_i32_1 = arith.constant 0 : i32
    return %c0_i32, %c0_i32_0 : i32, i32
  }
  func.func @transform_9(%arg0: i32, %arg1: i32) -> (i32, i32) {
    %c0_i32 = arith.constant 0 : i32
    %c0_i32_0 = arith.constant 0 : i32
    %c0_i32_1 = arith.constant 0 : i32
    return %c0_i32, %c0_i32_0 : i32, i32
  }
  func.func @transform_10(%arg0: i32, %arg1: i32) -> (i32, i32) {
    %c0_i32 = arith.constant 0 : i32
    %c0_i32_0 = arith.constant 0 : i32
    %c0_i32_1 = arith.constant 0 : i32
    return %c0_i32, %c0_i32_0 : i32, i32
  }
  func.func @transform_11(%arg0: i32, %arg1: i32) -> (i32, i32) {
    %c0_i32 = arith.constant 0 : i32
    %c0_i32_0 = arith.constant 0 : i32
    %c0_i32_1 = arith.constant 0 : i32
    return %c0_i32, %c0_i32_0 : i32, i32
  }
  func.func @transform_12(%arg0: i32, %arg1: i32) -> (i32, i32) {
    %c0_i32 = arith.constant 0 : i32
    %c0_i32_0 = arith.constant 0 : i32
    %c0_i32_1 = arith.constant 0 : i32
    return %c0_i32, %c0_i32_0 : i32, i32
  }
  func.func @transform_13(%arg0: i32, %arg1: i32) -> (i32, i32) {
    %c0_i32 = arith.constant 0 : i32
    %c0_i32_0 = arith.constant 0 : i32
    %c0_i32_1 = arith.constant 0 : i32
    return %c0_i32, %c0_i32_0 : i32, i32
  }
  func.func @transform_14(%arg0: i32, %arg1: i32) -> (i32, i32) {
    %c0_i32 = arith.constant 0 : i32
    %c0_i32_0 = arith.constant 0 : i32
    %c0_i32_1 = arith.constant 0 : i32
    return %c0_i32, %c0_i32_0 : i32, i32
  }
  func.func @transform_15(%arg0: i32, %arg1: i32) -> (i32, i32) {
    %c0_i32 = arith.constant 0 : i32
    %c0_i32_0 = arith.constant 0 : i32
    %c0_i32_1 = arith.constant 0 : i32
    return %c0_i32, %c0_i32_0 : i32, i32
  }
  func.func @transform_16(%arg0: i32, %arg1: i32) -> (i32, i32) {
    %c0_i32 = arith.constant 0 : i32
    %c0_i32_0 = arith.constant 0 : i32
    %c0_i32_1 = arith.constant 0 : i32
    return %c0_i32, %c0_i32_0 : i32, i32
  }
  func.func @transform_17(%arg0: i32, %arg1: i32) -> (i32, i32, i32) {
    %c0_i32 = arith.constant 0 : i32
    %c0_i32_0 = arith.constant 0 : i32
    return %arg0, %c0_i32, %arg1 : i32, i32, i32
  }
  func.func @transform_18(%arg0: i32, %arg1: i32) -> (i32, i32, i32) {
    %c0_i32 = arith.constant 0 : i32
    %c0_i32_0 = arith.constant 0 : i32
    return %arg0, %c0_i32, %arg1 : i32, i32, i32
  }
}

</mosaic_0001>

<bundles_post_ra>
// kernel: invblock_forward.10
= control target key start
LH: loop header
LB: loop body
LE: loop exit
PB: predicated region body
PF: predicated region fallthrough
CT: control target
= control target key end

     0   :  { %s1139_s24 = smov 0   ;;  %s1141_s25 = smov 0   ;;  %s1294_s0 = inlined_call_operand.vmem [shape: f32[2,16,256], index: 0, kind: input, shape index: {}, may-alias: {0,1}]   ;;  %s1295_s1 = inlined_call_operand.vmem [shape: f32[2,16,256], index: 1, kind: input, shape index: {}, may-alias: {0,1}]   ;;  %s1296_s2 = inlined_call_operand.vmem [shape: f32[16,9], index: 2, kind: input, shape index: {}, may-alias: {2,3}]   ;;  %s1297_s3 = inlined_call_operand.vmem [shape: f32[16,9], index: 3, kind: input, shape index: {}, may-alias: {2,3}]   ;;  %s1298_s4 = inlined_call_operand.vmem [shape: f32[16,1], index: 4, kind: input, shape index: {}, may-alias: {4,5}]   ;;  %s1299_s5 = inlined_call_operand.vmem [shape: f32[16,1], index: 5, kind: input, shape index: {}, may-alias: {4,5}]   ;;  %s1300_s6 = inlined_call_operand.vmem [shape: f32[2,8,256], index: 6, kind: output, shape index: {0}]   ;;  %s1301_s7 = inlined_call_operand.vmem [shape: f32[2,8,1], index: 7, kind: output, shape index: {1}]  }
   0x1   :  { %s1143_s26 = smov 0  }
   0x2 LB: > { %s30_s27 = sadd.s32 1, %s1079_s25  ;;  %p987_p0 = scmp.ge.s32.totalorder %s1083_s26, 1  ;;  %s1083_s26 = sphi %s1143_s26, %s18_s26   ;;  %s1079_s25 = sphi %s1141_s25, %s1311_s25   ;;  %s1075_s24 = sphi %s1139_s24, %s1310_s24  }
   0x3   : > { %p32_p1 = scmp.ge.s32.totalorder %s30_s27, 2  ;;  %p326_p2 = scmp.lt.s32.totalorder %s1083_s26, 3 }
   0x5   : > { %s1313_s27 = smov (%p32_p1, %s30_s27), 0  ;;  %p327_p3 = pnand %p987_p0, %p326_p2 }
   0x6   : > { %p401_p4 = scmp.lt.s32.totalorder (!%p327_p3), %s1075_s24, 1  ;;  %s1088_s11 = smov (!%p327_p3), 127  }
   0x7   : > { %330 = sbr.rel (%p327_p3) target bundleno = 451 (0x1c3), region = 44  ;;  %s1089_s12 = smov (!%p327_p3), 1  }
   0x8   : > { %s1096_s23 = smov (!%p327_p3), 16   ;;  %s1097_s28 = smov (!%p327_p3), 112  }
   0xc   : > { %v459_v0 = vld [vmem:[%s1296_s2] sm:$0xff]  ;;  %v1085_v1 = vmov 3   ;;  %s1315_s24 = smov (!%p401_p4, %s1075_s24), 1  ;;  %v1086_v2 = vmov 5   ;;  %v1087_v3 = vmov 4   ;;  %v1090_v6 = vmov 0  }
   0xd   : > { %1042 = vset.pattern.permute.xlu2 %v1085_v1  ;;  %1045 = vset.pattern.permute.xlu1 %v1086_v2  ;;  %s999_s30 = sshll.u32 %s1315_s24, 5  ;;  %v460_v5 = vld [vmem:[%s1298_s4] sm:$0xff]  ;;  %v1091_v10 = vmov 2   ;;  %v1092_v11 = vmov 1   ;;  %v995_v12 = vld [vmem:[%s1297_s3 + $0x8] sm:$0xff]  ;;  %v1093_v13 = vmov 7   ;;  %v461_v19 = vlaneseq }
   0xe   : > { %526 = vperm.xlu2 %1042, %v459_v0   ;;  %1044 = vset.pattern.permute.xlu0 %v1087_v3  ;;  %s409_s10 = scalar_lea.vmem %s1294_s0, %s999_s30  ;;  %s1001_s15 = sadd.s32 16, %s999_s30  ;;  %v1094_v14 = vmov 6   ;;  %v1095_v15 = vmov 8   ;;  %v996_v16 = vld [vmem:[%s1299_s5 + $0x8] sm:$0xff]  ;;  %vm496_vm0 = vcmask 7168   ;;  %vm513_vm3 = vcmask 1039360  }
   0xf   : > { %v1166_v4 = vld [vmem:[%s409_s10] sm:$0xff]  ;;  %v1173_v7 = vld [vmem:[%s409_s10 + $0x8] sm:$0xff]  ;;  %s419_s18 = scalar_lea.vmem %s1295_s1, %s1001_s15  ;;  %v462_v20 = vand.u32 127, %v461_v19  ;;  %vm582_vm6 = vcmask 130048   ;;  %vm617_vm7 = vcmask 916480   ;;  %s1002_s29 = sshll.u32 %s1315_s24, 4 }
  0x10   : > { %509 = vrot.lane.b32.xlu1 %v1166_v4, %s1088_s11  ;;  %492 = vrot.lane.b32.xlu0 %v1166_v4, %s1089_s12  ;;  %v1180_v8 = vld [vmem:[%s419_s18] sm:$0xff]  ;;  %v1183_v9 = vld [vmem:[%s419_s18 + $0x8] sm:$0xff]  ;;  %s449_s9 = scalar_lea.vmem %s1300_s6, %s1002_s29  ;;  %s994_s10 = sshll.u32 %s1315_s24, 3 }
  0x11   : > { %v468_v22 = vand.u32 15, %v462_v20  ;;  %v463_v24 = vadd.s32 128, %v462_v20  ;;  %s456_s13 = scalar_lea.vmem %s1301_s7, %s994_s10 }
  0x13   : > { %vm1194_vm1 = vcmp.ge.s32.totalorder %v468_v22, 1  ;;  %v475_v30 = vand.u32 15, %v463_v24  ;;  %vm1214_vm4 = vcmp.le.s32.totalorder %v468_v22, 14 }
  0x15   : > { %vm1204_vm2 = vcmp.ge.s32.totalorder %v475_v30, 1  ;;  %vm1218_vm5 = vcmp.le.s32.totalorder %v475_v30, 14 }
  0x16   : > { %1043 = vset.pattern.permute.xlu2 %v1090_v6 }
  0x17   : > { %533 = vperm.xlu2 %1043, %v460_v5  }
  0x18   : > { %511 = vrot.lane.b32.xlu1 %v1173_v7, %s1088_s11  ;;  %494 = vrot.lane.b32.xlu0 %v1173_v7, %s1089_s12 }
  0x1f   : > { %555 = vperm.xlu2 %1043, %v459_v0  }
  0x20   : > { %547 = vperm.xlu1 %1045, %v459_v0   ;;  %539 = vperm.xlu0 %1044, %v459_v0  }
  0x27   : > { %630 = vrot.lane.b32.xlu2 %v1180_v8, %s1089_s12 }
  0x28   : > { %1048 = vset.pattern.permute.xlu2 %v1091_v10  ;;  %1046 = vset.pattern.permute.xlu1 %v1092_v11 }
  0x29   : > { %632 = vrot.lane.b32.xlu0 %v1183_v9, %s1089_s12  ;;  %561 = vperm.xlu1 %1046, %v459_v0  }
  0x2a   : > { %1047 = vset.pattern.permute.xlu0 %v1090_v6 }
  0x2f   : > { %642 = vrot.lane.b32.xlu2 %v1183_v9, %s1088_s11 }
  0x31   : > { %681 = vperm.xlu0 %1047, %v995_v12   ;;  %640 = vrot.lane.b32.xlu1 %v1180_v8, %s1088_s11 }
  0x37   : > { %569 = vperm.xlu2 %1048, %v459_v0  }
  0x39   : > { %1051 = vset.pattern.permute.xlu0 %v1091_v10  ;;  %687 = vperm.xlu1 %1046, %v995_v12  }
  0x3a   : > { %695 = vperm.xlu0 %1051, %v995_v12  }
  0x3f   : > { %1050 = vset.pattern.permute.xlu2 %v1093_v13 }
  0x40   : > { %596 = vperm.xlu2 %1050, %v459_v0  }
  0x41   : > { %1049 = vset.pattern.permute.xlu1 %v1094_v14 }
  0x42   : > { %1054 = vset.pattern.permute.xlu0 %v1085_v1  ;;  %590 = vperm.xlu1 %1049, %v459_v0  }
  0x43   : > { %652 = vperm.xlu0 %1054, %v995_v12  }
  0x48   : > { %721 = vperm.xlu2 %1050, %v995_v12  }
  0x4a   : > { %715 = vperm.xlu1 %1049, %v995_v12  }
  0x4b   : > { %1058 = vset.pattern.permute.xlu0 %v1095_v15 }
  0x50   : > { %1053 = vset.pattern.permute.xlu2 %v1095_v15 }
  0x51   : > { %729 = vperm.xlu2 %1053, %v995_v12  }
  0x52   : > { %1052 = vset.pattern.permute.xlu1 %v1095_v15 }
  0x53   : > { %604 = vperm.xlu1 %1052, %v459_v0  }
  0x59   : > { %1056 = vset.pattern.permute.xlu2 %v1087_v3 }
  0x5a   : > { %665 = vperm.xlu2 %1056, %v995_v12  }
  0x5b   : > { %1055 = vset.pattern.permute.xlu1 %v1090_v6 }
  0x5c   : > { %659 = vperm.xlu1 %1055, %v996_v16  }
  0x64   : > { %1057 = vset.pattern.permute.xlu1 %v1086_v2 }
  0x65   : > { %673 = vperm.xlu1 %1057, %v995_v12  }
  0x68   : > { %v527_v17 = vpop.permute.xlu2 %526 }
  0x71   : > { %v534_v18 = vpop.permute.xlu2 %533 }
  0x79   : > { %v556_v21 = vpop.permute.xlu2 %555 }
  0x81   : > { %v631_v31 = vpop.permute.xlu2 %630 }
  0x82   : > { %v510_v25 = vpop.permute.xlu1 %509  ;;  %v493_v26 = vpop.permute.xlu0 %492  ;;  %v637_v12 = vsel %vm496_vm0, 0.0, %v631_v31 }
  0x83   : > { %v500_v27 = vsel %vm496_vm0, 0.0, %v493_v26  ;;  %v638_v15 = vsel %vm1194_vm1, %v637_v12, 0.0 }
  0x84   : > { %v1201_v28 = vsel %vm1194_vm1, %v500_v27, 0.0 }
  0x85   : > { %v529_v29 = vmul.f32 %v527_v17, %v1201_v28  ;;  %v558_v60 = vmul.f32 %v556_v21, %v1201_v28 }
  0x87   : > { %v536_v32 = vadd.f32 %v534_v18, %v529_v29 }
  0x89   : > { %v643_v44 = vpop.permute.xlu2 %642 }
  0x8a   : > { %v512_v34 = vpop.permute.xlu1 %511  ;;  %v495_v35 = vpop.permute.xlu0 %494  ;;  %v647_v13 = vsel %vm513_vm3, %v643_v44, 0.0 }
  0x8b   : > { %v497_v36 = vsel %vm496_vm0, %v493_v26, %v495_v35  ;;  %v514_v41 = vsel %vm513_vm3, %v510_v25, %v512_v34  ;;  %v517_v42 = vsel %vm513_vm3, %v512_v34, 0.0 }
  0x8c   : > { %v1211_v37 = vsel %vm1204_vm2, %v497_v36, 0.0  ;;  %v1226_v45 = vsel %vm1214_vm4, %v514_v41, 0.0  ;;  %v1230_v46 = vsel %vm1218_vm5, %v517_v42, 0.0 }
  0x8d   : > { %v530_v38 = vmul.f32 %v527_v17, %v1211_v37  ;;  %v559_v61 = vmul.f32 %v556_v21, %v1211_v37  ;;  %v649_v17 = vsel %vm1218_vm5, %v647_v13, 0.0 }
  0x8f   : > { %v537_v43 = vadd.f32 %v534_v18, %v530_v38 }
  0x91   : > { %v570_v58 = vpop.permute.xlu2 %569 }
  0x92   : > { %v548_v47 = vpop.permute.xlu1 %547  ;;  %v540_v48 = vpop.permute.xlu0 %539  ;;  %v572_v0 = vmul.f32 %v570_v58, %v1226_v45  ;;  %v573_v1 = vmul.f32 %v570_v58, %v1230_v46 }
  0x93   : > { %v550_v49 = vmul.f32 %v548_v47, %v1226_v45  ;;  %v551_v50 = vmul.f32 %v548_v47, %v1230_v46  ;;  %v542_v51 = vmul.f32 %v540_v48, %v1166_v4  ;;  %v543_v52 = vmul.f32 %v540_v48, %v1173_v7 }
  0x95   : > { %v544_v53 = vadd.f32 %v542_v51, %v536_v32  ;;  %v545_v54 = vadd.f32 %v543_v52, %v537_v43 }
  0x97   : > { %v1236_v55 = vadd.f32 %v550_v49, %v544_v53  ;;  %v1238_v56 = vadd.f32 %v551_v50, %v545_v54 }
  0x9a   : > { %v597_v16 = vpop.permute.xlu2 %596 }
  0x9b   : > { %v633_v57 = vpop.permute.xlu0 %632  ;;  %v562_v59 = vpop.permute.xlu1 %561  ;;  %v599_v39 = vmul.f32 %v597_v16, %v1166_v4  ;;  %v600_v47 = vmul.f32 %v597_v16, %v1173_v7 }
  0x9c   : > { %v564_v62 = vmul.f32 %v562_v59, %v1166_v4  ;;  %v565_v63 = vmul.f32 %v562_v59, %v1173_v7  ;;  %v634_v14 = vsel %vm496_vm0, %v631_v31, %v633_v57 }
  0x9d   : > { %v639_v18 = vsel %vm1204_vm2, %v634_v14, 0.0 }
  0x9e   : > { %v566_v2 = vadd.f32 %v564_v62, %v558_v60  ;;  %v567_v3 = vadd.f32 %v565_v63, %v559_v61 }
  0xa0   : > { %v574_v5 = vadd.f32 %v572_v0, %v566_v2  ;;  %v575_v6 = vadd.f32 %v573_v1, %v567_v3 }
  0xa2   : > { %578 = vrot.lane.b32.xlu2 %v574_v5, %s1096_s23  ;;  %580 = vrot.lane.b32.xlu0 %v575_v6, %s1096_s23  ;;  %v722_v34 = vpop.permute.xlu2 %721 }
  0xa3   : > { %v682_v10 = vpop.permute.xlu0 %681  ;;  %v641_v11 = vpop.permute.xlu1 %640  ;;  %v724_v36 = vmul.f32 %v722_v34, %v1180_v8  ;;  %v725_v57 = vmul.f32 %v722_v34, %v1183_v9 }
  0xa4   : > { %v644_v19 = vsel %vm513_vm3, %v641_v11, %v643_v44  ;;  %v684_v20 = vmul.f32 %v682_v10, %v638_v15  ;;  %v685_v24 = vmul.f32 %v682_v10, %v639_v18 }
  0xa5   : > { %v648_v23 = vsel %vm1214_vm4, %v644_v19, 0.0 }
  0xab   : > { %v688_v21 = vpop.permute.xlu1 %687  ;;  %v730_v38 = vpop.permute.xlu2 %729 }
  0xac   : > { %v696_v22 = vpop.permute.xlu0 %695  ;;  %v690_v25 = vmul.f32 %v688_v21, %v1180_v8  ;;  %v691_v26 = vmul.f32 %v688_v21, %v1183_v9  ;;  %v732_v42 = vmul.f32 %v730_v38, %v648_v23 }
  0xad   : > { %v699_v27 = vmul.f32 %v696_v22, %v649_v17  ;;  %v698_v31 = vmul.f32 %v696_v22, %v648_v23 }
  0xae   : > { %v692_v29 = vadd.f32 %v690_v25, %v684_v20  ;;  %v693_v30 = vadd.f32 %v691_v26, %v685_v24 }
  0xb0   : > { %v700_v32 = vadd.f32 %v698_v31, %v692_v29  ;;  %v701_v33 = vadd.f32 %v699_v27, %v693_v30 }
  0xb2   : > { %706 = vrot.lane.b32.xlu2 %v701_v33, %s1096_s23  ;;  %704 = vrot.lane.b32.xlu1 %v700_v32, %s1096_s23 }
  0xb4   : > { %v591_v35 = vpop.permute.xlu1 %590  ;;  %v666_v62 = vpop.permute.xlu2 %665 }
  0xb5   : > { %v593_v48 = vmul.f32 %v591_v35, %v1201_v28  ;;  %v594_v49 = vmul.f32 %v591_v35, %v1211_v37  ;;  %v733_v28 = vmul.f32 %v730_v38, %v649_v17  ;;  %v653_v37 = vpop.permute.xlu0 %652 }
  0xb6   : > { %v655_v63 = vmul.f32 %v653_v37, %v638_v15  ;;  %v656_v0 = vmul.f32 %v653_v37, %v639_v18 }
  0xb7   : > { %v601_v51 = vadd.f32 %v599_v39, %v593_v48  ;;  %v602_v52 = vadd.f32 %v600_v47, %v594_v49 }
  0xbc   : > { %v716_v40 = vpop.permute.xlu1 %715 }
  0xbd   : > { %v718_v41 = vmul.f32 %v716_v40, %v638_v15  ;;  %v719_v58 = vmul.f32 %v716_v40, %v639_v18  ;;  %v1098_v40 = vmov 256.0  }
  0xbe   : > { %1059 = vrcp.f32 %v1098_v40 }
  0xbf   : > { %v726_v43 = vadd.f32 %v724_v36, %v718_v41  ;;  %v727_v7 = vadd.f32 %v725_v57, %v719_v58 }
  0xc1   : > { %v734_v44 = vadd.f32 %v732_v42, %v726_v43  ;;  %v735_v61 = vadd.f32 %v733_v28, %v727_v7 }
  0xc3   : > { %738 = vrot.lane.b32.xlu2 %v734_v44, %s1097_s28 }
  0xc4   : > { %v1060_v41 = vpop.eup %1059 }
  0xc5   : > { %v605_v50 = vpop.permute.xlu1 %604  ;;  %v756_v42 = vmul.f32 256.0, %v1060_v41  ;;  %vm760_vm8 = vweird.f32 %v1060_v41 }
  0xc6   : > { %v607_v53 = vmul.f32 %v605_v50, %v1226_v45  ;;  %v608_v54 = vmul.f32 %v605_v50, %v1230_v46  ;;  %v668_v45 = vmul.f32 %v666_v62, %v1180_v8  ;;  %v669_v46 = vmul.f32 %v666_v62, %v1183_v9 }
  0xc7   : > { %v757_v43 = vsub.f32 1.0, %v756_v42 }
  0xc8   : > { %v609_v59 = vadd.f32 %v607_v53, %v601_v51  ;;  %v610_v4 = vadd.f32 %v608_v54, %v602_v52 }
  0xc9   : > { %v758_v44 = vmul.f32 %v1060_v41, %v757_v43 }
  0xca   : > { %615 = vrot.lane.b32.xlu1 %v610_v4, %s1097_s28  ;;  %613 = vrot.lane.b32.xlu0 %v609_v59, %s1097_s28 }
  0xcb   : > { %v759_v39 = vadd.f32 %v1060_v41, %v758_v44 }
  0xcd   : > { %v761_v47 = vsel %vm760_vm8, %v1060_v41, %v759_v39 }
  0xce   : > { %v660_v60 = vpop.permute.xlu1 %659 }
  0xcf   : > { %v662_v1 = vadd.f32 %v660_v60, %v655_v63  ;;  %v663_v2 = vadd.f32 %v660_v60, %v656_v0 }
  0xd1   : > { %v670_v5 = vadd.f32 %v668_v45, %v662_v1  ;;  %v671_v6 = vadd.f32 %v669_v46, %v663_v2 }
  0xd2   : > { %740 = vrot.lane.b32.xlu0 %v735_v61, %s1097_s28 }
  0xd7   : > { %v674_v3 = vpop.permute.xlu1 %673 }
  0xd8   : > { %v676_v10 = vmul.f32 %v674_v3, %v648_v23  ;;  %v677_v11 = vmul.f32 %v674_v3, %v649_v17 }
  0xda   : > { %v678_v12 = vadd.f32 %v676_v10, %v670_v5  ;;  %v679_v13 = vadd.f32 %v677_v11, %v671_v6 }
  0xfc   : > { %v579_v14 = vpop.permute.xlu2 %578 }
  0xfd   : > { %v586_v18 = vsel %vm582_vm6, 0.0, %v579_v14 }
  0xfe   : > { %v587_v17 = vadd.f32 %v586_v18, %v1236_v55 }
 0x10c   : > { %v707_v20 = vpop.permute.xlu2 %706 }
 0x114   : > { %v581_v16 = vpop.permute.xlu0 %580 }
 0x115   : > { %v583_v9 = vsel %vm582_vm6, %v579_v14, %v581_v16 }
 0x116   : > { %v588_v26 = vadd.f32 %v583_v9, %v1238_v56 }
 0x11d   : > { %v739_v27 = vpop.permute.xlu2 %738 }
 0x124   : > { %v705_v19 = vpop.permute.xlu1 %704 }
 0x125   : > { %v708_v21 = vsel %vm582_vm6, %v705_v19, %v707_v20  ;;  %v711_v22 = vsel %vm582_vm6, 0.0, %v705_v19 }
 0x126   : > { %v712_v23 = vadd.f32 %v711_v22, %v678_v12  ;;  %v713_v29 = vadd.f32 %v708_v21, %v679_v13 }
 0x13c   : > { %v614_v15 = vpop.permute.xlu0 %613  ;;  %v616_v8 = vpop.permute.xlu1 %615 }
 0x13d   : > { %v621_v24 = vsel %vm617_vm7, %v616_v8, 0.0  ;;  %v618_v25 = vsel %vm617_vm7, %v614_v15, %v616_v8 }
 0x13e   : > { %v623_v33 = vadd.f32 %v621_v24, %v588_v26  ;;  %v622_v34 = vadd.f32 %v618_v25, %v587_v17 }
 0x144   : > { %v741_v30 = vpop.permute.xlu0 %740 }
 0x145   : > { %v742_v31 = vsel %vm617_vm7, %v739_v27, %v741_v30  ;;  %v745_v32 = vsel %vm617_vm7, %v741_v30, 0.0 }
 0x146   : > { %v746_v35 = vadd.f32 %v742_v31, %v712_v23  ;;  %v747_v36 = vadd.f32 %v745_v32, %v713_v29 }
 0x148   : > { %v748_v55 = vmul.f32 %v746_v35, %v622_v34  ;;  %v749_v56 = vmul.f32 %v747_v36, %v623_v33 }
 0x14a   : > { %751 = vst [vmem:[%s449_s9 + $0x8] sm:$0xff] %v749_v56  ;;  %v752_v38 = vadd.f32 %v749_v56, %v748_v55 }
 0x14b   : > { %750 = vst [vmem:[%s449_s9] sm:$0xff] %v748_v55 }
 0x14c   : > { %753 = vadd.xlane.f32.xlu1 %v752_v38 }
 0x1bf   : > { %v754_v48 = vpop.xlane.xlu1 %753 }
 0x1c0   : > { %v762_v49 = vmul.f32 %v761_v47, %v754_v48 }
 0x1c2   : > { %763 = vst.msk [vmem:[%s456_s13] sm:$0xff] %vm496_vm0, %v762_v49 }
 0x1c3 PF: > { %s18_s26 = sadd.s32 1, %s1083_s26   ;;  %s1310_s24 = smov %s1079_s25 }
 0x1c4   : > { %p15_p5 = scmp.ge.s32.totalorder %s18_s26, 4   ;;  %s1311_s25 = smov %s1313_s27 }
 0x1c6   :  { %17 = sbr.rel (!%p15_p5) target bundleno = 2 (0x2), region = 101 }

// kernel: invblock_forward.9
= control target key start
LH: loop header
LB: loop body
LE: loop exit
PB: predicated region body
PF: predicated region fallthrough
CT: control target
= control target key end

     0   :  { %s838_s27 = smov 0   ;;  %s840_s28 = smov 0   ;;  %s908_s0 = inlined_call_operand.vmem [shape: f32[2,8,256], index: 0, kind: input, shape index: {}]   ;;  %s909_s1 = inlined_call_operand.vmem [shape: f32[8,8], index: 1, kind: input, shape index: {}]   ;;  %s910_s2 = inlined_call_operand.vmem [shape: f32[8,1], index: 2, kind: input, shape index: {}]   ;;  %s911_s3 = inlined_call_operand.vmem [shape: f32[8,1], index: 3, kind: input, shape index: {}]   ;;  %s912_s4 = inlined_call_operand.vmem [shape: f32[8,1], index: 4, kind: input, shape index: {}]   ;;  %s913_s5 = inlined_call_operand.vmem [shape: f32[16,8], index: 5, kind: input, shape index: {}]   ;;  %s914_s6 = inlined_call_operand.vmem [shape: f32[16,1], index: 6, kind: input, shape index: {}]   ;;  %s915_s7 = inlined_call_operand.vmem [shape: f32[2,8,256], index: 7, kind: output, shape index: {0}]   ;;  %s916_s8 = inlined_call_operand.vmem [shape: f32[2,16,256], index: 8, kind: output, shape index: {1}]  }
   0x1   :  { %s842_s29 = smov 0  }
   0x2 LB: > { %s31_s30 = sadd.s32 1, %s785_s28  ;;  %p714_p0 = scmp.ge.s32.totalorder %s789_s29, 1  ;;  %s789_s29 = sphi %s842_s29, %s19_s29   ;;  %s785_s28 = sphi %s840_s28, %s918_s28   ;;  %s781_s27 = sphi %s838_s27, %s917_s27  }
   0x3   : > { %p33_p1 = scmp.ge.s32.totalorder %s31_s30, 2  ;;  %p288_p2 = scmp.lt.s32.totalorder %s789_s29, 3 }
   0x5   : > { %s920_s30 = smov (%p33_p1, %s31_s30), 0  ;;  %p289_p3 = pnand %p714_p0, %p288_p2 }
   0x6   : > { %p340_p4 = scmp.lt.s32.totalorder (!%p289_p3), %s781_s27, 1 }
   0x7   : > { %292 = sbr.rel (%p289_p3) target bundleno = 348 (0x15c), region = 48 }
   0xc   : > { %v372_v0 = vld [vmem:[%s910_s2] sm:$0xff]  ;;  %v791_v1 = vmov 0   ;;  %s922_s27 = smov (!%p340_p4, %s781_s27), 1  ;;  %vm378_vm0 = vcmask 64512   ;;  %v792_v8 = vmov 8.0   ;;  %v506_v54 = vld [vmem:[%s914_s6 + $0x8] sm:$0xff] }
   0xd   : > { %758 = vset.pattern.permute.xlu0 %v791_v1  ;;  %759 = vset.pattern.permute.xlu1 %v791_v1  ;;  %v425_v2 = vld [vmem:[%s912_s4] sm:$0xff]  ;;  %s729_s13 = sshll.u32 %s922_s27, 4  ;;  %761 = vrcp.f32 %v792_v8  ;;  %s731_s14 = sshll.u32 %s922_s27, 5 }
   0xe   : > { %375 = vperm.xlu0 %758, %v372_v0   ;;  %498 = vperm.xlu1 %759, %v425_v2   ;;  %s347_s16 = scalar_lea.vmem %s908_s0, %s729_s13  ;;  %v371_v3 = vld [vmem:[%s909_s1] sm:$0xff]  ;;  %s357_s25 = scalar_lea.vmem %s915_s7, %s729_s13 }
   0xf   : > { %760 = vset.pattern.permute.xlu2 %v791_v1  ;;  %v369_v4 = vld [vmem:[%s347_s16] sm:$0xff]  ;;  %v370_v5 = vld [vmem:[%s347_s16 + $0x8] sm:$0xff]  ;;  %s367_s17 = scalar_lea.vmem %s916_s8, %s731_s14 }
  0x10   : > { %397 = vmatpush.msra.mxu0 %v369_v4  ;;  %417 = vmatpush.msra.mxu1 %v370_v5  ;;  %v424_v6 = vld [vmem:[%s911_s3] sm:$0xff] }
  0x11   : > { %v505_v7 = vld [vmem:[%s914_s6] sm:$0xff]  ;;  %721 = vmatmul.msk.f32.vlgmr.msra.gmra.mxu0 %vm378_vm0, %v371_v3  ;;  %722 = vmatmul.msk.f32.vlgmr.msra.gmra.mxu1 %vm378_vm0, %v371_v3 }
  0x12   : > { %514 = vperm.xlu2 %760, %v506_v54  }
  0x13   : > { %v762_v9 = vpop.eup %761 }
  0x14   : > { %v439_v10 = vmul.f32 8.0, %v762_v9  ;;  %vm443_vm1 = vweird.f32 %v762_v9 }
  0x16   : > { %491 = vperm.xlu0 %758, %v424_v6   ;;  %509 = vperm.xlu1 %759, %v505_v7   ;;  %v440_v14 = vsub.f32 1.0, %v439_v10 }
  0x18   : > { %v441_v19 = vmul.f32 %v762_v9, %v440_v14  ;;  %v504_v14 = vld [vmem:[%s913_s5 + $0x8] sm:$0xff] }
  0x1a   : > { %v442_v24 = vadd.f32 %v762_v9, %v441_v19 }
  0x1c   : > { %v444_v29 = vsel %vm443_vm1, %v762_v9, %v442_v24 }
  0x80   : > { %v376_v11 = vpop.permute.xlu0 %375  ;;  %v499_v9 = vpop.permute.xlu1 %498 }
  0x88   : > { %v492_v6 = vpop.permute.xlu0 %491 }
  0x8e   : > { %v399_v12 = vpop.f32.mrf.mxu0  ;;  %v419_v13 = vpop.f32.mrf.mxu1 }
  0x8f   : > { %v400_v15 = vadd.f32 %v399_v12, %v376_v11  ;;  %v420_v16 = vadd.f32 %v419_v13, %v376_v11  ;;  %v503_v12 = vld [vmem:[%s913_s5] sm:$0xff] }
  0x91   : > { %422 = vst [vmem:[%s357_s25] sm:$0xff] %v400_v15  ;;  %v426_v17 = vrot.slane %v400_v15, 4  ;;  %v432_v18 = vrot.slane %v420_v16, 4 }
  0x92   : > { %423 = vst [vmem:[%s357_s25 + $0x8] sm:$0xff] %v420_v16 }
  0x93   : > { %v427_v20 = vadd.f32 %v426_v17, %v400_v15  ;;  %v433_v21 = vadd.f32 %v432_v18, %v420_v16 }
  0x95   : > { %v428_v22 = vrot.slane %v427_v20, 2  ;;  %v434_v23 = vrot.slane %v433_v21, 2 }
  0x97   : > { %v429_v25 = vadd.f32 %v428_v22, %v427_v20  ;;  %v435_v26 = vadd.f32 %v434_v23, %v433_v21  ;;  %v515_v20 = vpop.permute.xlu2 %514 }
  0x99   : > { %v430_v27 = vrot.slane %v429_v25, 1  ;;  %v436_v28 = vrot.slane %v435_v26, 1 }
  0x9b   : > { %v431_v30 = vadd.f32 %v430_v27, %v429_v25  ;;  %v437_v31 = vadd.f32 %v436_v28, %v435_v26 }
  0x9d   : > { %v445_v32 = vmul.f32 %v444_v29, %v431_v30  ;;  %v446_v33 = vmul.f32 %v444_v29, %v437_v31 }
  0x9f   : > { %v447_v34 = vsub.f32 %v400_v15, %v445_v32  ;;  %v448_v35 = vsub.f32 %v420_v16, %v446_v33  ;;  %v510_v15 = vpop.permute.xlu1 %509 }
  0xa1   : > { %v449_v36 = vmul.f32 %v447_v34, %v447_v34  ;;  %v450_v37 = vmul.f32 %v448_v35, %v448_v35 }
  0xa3   : > { %v451_v38 = vrot.slane %v449_v36, 4  ;;  %v457_v39 = vrot.slane %v450_v37, 4 }
  0xa5   : > { %v452_v40 = vadd.f32 %v451_v38, %v449_v36  ;;  %v458_v41 = vadd.f32 %v457_v39, %v450_v37 }
  0xa7   : > { %v453_v42 = vrot.slane %v452_v40, 2  ;;  %v459_v43 = vrot.slane %v458_v41, 2 }
  0xa9   : > { %v454_v44 = vadd.f32 %v453_v42, %v452_v40  ;;  %v460_v45 = vadd.f32 %v459_v43, %v458_v41 }
  0xab   : > { %v455_v46 = vrot.slane %v454_v44, 1  ;;  %v461_v47 = vrot.slane %v460_v45, 1 }
  0xad   : > { %v456_v48 = vadd.f32 %v455_v46, %v454_v44  ;;  %v462_v49 = vadd.f32 %v461_v47, %v460_v45 }
  0xaf   : > { %v463_v50 = vmul.f32 %v456_v48, %v444_v29  ;;  %v464_v51 = vmul.f32 %v462_v49, %v444_v29 }
  0xb1   : > { %v465_v52 = vadd.f32 1e-06, %v463_v50  ;;  %v466_v53 = vadd.f32 1e-06, %v464_v51 }
  0xb3   : > { %763 = vrsqrt.f32 %v465_v52  ;;  %vm473_vm4 = vweird.f32 %v465_v52  ;;  %vm483_vm6 = vweird.f32 %v466_v53 }
  0xb4   : > { %765 = vrsqrt.f32 %v466_v53 }
  0xb9   : > { %v764_v55 = vpop.eup %763 }
  0xba   : > { %v766_v56 = vpop.eup %765  ;;  %v468_v57 = vmul.f32 %v764_v55, %v465_v52  ;;  %vm474_vm2 = vweird.f32 %v764_v55 }
  0xbb   : > { %v478_v58 = vmul.f32 %v766_v56, %v466_v53  ;;  %vm484_vm3 = vweird.f32 %v766_v56  ;;  %vm475_vm5 = vmor %vm473_vm4, %vm474_vm2 }
  0xbc   : > { %v469_v59 = vmul.f32 %v764_v55, %v468_v57  ;;  %vm485_vm7 = vmor %vm483_vm6, %vm484_vm3 }
  0xbd   : > { %v479_v60 = vmul.f32 %v766_v56, %v478_v58 }
  0xbe   : > { %v470_v61 = vmul.f32 0.5, %v469_v59 }
  0xbf   : > { %v480_v62 = vmul.f32 0.5, %v479_v60 }
  0xc0   : > { %v471_v63 = vsub.f32 1.5, %v470_v61 }
  0xc1   : > { %v481_v0 = vsub.f32 1.5, %v480_v62 }
  0xc2   : > { %v472_v1 = vmul.f32 %v764_v55, %v471_v63 }
  0xc3   : > { %v482_v2 = vmul.f32 %v766_v56, %v481_v0 }
  0xc4   : > { %v476_v3 = vsel %vm475_vm5, %v764_v55, %v472_v1 }
  0xc5   : > { %v487_v4 = vmul.f32 %v476_v3, %v447_v34  ;;  %v486_v5 = vsel %vm485_vm7, %v766_v56, %v482_v2 }
  0xc6   : > { %v488_v7 = vmul.f32 %v486_v5, %v448_v35 }
  0xc7   : > { %v494_v8 = vmul.f32 %v492_v6, %v487_v4 }
  0xc8   : > { %v495_v10 = vmul.f32 %v492_v6, %v488_v7 }
  0xc9   : > { %v501_v11 = vadd.f32 %v499_v9, %v494_v8 }
  0xca   : > { %v502_v13 = vadd.f32 %v499_v9, %v495_v10 }
  0xcb   : > { %538 = vmatpush.msra.mxu2 %v501_v11 }
  0xcc   : > { %561 = vmatpush.msra.mxu3 %v502_v13  ;;  %723 = vmatmul.msk.f32.vlgmr.msra.gmra.mxu2 %vm378_vm0, %v503_v12 }
  0xcd   : > { %725 = vmatmul.msk.f32.vlgmr.msra.gmra.mxu3 %vm378_vm0, %v503_v12 }
  0xd4   : > { %724 = vmatmul.msk.f32.gmra.mxu2 %vm378_vm0, %v504_v14 }
  0xd5   : > { %726 = vmatmul.msk.f32.gmra.mxu3 %vm378_vm0, %v504_v14 }
 0x14f   : > { %v540_v16 = vpop.f32.mrf.mxu2 }
 0x150   : > { %v541_v17 = vadd.f32 %v540_v16, %v510_v15  ;;  %v563_v18 = vpop.f32.mrf.mxu3 }
 0x151   : > { %v564_v19 = vadd.f32 %v563_v18, %v510_v15 }
 0x152   : > { %569 = vst [vmem:[%s367_s17] sm:$0xff] %v541_v17 }
 0x153   : > { %570 = vst [vmem:[%s367_s17 + $0x8] sm:$0xff] %v564_v19 }
 0x157   : > { %v543_v21 = vpop.f32.mrf.mxu2 }
 0x158   : > { %v544_v22 = vadd.f32 %v543_v21, %v515_v20  ;;  %v566_v23 = vpop.f32.mrf.mxu3 }
 0x159   : > { %v567_v24 = vadd.f32 %v566_v23, %v515_v20 }
 0x15a   : > { %571 = vst [vmem:[%s367_s17 + $0x10] sm:$0xff] %v544_v22 }
 0x15b   : > { %572 = vst [vmem:[%s367_s17 + $0x18] sm:$0xff] %v567_v24 }
 0x15c PF: > { %s19_s29 = sadd.s32 1, %s789_s29   ;;  %s917_s27 = smov %s785_s28 }
 0x15d   : > { %p16_p5 = scmp.ge.s32.totalorder %s19_s29, 4   ;;  %s918_s28 = smov %s920_s30 }
 0x15f   :  { %18 = sbr.rel (!%p16_p5) target bundleno = 2 (0x2), region = 90 }

// kernel: invblock_forward.14
= control target key start
LH: loop header
LB: loop body
LE: loop exit
PB: predicated region body
PF: predicated region fallthrough
CT: control target
= control target key end

     0   :  { %s1178_s18 = smov 0   ;;  %s1180_s19 = smov 0   ;;  %s1285_s0 = inlined_call_operand.vmem [shape: f32[2,8,256], index: 0, kind: input, shape index: {}]   ;;  %s1286_s1 = inlined_call_operand.vmem [shape: f32[2,8,1], index: 1, kind: input, shape index: {}]   ;;  %s1287_s2 = inlined_call_operand.vmem [shape: f32[2,8,256], index: 2, kind: input, shape index: {}]   ;;  %s1288_s3 = inlined_call_operand.vmem [shape: f32[8,8], index: 3, kind: input, shape index: {}]   ;;  %s1289_s4 = inlined_call_operand.vmem [shape: f32[8,1], index: 4, kind: input, shape index: {}]   ;;  %s1290_s5 = inlined_call_operand.vmem [shape: f32[8,8], index: 5, kind: input, shape index: {}]   ;;  %s1291_s6 = inlined_call_operand.vmem [shape: f32[8,1], index: 6, kind: input, shape index: {}]   ;;  %s1292_s7 = inlined_call_operand.vmem [shape: f32[8,1], index: 7, kind: input, shape index: {}]   ;;  %s1293_s8 = inlined_call_operand.vmem [shape: f32[8,1], index: 8, kind: input, shape index: {}]   ;;  %s1294_s9 = inlined_call_operand.vmem [shape: f32[8,1], index: 9, kind: input, shape index: {}]   ;;  %s1295_s10 = inlined_call_operand.vmem [shape: f32[16,8], index: 10, kind: input, shape index: {}]   ;;  %s1296_s11 = inlined_call_operand.vmem [shape: f32[16,1], index: 11, kind: input, shape index: {}]   ;;  %s1297_s12 = inlined_call_operand.vmem [shape: f32[8,8], index: 12, kind: input, shape index: {}]   ;;  %s1298_s13 = inlined_call_operand.vmem [shape: f32[8,1], index: 13, kind: input, shape index: {}]   ;;  %s1299_s14 = inlined_call_operand.vmem [shape: f32[8,1], index: 14, kind: input, shape index: {}]   ;;  %s1300_s15 = inlined_call_operand.vmem [shape: f32[2,8,256], index: 15, kind: output, shape index: {}]  }
   0x1   :  { %s1182_s20 = smov 0  }
   0x2 LB: > { %s37_s21 = sadd.s32 1, %s1090_s19  ;;  %p1015_p0 = scmp.ge.s32.totalorder %s1094_s20, 1  ;;  %s1094_s20 = sphi %s1182_s20, %s25_s20   ;;  %s1090_s19 = sphi %s1180_s19, %s1302_s19   ;;  %s1086_s18 = sphi %s1178_s18, %s1301_s18  }
   0x3   : > { %p39_p1 = scmp.ge.s32.totalorder %s37_s21, 2  ;;  %p484_p2 = scmp.lt.s32.totalorder %s1094_s20, 3 }
   0x5   : > { %s1304_s21 = smov (%p39_p1, %s37_s21), 0  ;;  %p485_p3 = pnand %p1015_p0, %p484_p2 }
   0x6   : > { %p554_p4 = scmp.lt.s32.totalorder (!%p485_p3), %s1086_s18, 1 }
   0x7   : > { %488 = sbr.rel (%p485_p3) target bundleno = 738 (0x2e2), region = 80 }
   0xc   : > { %s1306_s18 = smov (!%p554_p4, %s1086_s18), 1  ;;  %v591_v0 = vld [vmem:[%s1288_s3] sm:$0xff]  ;;  %vm594_vm0 = vcmask 64512   ;;  %v1096_v2 = vmov 0   ;;  %v767_v7 = vld [vmem:[%s1296_s11 + $0x8] sm:$0xff]  ;;  %v1097_v20 = vmov 8.0  }
   0xd   : > { %s1018_s22 = sshll.u32 %s1306_s18, 3  ;;  %1063 = vset.pattern.permute.xlu0 %v1096_v2  ;;  %1064 = vset.pattern.permute.xlu1 %v1096_v2  ;;  %v593_v3 = vld [vmem:[%s1289_s4] sm:$0xff]  ;;  %1066 = vrcp.f32 %v1097_v20 }
   0xe   : > { %s566_s25 = scalar_lea.vmem %s1286_s1, %s1018_s22  ;;  %1065 = vset.pattern.permute.xlu2 %v1096_v2  ;;  %v627_v6 = vld [vmem:[%s1291_s6] sm:$0xff]  ;;  %s1227_s22 = sshll.u32 %s1306_s18, 4 }
   0xf   : > { %v592_v1 = vld [vmem:[%s566_s25] sm:$0xff]  ;;  %s561_s25 = scalar_lea.vmem %s1285_s0, %s1227_s22  ;;  %s575_s16 = scalar_lea.vmem %s1287_s2, %s1227_s22 }
  0x10   : > { %613 = vmatpush.msra.mxu0 %v592_v1  ;;  %v618_v8 = vld [vmem:[%s1292_s7] sm:$0xff]  ;;  %v588_v14 = vld [vmem:[%s561_s25 + $0x8] sm:$0xff]  ;;  %s585_s18 = scalar_lea.vmem %s1300_s15, %s1227_s22 }
  0x11   : > { %1023 = vmatmul.msk.f32.vlgmr.msra.gmra.mxu0 %vm594_vm0, %v591_v0  ;;  %678 = vperm.xlu1 %1064, %v618_v8   ;;  %v687_v9 = vld [vmem:[%s1293_s8] sm:$0xff]  ;;  %v590_v34 = vld [vmem:[%s575_s16 + $0x8] sm:$0xff] }
  0x12   : > { %v688_v10 = vld [vmem:[%s1294_s9] sm:$0xff] }
  0x13   : > { %761 = vperm.xlu2 %1065, %v688_v10   ;;  %v834_v11 = vld [vmem:[%s1298_s13] sm:$0xff]  ;;  %v1067_v21 = vpop.eup %1066 }
  0x14   : > { %v766_v12 = vld [vmem:[%s1296_s11] sm:$0xff]  ;;  %v702_v24 = vmul.f32 8.0, %v1067_v21  ;;  %vm706_vm1 = vweird.f32 %v1067_v21 }
  0x15   : > { %v587_v13 = vld [vmem:[%s561_s25] sm:$0xff] }
  0x16   : > { %v832_v15 = vld [vmem:[%s1299_s14] sm:$0xff]  ;;  %v703_v29 = vsub.f32 1.0, %v702_v24 }
  0x17   : > { %v619_v19 = vld [vmem:[%s1290_s5] sm:$0xff] }
  0x18   : > { %v589_v27 = vld [vmem:[%s575_s16] sm:$0xff]  ;;  %v704_v35 = vmul.f32 %v1067_v21, %v703_v29 }
  0x19   : > { %754 = vperm.xlu1 %1064, %v687_v9  }
  0x1a   : > { %v705_v40 = vadd.f32 %v1067_v21, %v704_v35 }
  0x1b   : > { %770 = vperm.xlu2 %1065, %v766_v12  }
  0x1c   : > { %v707_v45 = vsel %vm706_vm1, %v1067_v21, %v705_v40 }
  0x21   : > { %837 = vperm.xlu1 %1064, %v834_v11  }
  0x23   : > { %885 = vperm.xlu2 %1065, %v832_v15  }
  0x6d   : > { %v762_v24 = vpop.permute.xlu2 %761 }
  0x83   : > { %v679_v26 = vpop.permute.xlu1 %678 }
  0x8b   : > { %v755_v21 = vpop.permute.xlu1 %754 }
  0x8e   : > { %v615_v4 = vpop.f32.mrf.mxu0 }
  0x8f   : > { %v616_v5 = vadd.f32 %v615_v4, %v593_v3 }
  0x91   : > { %622 = vperm.xlu0 %1063, %v616_v5  }
  0x99   : > { %630 = vperm.xlu0 %1063, %v627_v6  }
  0xa1   : > { %775 = vperm.xlu0 %1063, %v767_v7  }
 0x103   : > { %v623_v16 = vpop.permute.xlu0 %622 }
 0x104   : > { %v625_v17 = vmul.f32 %v623_v16, %v587_v13  ;;  %v626_v18 = vmul.f32 %v623_v16, %v588_v14 }
 0x106   : > { %651 = vmatpush.msra.mxu1 %v625_v17  ;;  %671 = vmatpush.msra.mxu2 %v626_v18 }
 0x107   : > { %1024 = vmatmul.msk.f32.vlgmr.msra.gmra.mxu1 %vm594_vm0, %v619_v19  ;;  %1025 = vmatmul.msk.f32.vlgmr.msra.gmra.mxu2 %vm594_vm0, %v619_v19 }
 0x10b   : > { %v631_v22 = vpop.permute.xlu0 %630 }
 0x184   : > { %v653_v23 = vpop.f32.mrf.mxu1 }
 0x185   : > { %v654_v25 = vadd.f32 %v653_v23, %v631_v22 }
 0x187   : > { %v681_v28 = vmul.f32 %v679_v26, %v654_v25 }
 0x189   : > { %v1245_v30 = vadd.f32 %v681_v28, %v589_v27  ;;  %v685_v27 = vld [vmem:[%s1295_s10] sm:$0xff] }
 0x18a   : > { %v673_v31 = vpop.f32.mrf.mxu2 }
 0x18b   : > { %v689_v32 = vrot.slane %v1245_v30, 4  ;;  %v674_v33 = vadd.f32 %v673_v31, %v631_v22 }
 0x18d   : > { %v690_v36 = vadd.f32 %v689_v32, %v1245_v30  ;;  %v682_v37 = vmul.f32 %v679_v26, %v674_v33  ;;  %v686_v33 = vld [vmem:[%s1295_s10 + $0x8] sm:$0xff] }
 0x18f   : > { %v1249_v38 = vadd.f32 %v682_v37, %v590_v34  ;;  %v691_v39 = vrot.slane %v690_v36, 2  ;;  %v771_v37 = vpop.permute.xlu2 %770 }
 0x191   : > { %v695_v41 = vrot.slane %v1249_v38, 4  ;;  %v692_v42 = vadd.f32 %v691_v39, %v690_v36  ;;  %v776_v36 = vpop.permute.xlu0 %775 }
 0x193   : > { %v696_v43 = vadd.f32 %v695_v41, %v1249_v38  ;;  %v693_v44 = vrot.slane %v692_v42, 1 }
 0x195   : > { %v697_v46 = vrot.slane %v696_v43, 2  ;;  %v694_v47 = vadd.f32 %v693_v44, %v692_v42 }
 0x197   : > { %v708_v48 = vmul.f32 %v707_v45, %v694_v47  ;;  %v698_v49 = vadd.f32 %v697_v46, %v696_v43  ;;  %v833_v47 = vld [vmem:[%s1297_s12] sm:$0xff] }
 0x199   : > { %v710_v50 = vsub.f32 %v1245_v30, %v708_v48  ;;  %v699_v51 = vrot.slane %v698_v49, 1  ;;  %v838_v48 = vpop.permute.xlu1 %837 }
 0x19b   : > { %v712_v52 = vmul.f32 %v710_v50, %v710_v50  ;;  %v700_v53 = vadd.f32 %v699_v51, %v698_v49  ;;  %v886_v51 = vpop.permute.xlu2 %885 }
 0x19d   : > { %v714_v54 = vrot.slane %v712_v52, 4  ;;  %v709_v55 = vmul.f32 %v707_v45, %v700_v53 }
 0x19f   : > { %v715_v56 = vadd.f32 %v714_v54, %v712_v52  ;;  %v711_v57 = vsub.f32 %v1249_v38, %v709_v55 }
 0x1a1   : > { %v716_v58 = vrot.slane %v715_v56, 2  ;;  %v713_v59 = vmul.f32 %v711_v57, %v711_v57 }
 0x1a3   : > { %v717_v60 = vadd.f32 %v716_v58, %v715_v56  ;;  %v720_v61 = vrot.slane %v713_v59, 4 }
 0x1a5   : > { %v718_v62 = vrot.slane %v717_v60, 1  ;;  %v721_v63 = vadd.f32 %v720_v61, %v713_v59 }
 0x1a7   : > { %v719_v0 = vadd.f32 %v718_v62, %v717_v60  ;;  %v722_v1 = vrot.slane %v721_v63, 2 }
 0x1a9   : > { %v726_v2 = vmul.f32 %v719_v0, %v707_v45  ;;  %v723_v3 = vadd.f32 %v722_v1, %v721_v63 }
 0x1ab   : > { %v728_v4 = vadd.f32 1e-06, %v726_v2  ;;  %v724_v5 = vrot.slane %v723_v3, 1 }
 0x1ad   : > { %1068 = vrsqrt.f32 %v728_v4  ;;  %v725_v6 = vadd.f32 %v724_v5, %v723_v3  ;;  %vm736_vm3 = vweird.f32 %v728_v4 }
 0x1af   : > { %v727_v7 = vmul.f32 %v725_v6, %v707_v45 }
 0x1b1   : > { %v729_v8 = vadd.f32 1e-06, %v727_v7 }
 0x1b3   : > { %v1069_v9 = vpop.eup %1068  ;;  %1070 = vrsqrt.f32 %v729_v8  ;;  %vm746_vm6 = vweird.f32 %v729_v8 }
 0x1b4   : > { %v731_v10 = vmul.f32 %v1069_v9, %v728_v4  ;;  %vm737_vm2 = vweird.f32 %v1069_v9 }
 0x1b5   : > { %vm738_vm4 = vmor %vm736_vm3, %vm737_vm2 }
 0x1b6   : > { %v732_v11 = vmul.f32 %v1069_v9, %v731_v10 }
 0x1b8   : > { %v733_v12 = vmul.f32 0.5, %v732_v11 }
 0x1b9   : > { %v1071_v13 = vpop.eup %1070 }
 0x1ba   : > { %v734_v14 = vsub.f32 1.5, %v733_v12  ;;  %v741_v15 = vmul.f32 %v1071_v13, %v729_v8  ;;  %vm747_vm5 = vweird.f32 %v1071_v13 }
 0x1bb   : > { %vm748_vm7 = vmor %vm746_vm6, %vm747_vm5 }
 0x1bc   : > { %v735_v16 = vmul.f32 %v1069_v9, %v734_v14  ;;  %v742_v17 = vmul.f32 %v1071_v13, %v741_v15 }
 0x1be   : > { %v739_v18 = vsel %vm738_vm4, %v1069_v9, %v735_v16  ;;  %v743_v19 = vmul.f32 0.5, %v742_v17 }
 0x1bf   : > { %v750_v20 = vmul.f32 %v739_v18, %v710_v50 }
 0x1c0   : > { %v744_v22 = vsub.f32 1.5, %v743_v19 }
 0x1c1   : > { %v757_v23 = vmul.f32 %v755_v21, %v750_v20 }
 0x1c2   : > { %v745_v25 = vmul.f32 %v1071_v13, %v744_v22 }
 0x1c3   : > { %v764_v26 = vadd.f32 %v762_v24, %v757_v23 }
 0x1c4   : > { %v749_v28 = vsel %vm748_vm7, %v1071_v13, %v745_v25 }
 0x1c5   : > { %799 = vmatpush.msra.mxu3 %v764_v26  ;;  %v751_v29 = vmul.f32 %v749_v28, %v711_v57 }
 0x1c6   : > { %1026 = vmatmul.msk.f32.vlgmr.msra.gmra.mxu3 %vm594_vm0, %v685_v27 }
 0x1c7   : > { %v758_v31 = vmul.f32 %v755_v21, %v751_v29 }
 0x1c9   : > { %v765_v32 = vadd.f32 %v762_v24, %v758_v31 }
 0x1cb   : > { %822 = vmatpush.msrb.mxu0 %v765_v32 }
 0x1cc   : > { %1028 = vmatmul.msk.f32.vlgmr.msrb.gmra.mxu0 %vm594_vm0, %v685_v27 }
 0x1ce   : > { %1027 = vmatmul.msk.f32.gmra.mxu3 %vm594_vm0, %v686_v33 }
 0x1d4   : > { %1029 = vmatmul.msk.f32.gmra.mxu0 %vm594_vm0, %v686_v33 }
 0x249   : > { %v801_v34 = vpop.f32.mrf.mxu3  ;;  %v824_v35 = vpop.f32.mrf.mxu0 }
 0x24a   : > { %v802_v41 = vadd.f32 %v801_v34, %v771_v37  ;;  %v825_v42 = vadd.f32 %v824_v35, %v771_v37 }
 0x251   : > { %v804_v39 = vpop.f32.mrf.mxu3  ;;  %v827_v40 = vpop.f32.mrf.mxu0 }
 0x252   : > { %v805_v43 = vadd.f32 %v804_v39, %v776_v36  ;;  %v828_v44 = vadd.f32 %v827_v40, %v776_v36 }
 0x254   : > { %v830_v45 = vmul.f32 %v805_v43, %v802_v41  ;;  %v831_v46 = vmul.f32 %v828_v44, %v825_v42 }
 0x256   : > { %858 = vmatpush.msrb.mxu1 %v830_v45  ;;  %878 = vmatpush.msrb.mxu2 %v831_v46 }
 0x257   : > { %1030 = vmatmul.msk.f32.vlgmr.msrb.gmra.mxu1 %vm594_vm0, %v833_v47  ;;  %1031 = vmatmul.msk.f32.vlgmr.msrb.gmra.mxu2 %vm594_vm0, %v833_v47 }
 0x2d4   : > { %v860_v49 = vpop.f32.mrf.mxu1 }
 0x2d5   : > { %v861_v50 = vadd.f32 %v860_v49, %v838_v48 }
 0x2d7   : > { %v888_v52 = vmul.f32 %v886_v51, %v861_v50 }
 0x2d9   : > { %v890_v53 = vadd.f32 %v888_v52, %v1245_v30 }
 0x2da   : > { %v880_v54 = vpop.f32.mrf.mxu2 }
 0x2db   : > { %892 = vst [vmem:[%s585_s18] sm:$0xff] %v890_v53  ;;  %v881_v55 = vadd.f32 %v880_v54, %v838_v48 }
 0x2dd   : > { %v889_v56 = vmul.f32 %v886_v51, %v881_v55 }
 0x2df   : > { %v891_v57 = vadd.f32 %v889_v56, %v1249_v38 }
 0x2e1   : > { %893 = vst [vmem:[%s585_s18 + $0x8] sm:$0xff] %v891_v57 }
 0x2e2 PF: > { %s25_s20 = sadd.s32 1, %s1094_s20   ;;  %s1301_s18 = smov %s1090_s19 }
 0x2e3   : > { %p22_p5 = scmp.ge.s32.totalorder %s25_s20, 4   ;;  %s1302_s19 = smov %s1304_s21 }
 0x2e5   :  { %24 = sbr.rel (!%p22_p5) target bundleno = 2 (0x2), region = 116 }

// kernel: invblock_forward.11
= control target key start
LH: loop header
LB: loop body
LE: loop exit
PB: predicated region body
PF: predicated region fallthrough
CT: control target
= control target key end

     0   :  { %s1271_s21 = smov 0   ;;  %s1273_s22 = smov 0   ;;  %s1382_s0 = inlined_call_operand.vmem [shape: f32[2,8,256], index: 0, kind: input, shape index: {}]   ;;  %s1383_s1 = inlined_call_operand.vmem [shape: f32[2,8,1], index: 1, kind: input, shape index: {}]   ;;  %s1384_s2 = inlined_call_operand.vmem [shape: f32[2,8,256], index: 2, kind: input, shape index: {}]   ;;  %s1385_s3 = inlined_call_operand.vmem [shape: f32[2,8,256], index: 3, kind: input, shape index: {}]   ;;  %s1386_s4 = inlined_call_operand.vmem [shape: f32[8,8], index: 4, kind: input, shape index: {}]   ;;  %s1387_s5 = inlined_call_operand.vmem [shape: f32[8,1], index: 5, kind: input, shape index: {}]   ;;  %s1388_s6 = inlined_call_operand.vmem [shape: f32[8,8], index: 6, kind: input, shape index: {}]   ;;  %s1389_s7 = inlined_call_operand.vmem [shape: f32[8,1], index: 7, kind: input, shape index: {}]   ;;  %s1390_s8 = inlined_call_operand.vmem [shape: f32[8,1], index: 8, kind: input, shape index: {}]   ;;  %s1391_s9 = inlined_call_operand.vmem [shape: f32[8,1], index: 9, kind: input, shape index: {}]   ;;  %s1392_s10 = inlined_call_operand.vmem [shape: f32[8,1], index: 10, kind: input, shape index: {}]   ;;  %s1393_s11 = inlined_call_operand.vmem [shape: f32[16,8], index: 11, kind: input, shape index: {}]   ;;  %s1394_s12 = inlined_call_operand.vmem [shape: f32[16,1], index: 12, kind: input, shape index: {}]   ;;  %s1395_s13 = inlined_call_operand.vmem [shape: f32[8,8], index: 13, kind: input, shape index: {}]   ;;  %s1396_s14 = inlined_call_operand.vmem [shape: f32[8,1], index: 14, kind: input, shape index: {}]   ;;  %s1397_s15 = inlined_call_operand.vmem [shape: f32[8,1], index: 15, kind: input, shape index: {}]   ;;  %s1398_s16 = inlined_call_operand.vmem [shape: f32[2,8,256], index: 16, kind: output, shape index: {}]  }
   0x1   :  { %1399 = sst [smem:[#allocation2_spill]] %s1382_s0  ;;  %s1275_s23 = smov 0  }
   0x2 LB: > { %s38_s24 = sadd.s32 1, %s1178_s22  ;;  %p1100_p0 = scmp.ge.s32.totalorder %s1182_s23, 1  ;;  %s1182_s23 = sphi %s1275_s23, %s26_s23   ;;  %s1178_s22 = sphi %s1273_s22, %s1402_s22   ;;  %s1174_s21 = sphi %s1271_s21, %s1401_s21  }
   0x3   : > { %p40_p1 = scmp.ge.s32.totalorder %s38_s24, 2  ;;  %p526_p2 = scmp.lt.s32.totalorder %s1182_s23, 3 }
   0x5   : > { %s1404_s24 = smov (%p40_p1, %s38_s24), 0  ;;  %p527_p3 = pnand %p1100_p0, %p526_p2 }
   0x6   : > { %p607_p4 = scmp.lt.s32.totalorder (!%p527_p3), %s1174_s21, 1 }
   0x7   : > { %530 = sbr.rel (%p527_p3) target bundleno = 740 (0x2e4), region = 84 }
   0xc   : > { %s1406_s21 = smov (!%p607_p4, %s1174_s21), 1  ;;  %v654_v0 = vld [vmem:[%s1386_s4] sm:$0xff]  ;;  %vm657_vm0 = vcmask 64512   ;;  %v1184_v2 = vmov 0   ;;  %v830_v7 = vld [vmem:[%s1394_s12 + $0x8] sm:$0xff]  ;;  %v1185_v20 = vmov 8.0  }
   0xd   : > { %s1103_s25 = sshll.u32 %s1406_s21, 3  ;;  %1151 = vset.pattern.permute.xlu0 %v1184_v2  ;;  %1152 = vset.pattern.permute.xlu1 %v1184_v2  ;;  %v656_v3 = vld [vmem:[%s1387_s5] sm:$0xff]  ;;  %1154 = vrcp.f32 %v1185_v20 }
   0xe   : > { %s619_s28 = scalar_lea.vmem %s1383_s1, %s1103_s25  ;;  %1153 = vset.pattern.permute.xlu2 %v1184_v2  ;;  %v690_v6 = vld [vmem:[%s1389_s7] sm:$0xff]  ;;  %s1320_s25 = sshll.u32 %s1406_s21, 4 }
   0xf   : > { %v655_v1 = vld [vmem:[%s619_s28] sm:$0xff]  ;;  %s1400_s28 = sld [smem:[#allocation2_spill]]  ;;  %s628_s20 = scalar_lea.vmem %s1384_s2, %s1320_s25 }
  0x10   : > { %676 = vmatpush.msra.mxu0 %v655_v1  ;;  %v681_v8 = vld [vmem:[%s1390_s8] sm:$0xff]  ;;  %v653_v34 = vld [vmem:[%s628_s20 + $0x8] sm:$0xff]  ;;  %s638_s21 = scalar_lea.vmem %s1385_s3, %s1320_s25  ;;  %s648_s26 = scalar_lea.vmem %s1398_s16, %s1320_s25 }
  0x11   : > { %1110 = vmatmul.msk.f32.vlgmr.msra.gmra.mxu0 %vm657_vm0, %v654_v0  ;;  %741 = vperm.xlu1 %1152, %v681_v8   ;;  %v750_v9 = vld [vmem:[%s1391_s9] sm:$0xff] }
  0x12   : > { %v751_v10 = vld [vmem:[%s1392_s10] sm:$0xff] }
  0x13   : > { %824 = vperm.xlu2 %1153, %v751_v10   ;;  %v897_v11 = vld [vmem:[%s1396_s14] sm:$0xff]  ;;  %v1155_v21 = vpop.eup %1154 }
  0x14   : > { %v829_v12 = vld [vmem:[%s1394_s12] sm:$0xff]  ;;  %v765_v24 = vmul.f32 8.0, %v1155_v21  ;;  %vm769_vm1 = vweird.f32 %v1155_v21 }
  0x15   : > { %s614_s29 = scalar_lea.vmem %s1400_s28, %s1320_s25  ;;  %v895_v15 = vld [vmem:[%s1397_s15] sm:$0xff] }
  0x16   : > { %v650_v13 = vld [vmem:[%s614_s29] sm:$0xff]  ;;  %v651_v14 = vld [vmem:[%s614_s29 + $0x8] sm:$0xff]  ;;  %v766_v29 = vsub.f32 1.0, %v765_v24 }
  0x17   : > { %v682_v19 = vld [vmem:[%s1388_s6] sm:$0xff] }
  0x18   : > { %v652_v27 = vld [vmem:[%s628_s20] sm:$0xff]  ;;  %v767_v35 = vmul.f32 %v1155_v21, %v766_v29 }
  0x19   : > { %817 = vperm.xlu1 %1152, %v750_v9  }
  0x1a   : > { %v768_v40 = vadd.f32 %v1155_v21, %v767_v35 }
  0x1b   : > { %833 = vperm.xlu2 %1153, %v829_v12  }
  0x1c   : > { %v770_v45 = vsel %vm769_vm1, %v1155_v21, %v768_v40 }
  0x21   : > { %900 = vperm.xlu1 %1152, %v897_v11  }
  0x23   : > { %948 = vperm.xlu2 %1153, %v895_v15  }
  0x6d   : > { %v825_v24 = vpop.permute.xlu2 %824 }
  0x83   : > { %v742_v26 = vpop.permute.xlu1 %741 }
  0x8b   : > { %v818_v21 = vpop.permute.xlu1 %817 }
  0x8e   : > { %v678_v4 = vpop.f32.mrf.mxu0 }
  0x8f   : > { %v679_v5 = vadd.f32 %v678_v4, %v656_v3 }
  0x91   : > { %685 = vperm.xlu0 %1151, %v679_v5  }
  0x99   : > { %693 = vperm.xlu0 %1151, %v690_v6  }
  0xa1   : > { %838 = vperm.xlu0 %1151, %v830_v7  }
 0x103   : > { %v686_v16 = vpop.permute.xlu0 %685 }
 0x104   : > { %v688_v17 = vmul.f32 %v686_v16, %v650_v13  ;;  %v689_v18 = vmul.f32 %v686_v16, %v651_v14 }
 0x106   : > { %714 = vmatpush.msra.mxu1 %v688_v17  ;;  %734 = vmatpush.msra.mxu2 %v689_v18 }
 0x107   : > { %1111 = vmatmul.msk.f32.vlgmr.msra.gmra.mxu1 %vm657_vm0, %v682_v19  ;;  %1112 = vmatmul.msk.f32.vlgmr.msra.gmra.mxu2 %vm657_vm0, %v682_v19 }
 0x10b   : > { %v694_v22 = vpop.permute.xlu0 %693 }
 0x184   : > { %v716_v23 = vpop.f32.mrf.mxu1 }
 0x185   : > { %v717_v25 = vadd.f32 %v716_v23, %v694_v22 }
 0x187   : > { %v744_v28 = vmul.f32 %v742_v26, %v717_v25 }
 0x189   : > { %v1338_v30 = vadd.f32 %v744_v28, %v652_v27  ;;  %v748_v27 = vld [vmem:[%s1393_s11] sm:$0xff] }
 0x18a   : > { %v736_v31 = vpop.f32.mrf.mxu2 }
 0x18b   : > { %v752_v32 = vrot.slane %v1338_v30, 4  ;;  %v737_v33 = vadd.f32 %v736_v31, %v694_v22 }
 0x18d   : > { %v753_v36 = vadd.f32 %v752_v32, %v1338_v30  ;;  %v745_v37 = vmul.f32 %v742_v26, %v737_v33  ;;  %v749_v33 = vld [vmem:[%s1393_s11 + $0x8] sm:$0xff] }
 0x18f   : > { %v1342_v38 = vadd.f32 %v745_v37, %v653_v34  ;;  %v754_v39 = vrot.slane %v753_v36, 2  ;;  %v834_v37 = vpop.permute.xlu2 %833 }
 0x191   : > { %v758_v41 = vrot.slane %v1342_v38, 4  ;;  %v755_v42 = vadd.f32 %v754_v39, %v753_v36  ;;  %v839_v36 = vpop.permute.xlu0 %838 }
 0x193   : > { %v759_v43 = vadd.f32 %v758_v41, %v1342_v38  ;;  %v756_v44 = vrot.slane %v755_v42, 1 }
 0x195   : > { %v760_v46 = vrot.slane %v759_v43, 2  ;;  %v757_v47 = vadd.f32 %v756_v44, %v755_v42 }
 0x197   : > { %v771_v48 = vmul.f32 %v770_v45, %v757_v47  ;;  %v761_v49 = vadd.f32 %v760_v46, %v759_v43  ;;  %v896_v47 = vld [vmem:[%s1395_s13] sm:$0xff] }
 0x199   : > { %v773_v50 = vsub.f32 %v1338_v30, %v771_v48  ;;  %v762_v51 = vrot.slane %v761_v49, 1  ;;  %v901_v48 = vpop.permute.xlu1 %900 }
 0x19b   : > { %v775_v52 = vmul.f32 %v773_v50, %v773_v50  ;;  %v763_v53 = vadd.f32 %v762_v51, %v761_v49  ;;  %v949_v51 = vpop.permute.xlu2 %948 }
 0x19d   : > { %v777_v54 = vrot.slane %v775_v52, 4  ;;  %v772_v55 = vmul.f32 %v770_v45, %v763_v53  ;;  %v955_v53 = vld [vmem:[%s638_s21] sm:$0xff] }
 0x19f   : > { %v778_v56 = vadd.f32 %v777_v54, %v775_v52  ;;  %v774_v57 = vsub.f32 %v1342_v38, %v772_v55 }
 0x1a1   : > { %v779_v58 = vrot.slane %v778_v56, 2  ;;  %v776_v59 = vmul.f32 %v774_v57, %v774_v57 }
 0x1a3   : > { %v780_v60 = vadd.f32 %v779_v58, %v778_v56  ;;  %v783_v61 = vrot.slane %v776_v59, 4 }
 0x1a5   : > { %v781_v62 = vrot.slane %v780_v60, 1  ;;  %v784_v63 = vadd.f32 %v783_v61, %v776_v59  ;;  %v956_v59 = vld [vmem:[%s638_s21 + $0x8] sm:$0xff] }
 0x1a7   : > { %v782_v0 = vadd.f32 %v781_v62, %v780_v60  ;;  %v785_v1 = vrot.slane %v784_v63, 2 }
 0x1a9   : > { %v789_v2 = vmul.f32 %v782_v0, %v770_v45  ;;  %v786_v3 = vadd.f32 %v785_v1, %v784_v63 }
 0x1ab   : > { %v791_v4 = vadd.f32 1e-06, %v789_v2  ;;  %v787_v5 = vrot.slane %v786_v3, 1 }
 0x1ad   : > { %1156 = vrsqrt.f32 %v791_v4  ;;  %v788_v6 = vadd.f32 %v787_v5, %v786_v3  ;;  %vm799_vm3 = vweird.f32 %v791_v4 }
 0x1af   : > { %v790_v7 = vmul.f32 %v788_v6, %v770_v45 }
 0x1b1   : > { %v792_v8 = vadd.f32 1e-06, %v790_v7 }
 0x1b3   : > { %v1157_v9 = vpop.eup %1156  ;;  %1158 = vrsqrt.f32 %v792_v8  ;;  %vm809_vm6 = vweird.f32 %v792_v8 }
 0x1b4   : > { %v794_v10 = vmul.f32 %v1157_v9, %v791_v4  ;;  %vm800_vm2 = vweird.f32 %v1157_v9 }
 0x1b5   : > { %vm801_vm4 = vmor %vm799_vm3, %vm800_vm2 }
 0x1b6   : > { %v795_v11 = vmul.f32 %v1157_v9, %v794_v10 }
 0x1b8   : > { %v796_v12 = vmul.f32 0.5, %v795_v11 }
 0x1b9   : > { %v1159_v13 = vpop.eup %1158 }
 0x1ba   : > { %v797_v14 = vsub.f32 1.5, %v796_v12  ;;  %v804_v15 = vmul.f32 %v1159_v13, %v792_v8  ;;  %vm810_vm5 = vweird.f32 %v1159_v13 }
 0x1bb   : > { %vm811_vm7 = vmor %vm809_vm6, %vm810_vm5 }
 0x1bc   : > { %v798_v16 = vmul.f32 %v1157_v9, %v797_v14  ;;  %v805_v17 = vmul.f32 %v1159_v13, %v804_v15 }
 0x1be   : > { %v802_v18 = vsel %vm801_vm4, %v1157_v9, %v798_v16  ;;  %v806_v19 = vmul.f32 0.5, %v805_v17 }
 0x1bf   : > { %v813_v20 = vmul.f32 %v802_v18, %v773_v50 }
 0x1c0   : > { %v807_v22 = vsub.f32 1.5, %v806_v19 }
 0x1c1   : > { %v820_v23 = vmul.f32 %v818_v21, %v813_v20 }
 0x1c2   : > { %v808_v25 = vmul.f32 %v1159_v13, %v807_v22 }
 0x1c3   : > { %v827_v26 = vadd.f32 %v825_v24, %v820_v23 }
 0x1c4   : > { %v812_v28 = vsel %vm811_vm7, %v1159_v13, %v808_v25 }
 0x1c5   : > { %862 = vmatpush.msra.mxu3 %v827_v26  ;;  %v814_v29 = vmul.f32 %v812_v28, %v774_v57 }
 0x1c6   : > { %1113 = vmatmul.msk.f32.vlgmr.msra.gmra.mxu3 %vm657_vm0, %v748_v27 }
 0x1c7   : > { %v821_v31 = vmul.f32 %v818_v21, %v814_v29 }
 0x1c9   : > { %v828_v32 = vadd.f32 %v825_v24, %v821_v31 }
 0x1cb   : > { %885 = vmatpush.msrb.mxu0 %v828_v32 }
 0x1cc   : > { %1115 = vmatmul.msk.f32.vlgmr.msrb.gmra.mxu0 %vm657_vm0, %v748_v27 }
 0x1ce   : > { %1114 = vmatmul.msk.f32.gmra.mxu3 %vm657_vm0, %v749_v33 }
 0x1d4   : > { %1116 = vmatmul.msk.f32.gmra.mxu0 %vm657_vm0, %v749_v33 }
 0x249   : > { %v864_v34 = vpop.f32.mrf.mxu3  ;;  %v887_v35 = vpop.f32.mrf.mxu0 }
 0x24a   : > { %v865_v41 = vadd.f32 %v864_v34, %v834_v37  ;;  %v888_v42 = vadd.f32 %v887_v35, %v834_v37 }
 0x251   : > { %v867_v39 = vpop.f32.mrf.mxu3  ;;  %v890_v40 = vpop.f32.mrf.mxu0 }
 0x252   : > { %v868_v43 = vadd.f32 %v867_v39, %v839_v36  ;;  %v891_v44 = vadd.f32 %v890_v40, %v839_v36 }
 0x254   : > { %v893_v45 = vmul.f32 %v868_v43, %v865_v41  ;;  %v894_v46 = vmul.f32 %v891_v44, %v888_v42 }
 0x256   : > { %921 = vmatpush.msrb.mxu1 %v893_v45  ;;  %941 = vmatpush.msrb.mxu2 %v894_v46 }
 0x257   : > { %1117 = vmatmul.msk.f32.vlgmr.msrb.gmra.mxu1 %vm657_vm0, %v896_v47  ;;  %1118 = vmatmul.msk.f32.vlgmr.msrb.gmra.mxu2 %vm657_vm0, %v896_v47 }
 0x2d4   : > { %v923_v49 = vpop.f32.mrf.mxu1 }
 0x2d5   : > { %v924_v50 = vadd.f32 %v923_v49, %v901_v48 }
 0x2d7   : > { %v951_v52 = vmul.f32 %v949_v51, %v924_v50 }
 0x2d9   : > { %v953_v54 = vadd.f32 %v951_v52, %v1338_v30 }
 0x2da   : > { %v943_v55 = vpop.f32.mrf.mxu2 }
 0x2db   : > { %v957_v56 = vadd.f32 %v955_v53, %v953_v54  ;;  %v944_v57 = vadd.f32 %v943_v55, %v901_v48 }
 0x2dd   : > { %959 = vst [vmem:[%s648_s26] sm:$0xff] %v957_v56  ;;  %v952_v58 = vmul.f32 %v949_v51, %v944_v57 }
 0x2df   : > { %v954_v60 = vadd.f32 %v952_v58, %v1342_v38 }
 0x2e1   : > { %v958_v61 = vadd.f32 %v956_v59, %v954_v60 }
 0x2e3   : > { %960 = vst [vmem:[%s648_s26 + $0x8] sm:$0xff] %v958_v61 }
 0x2e4 PF: > { %s26_s23 = sadd.s32 1, %s1182_s23   ;;  %s1401_s21 = smov %s1178_s22 }
 0x2e5   : > { %p23_p5 = scmp.ge.s32.totalorder %s26_s23, 4   ;;  %s1402_s22 = smov %s1404_s24 }
 0x2e7   :  { %25 = sbr.rel (!%p23_p5) target bundleno = 2 (0x2), region = 123 }

// kernel: invblock_forward.17
= control target key start
LH: loop header
LB: loop body
LE: loop exit
PB: predicated region body
PF: predicated region fallthrough
CT: control target
= control target key end

     0   :  { %s1533_s27 = smov 0   ;;  %s1535_s28 = smov 0   ;;  %s1660_s0 = inlined_call_operand.vmem [shape: f32[2,8,256], index: 0, kind: input, shape index: {}]   ;;  %s1661_s1 = inlined_call_operand.vmem [shape: f32[2,8,1], index: 1, kind: input, shape index: {}]   ;;  %s1662_s2 = inlined_call_operand.vmem [shape: f32[2,8,256], index: 2, kind: input, shape index: {}]   ;;  %s1663_s3 = inlined_call_operand.vmem [shape: f32[2,8,256], index: 3, kind: input, shape index: {}]   ;;  %s1664_s4 = inlined_call_operand.vmem [shape: f32[2,8,256], index: 4, kind: input, shape index: {}]   ;;  %s1665_s5 = inlined_call_operand.vmem [shape: f32[8,8], index: 5, kind: input, shape index: {}]   ;;  %s1666_s6 = inlined_call_operand.vmem [shape: f32[8,1], index: 6, kind: input, shape index: {}]   ;;  %s1667_s7 = inlined_call_operand.vmem [shape: f32[8,8], index: 7, kind: input, shape index: {}]   ;;  %s1668_s8 = inlined_call_operand.vmem [shape: f32[8,1], index: 8, kind: input, shape index: {}]   ;;  %s1669_s9 = inlined_call_operand.vmem [shape: f32[8,1], index: 9, kind: input, shape index: {}]   ;;  %s1670_s10 = inlined_call_operand.vmem [shape: f32[8,1], index: 10, kind: input, shape index: {}]   ;;  %s1671_s11 = inlined_call_operand.vmem [shape: f32[8,1], index: 11, kind: input, shape index: {}]   ;;  %s1672_s12 = inlined_call_operand.vmem [shape: f32[16,8], index: 12, kind: input, shape index: {}]   ;;  %s1673_s13 = inlined_call_operand.vmem [shape: f32[16,1], index: 13, kind: input, shape index: {}]   ;;  %s1674_s14 = inlined_call_operand.vmem [shape: f32[8,8], index: 14, kind: input, shape index: {}]   ;;  %s1675_s15 = inlined_call_operand.vmem [shape: f32[8,1], index: 15, kind: input, shape index: {}]   ;;  %s1676_s16 = inlined_call_operand.vmem [shape: f32[8,1], index: 16, kind: input, shape index: {}]   ;;  %s1677_s17 = inlined_call_operand.vmem [shape: f32[2,8,256], index: 17, kind: output, shape index: {0}]   ;;  %s1678_s18 = inlined_call_operand.vmem [shape: f32[2,8,256], index: 18, kind: output, shape index: {1}]  }
   0x1   :  { %1679 = sst [smem:[#allocation2_spill]] %s1660_s0  ;;  %s1537_s29 = smov 0  }
   0x2   :  { %1680 = sst [smem:[#allocation3_spill]] %s1661_s1 }
   0x3   :  { %1681 = sst [smem:[#allocation4_spill]] %s1662_s2 }
   0x4 LB: > { %s41_s30 = sadd.s32 1, %s1430_s28  ;;  %p1332_p0 = scmp.ge.s32.totalorder %s1434_s29, 1  ;;  %s1434_s29 = sphi %s1537_s29, %s29_s29   ;;  %s1430_s28 = sphi %s1535_s28, %s1686_s28   ;;  %s1426_s27 = sphi %s1533_s27, %s1685_s27  }
   0x5   : > { %p43_p1 = scmp.ge.s32.totalorder %s41_s30, 2  ;;  %p598_p2 = scmp.lt.s32.totalorder %s1434_s29, 3 }
   0x7   : > { %s1688_s30 = smov (%p43_p1, %s41_s30), 0  ;;  %p599_p3 = pnand %p1332_p0, %p598_p2 }
   0x8   : > { %p701_p4 = scmp.lt.s32.totalorder (!%p599_p3), %s1426_s27, 1  ;;  %s1682_s21 = sld [smem:[#allocation3_spill]] (!%p599_p3) }
   0x9   : > { %602 = sbr.rel (%p599_p3) target bundleno = 742 (0x2e6), region = 88  ;;  %s1683_s26 = sld [smem:[#allocation2_spill]] (!%p599_p3) }
   0xa   : > { %s1684_s23 = sld [smem:[#allocation4_spill]] (!%p599_p3) }
   0xe   : > { %s1690_s27 = smov (!%p701_p4, %s1426_s27), 1  ;;  %v768_v0 = vld [vmem:[%s1665_s5] sm:$0xff]  ;;  %vm771_vm0 = vcmask 64512   ;;  %v1436_v36 = vmov 0   ;;  %v944_v41 = vld [vmem:[%s1673_s13 + $0x8] sm:$0xff]  ;;  %v1437_v54 = vmov 8.0  }
   0xf   : > { %s1551_s0 = sshll.u32 %s1690_s27, 4  ;;  %s1335_s19 = sshll.u32 %s1690_s27, 3  ;;  %1391 = vset.pattern.permute.xlu0 %v1436_v36  ;;  %1392 = vset.pattern.permute.xlu1 %v1436_v36  ;;  %v770_v37 = vld [vmem:[%s1666_s6] sm:$0xff] }
  0x10   : > { %s713_s22 = scalar_lea.vmem %s1682_s21, %s1335_s19  ;;  %s742_s24 = scalar_lea.vmem %s1664_s4, %s1551_s0  ;;  %1393 = vset.pattern.permute.xlu2 %v1436_v36  ;;  %v804_v40 = vld [vmem:[%s1668_s8] sm:$0xff] }
  0x11   : > { %v769_v1 = vld [vmem:[%s713_s22] sm:$0xff]  ;;  %v1070_v3 = vld [vmem:[%s742_s24 + $0x8] sm:$0xff]  ;;  %s752_s1 = scalar_lea.vmem %s1677_s17, %s1551_s0  ;;  %s708_s27 = scalar_lea.vmem %s1683_s26, %s1551_s0 }
  0x12   : > { %v1069_v2 = vld [vmem:[%s742_s24] sm:$0xff]  ;;  %790 = vmatpush.msra.mxu0 %v769_v1  ;;  %v1072_v5 = vsub.f32 0.0, %v1070_v3  ;;  %v765_v48 = vld [vmem:[%s708_s27 + $0x8] sm:$0xff]  ;;  %s722_s24 = scalar_lea.vmem %s1684_s23, %s1551_s0  ;;  %s732_s2 = scalar_lea.vmem %s1663_s3, %s1551_s0 }
  0x13   : > { %v1071_v4 = vsub.f32 0.0, %v1069_v2  ;;  %1346 = vmatmul.msk.f32.vlgmr.msra.gmra.mxu0 %vm771_vm0, %v768_v0  ;;  %v795_v42 = vld [vmem:[%s1669_s9] sm:$0xff]  ;;  %s762_s25 = scalar_lea.vmem %s1678_s18, %s1551_s0 }
  0x14   : > { %v1075_v7 = vmul.f32 1.442695, %v1072_v5  ;;  %855 = vperm.xlu1 %1392, %v795_v42   ;;  %v864_v43 = vld [vmem:[%s1670_s10] sm:$0xff] }
  0x15   : > { %v1073_v6 = vmul.f32 1.442695, %v1071_v4  ;;  %v865_v44 = vld [vmem:[%s1671_s11] sm:$0xff]  ;;  %v767_v4 = vld [vmem:[%s722_s24 + $0x8] sm:$0xff] }
  0x16   : > { %938 = vperm.xlu2 %1393, %v865_v44   ;;  %v1011_v45 = vld [vmem:[%s1675_s15] sm:$0xff] }
  0x17   : > { %1394 = vpow2.f32 %v1073_v6  ;;  %v943_v46 = vld [vmem:[%s1673_s13] sm:$0xff] }
  0x18   : > { %1396 = vpow2.f32 %v1075_v7  ;;  %v764_v47 = vld [vmem:[%s708_s27] sm:$0xff] }
  0x19   : > { %v1009_v49 = vld [vmem:[%s1676_s16] sm:$0xff] }
  0x1a   : > { %v796_v53 = vld [vmem:[%s1667_s7] sm:$0xff] }
  0x1b   : > { %v766_v61 = vld [vmem:[%s722_s24] sm:$0xff] }
  0x1c   : > { %931 = vperm.xlu1 %1392, %v864_v43  }
  0x1d   : > { %v1395_v8 = vpop.eup %1394 }
  0x1e   : > { %v1397_v9 = vpop.eup %1396  ;;  %v1077_v10 = vadd.f32 1.0, %v1395_v8  ;;  %947 = vperm.xlu2 %1393, %v943_v46  }
  0x1f   : > { %v1078_v11 = vadd.f32 1.0, %v1397_v9 }
  0x20   : > { %1398 = vrcp.f32 %v1077_v10  ;;  %vm1084_vm1 = vweird.f32 %v1077_v10  ;;  %v1090_v15 = vand.u32 2147483648, %v1077_v10  ;;  %v1088_v18 = vand.u32 2147483647, %v1077_v10 }
  0x21   : > { %1400 = vrcp.f32 %v1078_v11  ;;  %v1105_v19 = vand.u32 2147483648, %v1078_v11  ;;  %vm1099_vm3 = vweird.f32 %v1078_v11  ;;  %v1103_v21 = vand.u32 2147483647, %v1078_v11 }
  0x22   : > { %v1091_v23 = vor.u32 1.1754944e-38, %v1090_v15  ;;  %vm1089_vm6 = vcmp.eq.f32.partialorder %v1088_v18, 8.507059e+37  ;;  %1402 = vrcp.f32 %v1437_v54 }
  0x23   : > { %v1106_v26 = vor.u32 1.1754944e-38, %v1105_v19  ;;  %vm1104_vm8 = vcmp.eq.f32.partialorder %v1103_v21, 8.507059e+37 }
  0x24   : > { %1014 = vperm.xlu1 %1392, %v1011_v45  }
  0x26   : > { %v1399_v12 = vpop.eup %1398  ;;  %1062 = vperm.xlu2 %1393, %v1009_v49  }
  0x27   : > { %v1401_v13 = vpop.eup %1400  ;;  %v1080_v14 = vmul.f32 %v1399_v12, %v1077_v10  ;;  %vm1085_vm2 = vweird.f32 %v1399_v12 }
  0x28   : > { %v1095_v16 = vmul.f32 %v1401_v13, %v1078_v11  ;;  %vm1100_vm4 = vweird.f32 %v1401_v13  ;;  %vm1086_vm5 = vmor %vm1084_vm1, %vm1085_vm2  ;;  %v1403_v55 = vpop.eup %1402 }
  0x29   : > { %v1081_v17 = vsub.f32 1.0, %v1080_v14  ;;  %vm1101_vm7 = vmor %vm1099_vm3, %vm1100_vm4  ;;  %v879_v58 = vmul.f32 8.0, %v1403_v55  ;;  %vm883_vm9 = vweird.f32 %v1403_v55 }
  0x2a   : > { %v1096_v20 = vsub.f32 1.0, %v1095_v16 }
  0x2b   : > { %v1082_v22 = vmul.f32 %v1399_v12, %v1081_v17  ;;  %v880_v63 = vsub.f32 1.0, %v879_v58 }
  0x2c   : > { %v1097_v24 = vmul.f32 %v1401_v13, %v1096_v20 }
  0x2d   : > { %v1083_v25 = vadd.f32 %v1399_v12, %v1082_v22  ;;  %v881_v5 = vmul.f32 %v1403_v55, %v880_v63  ;;  %v862_v63 = vld [vmem:[%s1672_s12] sm:$0xff] }
  0x2e   : > { %v1098_v27 = vadd.f32 %v1401_v13, %v1097_v24 }
  0x2f   : > { %v1087_v28 = vsel %vm1086_vm5, %v1399_v12, %v1083_v25  ;;  %v882_v10 = vadd.f32 %v1403_v55, %v881_v5  ;;  %v863_v5 = vld [vmem:[%s1672_s12 + $0x8] sm:$0xff] }
  0x30   : > { %v1092_v29 = vsel %vm1089_vm6, %v1091_v23, %v1087_v28  ;;  %v1102_v30 = vsel %vm1101_vm7, %v1401_v13, %v1098_v27 }
  0x31   : > { %v1093_v31 = vmul.f32 2.0, %v1092_v29  ;;  %v1107_v32 = vsel %vm1104_vm8, %v1106_v26, %v1102_v30  ;;  %v884_v15 = vsel %vm883_vm9, %v1403_v55, %v882_v10 }
  0x32   : > { %v1108_v33 = vmul.f32 2.0, %v1107_v32 }
  0x33   : > { %v1568_v34 = vadd.f32 -1.0, %v1093_v31 }
  0x34   : > { %v1570_v35 = vadd.f32 -1.0, %v1108_v33 }
  0x35   : > { %1111 = vst [vmem:[%s752_s1] sm:$0xff] %v1568_v34 }
  0x36   : > { %1112 = vst [vmem:[%s752_s1 + $0x8] sm:$0xff] %v1570_v35 }
  0x86   : > { %v856_v60 = vpop.permute.xlu1 %855 }
  0x90   : > { %v792_v38 = vpop.f32.mrf.mxu0 }
  0x91   : > { %v793_v39 = vadd.f32 %v792_v38, %v770_v37 }
  0x93   : > { %799 = vperm.xlu0 %1391, %v793_v39  }
  0x9b   : > { %807 = vperm.xlu0 %1391, %v804_v40  }
  0xa3   : > { %952 = vperm.xlu0 %1391, %v944_v41  }
 0x105   : > { %v800_v50 = vpop.permute.xlu0 %799 }
 0x106   : > { %v802_v51 = vmul.f32 %v800_v50, %v764_v47  ;;  %v803_v52 = vmul.f32 %v800_v50, %v765_v48 }
 0x108   : > { %828 = vmatpush.msra.mxu1 %v802_v51  ;;  %848 = vmatpush.msra.mxu2 %v803_v52 }
 0x109   : > { %1347 = vmatmul.msk.f32.vlgmr.msra.gmra.mxu1 %vm771_vm0, %v796_v53  ;;  %1348 = vmatmul.msk.f32.vlgmr.msra.gmra.mxu2 %vm771_vm0, %v796_v53 }
 0x10d   : > { %v808_v56 = vpop.permute.xlu0 %807 }
 0x186   : > { %v830_v57 = vpop.f32.mrf.mxu1 }
 0x187   : > { %v831_v59 = vadd.f32 %v830_v57, %v808_v56  ;;  %v932_v57 = vpop.permute.xlu1 %931 }
 0x189   : > { %v858_v62 = vmul.f32 %v856_v60, %v831_v59 }
 0x18b   : > { %v1614_v0 = vadd.f32 %v858_v62, %v766_v61 }
 0x18c   : > { %v850_v1 = vpop.f32.mrf.mxu2 }
 0x18d   : > { %v866_v2 = vrot.slane %v1614_v0, 4  ;;  %v851_v3 = vadd.f32 %v850_v1, %v808_v56 }
 0x18f   : > { %v867_v6 = vadd.f32 %v866_v2, %v1614_v0  ;;  %v859_v7 = vmul.f32 %v856_v60, %v851_v3  ;;  %v939_v60 = vpop.permute.xlu2 %938 }
 0x191   : > { %v1618_v8 = vadd.f32 %v859_v7, %v767_v4  ;;  %v868_v9 = vrot.slane %v867_v6, 2 }
 0x193   : > { %v872_v11 = vrot.slane %v1618_v8, 4  ;;  %v869_v12 = vadd.f32 %v868_v9, %v867_v6  ;;  %v953_v9 = vpop.permute.xlu0 %952 }
 0x195   : > { %v873_v13 = vadd.f32 %v872_v11, %v1618_v8  ;;  %v870_v14 = vrot.slane %v869_v12, 1 }
 0x197   : > { %v874_v16 = vrot.slane %v873_v13, 2  ;;  %v871_v17 = vadd.f32 %v870_v14, %v869_v12  ;;  %v948_v10 = vpop.permute.xlu2 %947 }
 0x199   : > { %v885_v18 = vmul.f32 %v884_v15, %v871_v17  ;;  %v875_v19 = vadd.f32 %v874_v16, %v873_v13 }
 0x19b   : > { %v887_v20 = vsub.f32 %v1614_v0, %v885_v18  ;;  %v876_v21 = vrot.slane %v875_v19, 1 }
 0x19d   : > { %v889_v22 = vmul.f32 %v887_v20, %v887_v20  ;;  %v877_v23 = vadd.f32 %v876_v21, %v875_v19  ;;  %v1010_v19 = vld [vmem:[%s1674_s14] sm:$0xff]  ;;  %v1117_v21 = vmul.f32 1.442695, %v1570_v35  ;;  %v1114_v35 = vld [vmem:[%s732_s2 + $0x8] sm:$0xff] }
 0x19f   : > { %v891_v24 = vrot.slane %v889_v22, 4  ;;  %v886_v25 = vmul.f32 %v884_v15, %v877_v23  ;;  %v1015_v23 = vpop.permute.xlu1 %1014 }
 0x1a1   : > { %v892_v26 = vadd.f32 %v891_v24, %v889_v22  ;;  %v888_v27 = vsub.f32 %v1618_v8, %v886_v25  ;;  %v1113_v25 = vld [vmem:[%s732_s2] sm:$0xff] }
 0x1a3   : > { %v893_v28 = vrot.slane %v892_v26, 2  ;;  %v890_v29 = vmul.f32 %v888_v27, %v888_v27 }
 0x1a5   : > { %v894_v30 = vadd.f32 %v893_v28, %v892_v26  ;;  %v897_v31 = vrot.slane %v890_v29, 4 }
 0x1a7   : > { %v895_v32 = vrot.slane %v894_v30, 1  ;;  %v898_v33 = vadd.f32 %v897_v31, %v890_v29 }
 0x1a9   : > { %v896_v36 = vadd.f32 %v895_v32, %v894_v30  ;;  %v899_v37 = vrot.slane %v898_v33, 2 }
 0x1ab   : > { %v903_v38 = vmul.f32 %v896_v36, %v884_v15  ;;  %v900_v39 = vadd.f32 %v899_v37, %v898_v33 }
 0x1ad   : > { %v905_v40 = vadd.f32 1e-06, %v903_v38  ;;  %v901_v41 = vrot.slane %v900_v39, 1 }
 0x1af   : > { %1404 = vrsqrt.f32 %v905_v40  ;;  %v902_v42 = vadd.f32 %v901_v41, %v900_v39  ;;  %vm913_vm11 = vweird.f32 %v905_v40 }
 0x1b1   : > { %v904_v43 = vmul.f32 %v902_v42, %v884_v15 }
 0x1b3   : > { %v906_v44 = vadd.f32 1e-06, %v904_v43 }
 0x1b5   : > { %v1405_v45 = vpop.eup %1404  ;;  %1406 = vrsqrt.f32 %v906_v44  ;;  %vm923_vm14 = vweird.f32 %v906_v44 }
 0x1b6   : > { %v908_v46 = vmul.f32 %v1405_v45, %v905_v40  ;;  %vm914_vm10 = vweird.f32 %v1405_v45 }
 0x1b7   : > { %vm915_vm12 = vmor %vm913_vm11, %vm914_vm10 }
 0x1b8   : > { %v909_v47 = vmul.f32 %v1405_v45, %v908_v46 }
 0x1ba   : > { %v910_v48 = vmul.f32 0.5, %v909_v47 }
 0x1bb   : > { %v1407_v49 = vpop.eup %1406 }
 0x1bc   : > { %v911_v50 = vsub.f32 1.5, %v910_v48  ;;  %v918_v51 = vmul.f32 %v1407_v49, %v906_v44  ;;  %vm924_vm13 = vweird.f32 %v1407_v49 }
 0x1bd   : > { %vm925_vm15 = vmor %vm923_vm14, %vm924_vm13 }
 0x1be   : > { %v912_v52 = vmul.f32 %v1405_v45, %v911_v50  ;;  %v919_v53 = vmul.f32 %v1407_v49, %v918_v51 }
 0x1c0   : > { %v916_v54 = vsel %vm915_vm12, %v1405_v45, %v912_v52  ;;  %v920_v55 = vmul.f32 0.5, %v919_v53 }
 0x1c1   : > { %v927_v56 = vmul.f32 %v916_v54, %v887_v20  ;;  %v1115_v20 = vmul.f32 1.442695, %v1568_v34 }
 0x1c2   : > { %v921_v58 = vsub.f32 1.5, %v920_v55 }
 0x1c3   : > { %v934_v59 = vmul.f32 %v932_v57, %v927_v56  ;;  %1408 = vpow2.f32 %v1115_v20 }
 0x1c4   : > { %v922_v61 = vmul.f32 %v1407_v49, %v921_v58  ;;  %1410 = vpow2.f32 %v1117_v21 }
 0x1c5   : > { %v941_v62 = vadd.f32 %v939_v60, %v934_v59 }
 0x1c6   : > { %v926_v1 = vsel %vm925_vm15, %v1407_v49, %v922_v61 }
 0x1c7   : > { %976 = vmatpush.msra.mxu3 %v941_v62  ;;  %v928_v2 = vmul.f32 %v926_v1, %v888_v27  ;;  %v1063_v27 = vpop.permute.xlu2 %1062 }
 0x1c8   : > { %1349 = vmatmul.msk.f32.vlgmr.msra.gmra.mxu3 %vm771_vm0, %v862_v63 }
 0x1c9   : > { %v935_v3 = vmul.f32 %v932_v57, %v928_v2  ;;  %v1409_v22 = vpop.eup %1408 }
 0x1ca   : > { %v1119_v29 = vmul.f32 %v1409_v22, %v1113_v25  ;;  %v1411_v31 = vpop.eup %1410 }
 0x1cb   : > { %v942_v4 = vadd.f32 %v939_v60, %v935_v3  ;;  %v1120_v37 = vmul.f32 %v1411_v31, %v1114_v35 }
 0x1cd   : > { %999 = vmatpush.msrb.mxu0 %v942_v4 }
 0x1ce   : > { %1351 = vmatmul.msk.f32.vlgmr.msrb.gmra.mxu0 %vm771_vm0, %v862_v63 }
 0x1d0   : > { %1350 = vmatmul.msk.f32.gmra.mxu3 %vm771_vm0, %v863_v5 }
 0x1d6   : > { %1352 = vmatmul.msk.f32.gmra.mxu0 %vm771_vm0, %v863_v5 }
 0x24b   : > { %v978_v6 = vpop.f32.mrf.mxu3  ;;  %v1001_v7 = vpop.f32.mrf.mxu0 }
 0x24c   : > { %v979_v13 = vadd.f32 %v978_v6, %v948_v10  ;;  %v1002_v14 = vadd.f32 %v1001_v7, %v948_v10 }
 0x253   : > { %v981_v11 = vpop.f32.mrf.mxu3  ;;  %v1004_v12 = vpop.f32.mrf.mxu0 }
 0x254   : > { %v982_v15 = vadd.f32 %v981_v11, %v953_v9  ;;  %v1005_v16 = vadd.f32 %v1004_v12, %v953_v9 }
 0x256   : > { %v1007_v17 = vmul.f32 %v982_v15, %v979_v13  ;;  %v1008_v18 = vmul.f32 %v1005_v16, %v1002_v14 }
 0x258   : > { %1035 = vmatpush.msrb.mxu1 %v1007_v17  ;;  %1055 = vmatpush.msrb.mxu2 %v1008_v18 }
 0x259   : > { %1353 = vmatmul.msk.f32.vlgmr.msrb.gmra.mxu1 %vm771_vm0, %v1010_v19  ;;  %1354 = vmatmul.msk.f32.vlgmr.msrb.gmra.mxu2 %vm771_vm0, %v1010_v19 }
 0x2d6   : > { %v1037_v24 = vpop.f32.mrf.mxu1 }
 0x2d7   : > { %v1038_v26 = vadd.f32 %v1037_v24, %v1015_v23 }
 0x2d9   : > { %v1065_v28 = vmul.f32 %v1063_v27, %v1038_v26 }
 0x2db   : > { %v1067_v30 = vadd.f32 %v1065_v28, %v1614_v0 }
 0x2dc   : > { %v1057_v34 = vpop.f32.mrf.mxu2 }
 0x2dd   : > { %v1121_v32 = vadd.f32 %v1119_v29, %v1067_v30  ;;  %v1058_v33 = vadd.f32 %v1057_v34, %v1015_v23 }
 0x2df   : > { %1123 = vst [vmem:[%s762_s25] sm:$0xff] %v1121_v32  ;;  %v1066_v36 = vmul.f32 %v1063_v27, %v1058_v33 }
 0x2e1   : > { %v1068_v38 = vadd.f32 %v1066_v36, %v1618_v8 }
 0x2e3   : > { %v1122_v39 = vadd.f32 %v1120_v37, %v1068_v38 }
 0x2e5   : > { %1124 = vst [vmem:[%s762_s25 + $0x8] sm:$0xff] %v1122_v39 }
 0x2e6 PF: > { %s29_s29 = sadd.s32 1, %s1434_s29   ;;  %s1685_s27 = smov %s1430_s28 }
 0x2e7   : > { %p26_p5 = scmp.ge.s32.totalorder %s29_s29, 4   ;;  %s1686_s28 = smov %s1688_s30 }
 0x2e9   :  { %28 = sbr.rel (!%p26_p5) target bundleno = 4 (0x4), region = 142 }

</bundles_post_ra>
